<compile_context>
chip_gen: v5e
topology: v5e:2x2
jax: 0.10.0
libtpu: 0.0.40
codegen_flags: <defaults>
</compile_context>

<pallas_src>
import functools

import jax
import jax.numpy as jnp
from jax.experimental import pallas as pl
from jax.experimental.pallas import tpu as pltpu

# ---- module hyper-parameters (from __init__) --------------------------------
CH_IN = 3
CONV1_CH = 16
CONV2_CH = 20
NODE = 64                    # node_size
N_HEADS = 3
SP_DIM = 2                   # sp_coord_dim
OUT_DIM = 5
HW = 7                       # module hard-codes N = 7**2
N_NODES = HW * HW            # 49
NPAD = 56                    # nodes padded to a sublane multiple (49 -> 56)
PROJ_IN = CONV2_CH + SP_DIM  # 22
PROJ_OUT = N_HEADS * NODE    # 192
HEAD_PITCH = 128             # lanes per head in the packed slabs
QK_W = N_HEADS * HEAD_PITCH  # 384  ([Q_h | K_h] per head)
ATT_W = N_HEADS * HEAD_PITCH # 384  (attention logits, 49 real per head pitch)
PACK_W = 2 * QK_W            # 768  (QK region + zero-padded V region)
OUT_PAD = 128                # output lanes (5 valid, lane-dense store)
EPS = 1e-5                   # torch.nn.LayerNorm default eps
NEG = -1e30                  # softmax pad-column bias
MAX_B_TILE = 8
XCH = CH_IN + 3              # input channels + [xc, yc, valid]


def _elu(z):
    return jnp.where(z > 0, z, jnp.exp(jnp.minimum(z, 0.0)) - 1.0)


def relational_kernel(x_ref, w1_ref, b1_ref, w2_ref, b2_ref, wp_ref,
                      g_ref, beta_ref, wqk_ref, bqk_ref, wa_ref, ba_ref,
                      wl1_ref, bl1_ref, wl2_ref, bl2_ref, o_ref, *, bt):
    f32 = jnp.float32
    rows = bt * NPAD

    # ---- conv1 / conv2 (1x1 convs == per-node channel matmuls) --------------
    # [xc, yc, valid] ride through both relus via identity columns (all >= 0).
    x = x_ref[...]                                                    # (rows, 6)
    h1 = jnp.maximum(jnp.dot(x, w1_ref[...], preferred_element_type=f32) + b1_ref[...], 0.0)
    h2 = jnp.maximum(jnp.dot(h1, w2_ref[...], preferred_element_type=f32) + b2_ref[...], 0.0)

    # ---- fused Q/K/V projection (coords + bias folded into the weight) -------
    proj = jnp.dot(h2, wp_ref[...], preferred_element_type=f32)       # (rows, 768)

    # ---- batched LayerNorm statistics (per sample, over all heads) -----------
    r_idx = jax.lax.broadcasted_iota(jnp.int32, (bt, rows), 1)
    s_idx = jax.lax.broadcasted_iota(jnp.int32, (bt, rows), 0)
    seg = ((r_idx >= s_idx * NPAD)
           & (r_idx < s_idx * NPAD + N_NODES)).astype(f32)            # (bt, rows)
    lane = jax.lax.broadcasted_iota(jnp.int32, (1, QK_W), 1)
    qmask = (lane % HEAD_PITCH < NODE).astype(f32)                    # 1 on Q lanes

    csum = jnp.dot(seg, proj, preferred_element_type=f32)             # (bt, 768)
    csum2 = jnp.dot(seg, proj * proj, preferred_element_type=f32)     # (bt, 768)

    inv_cnt = 1.0 / float(N_NODES * PROJ_OUT)                         # 1 / 9408

    def moments(s1, s2):                                              # single-pass stats
        mu = s1 * inv_cnt
        return mu, jax.lax.rsqrt(s2 * inv_cnt - mu * mu + EPS)

    cq, cv = csum[:, :QK_W], csum[:, QK_W:]
    c2q, c2v = csum2[:, :QK_W], csum2[:, QK_W:]
    s_q = jnp.sum(cq * qmask, axis=1, keepdims=True)
    s2_q = jnp.sum(c2q * qmask, axis=1, keepdims=True)
    mu_q, inv_q = moments(s_q, s2_q)
    mu_k, inv_k = moments(jnp.sum(cq, axis=1, keepdims=True) - s_q,
                          jnp.sum(c2q, axis=1, keepdims=True) - s2_q)
    mu_v, inv_v = moments(jnp.sum(cv, axis=1, keepdims=True),
                          jnp.sum(c2v, axis=1, keepdims=True))

    mu_qk = mu_k + (mu_q - mu_k) * qmask                              # (bt, 384)
    inv_qk = inv_k + (inv_q - inv_k) * qmask
    mu_full = jnp.concatenate([mu_qk, jnp.broadcast_to(mu_v, (bt, QK_W))], axis=1)
    inv_full = jnp.concatenate([inv_qk, jnp.broadcast_to(inv_v, (bt, QK_W))], axis=1)

    # LN affine over a free (bt, 56, 768) view; gamma/beta pad rows are zero so
    # padded node rows of qk_n / v_n are exactly zero.
    proj3 = proj.reshape(bt, NPAD, PACK_W)
    normed = ((proj3 - mu_full[:, None, :]) * inv_full[:, None, :]
              * g_ref[...][None] + beta_ref[...][None]).reshape(rows, PACK_W)
    qk_n, v_n = normed[:, :QK_W], normed[:, QK_W:]

    # ---- relational attention: all heads via block-diagonal packed weights ---
    a1 = _elu(jnp.dot(qk_n, wqk_ref[...], preferred_element_type=f32) + bqk_ref[...])
    a2 = jnp.dot(a1, wa_ref[...], preferred_element_type=f32) + ba_ref[...]   # (rows, 384)
    vp = jnp.dot(v_n, wl1_ref[...], preferred_element_type=f32)              # (rows, 192)

    e_acc = jnp.zeros((bt, NPAD, NODE), f32)
    for h in range(N_HEADS):
        blk = a2[:, h * HEAD_PITCH:(h + 1) * HEAD_PITCH]              # (rows, 128)
        blk = blk - jnp.max(blk, axis=1, keepdims=True)               # pad cols ~ -1e30
        prob = jnp.exp(blk)
        prob = prob * pl.reciprocal(jnp.sum(prob, axis=1, keepdims=True), approx=True)
        a3 = prob[:, :NPAD].reshape(bt, NPAD, NPAD)                   # per-sample A_h
        vp3 = vp[:, h * NODE:(h + 1) * NODE].reshape(bt, NPAD, NODE)  # per-sample V_h @ W1_h
        e_acc = e_acc + jnp.einsum('bnc,bcd->bnd', a3, vp3,
                                   preferred_element_type=f32)

    # ---- linear1 bias + relu, per-sample LayerNorm (no affine), node max -----
    node_id = jax.lax.broadcasted_iota(jnp.int32, (bt, NPAD, 1), 1)
    valid = (node_id < N_NODES).astype(f32).reshape(rows, 1)
    e = jnp.maximum(e_acc.reshape(rows, NODE) + bl1_ref[...], 0.0) * valid

    ss = jnp.dot(seg, jnp.concatenate([e, e * e], axis=1),
                 preferred_element_type=f32)                          # (bt, 128)
    inv_cnt1 = 1.0 / float(N_NODES * NODE)
    mu1 = jnp.sum(ss[:, :NODE], axis=1, keepdims=True) * inv_cnt1
    inv1 = jax.lax.rsqrt(jnp.sum(ss[:, NODE:], axis=1, keepdims=True) * inv_cnt1
                         - mu1 * mu1 + EPS)
    # relu output >= 0, so the node-max commutes with the (monotone) LN.
    em = (jnp.max(e.reshape(bt, NPAD, NODE), axis=1) - mu1) * inv1    # (bt, 64)

    y = jnp.dot(em, wl2_ref[...], preferred_element_type=f32) + bl2_ref[...]
    o_ref[...] = _elu(y)[None]                                        # (1, bt, 128)


# ------------------------------ wrapper --------------------------------------
def _spatial_features():
    # per-node [xc, yc, valid]; nodes padded 49 -> 56 with all-zero rows.
    xs = jnp.arange(HW, dtype=jnp.float32) / HW
    xc = jnp.tile(xs[None, :], (HW, 1)).reshape(N_NODES)
    yc = jnp.tile(xs[:, None], (1, HW)).reshape(N_NODES)
    feats = jnp.stack([xc, yc, jnp.ones((N_NODES,), jnp.float32)], axis=-1)
    return jnp.pad(feats, ((0, NPAD - N_NODES), (0, 0)))              # (56, 3)


def _pack_params(p):
    """Repack module params into the kernel's fused / lane-aligned layout."""
    f32 = jnp.float32
    eye3 = jnp.eye(3, dtype=f32)

    # conv weights augmented with identity columns carrying [xc, yc, valid].
    w1a = jnp.zeros((CH_IN + 3, CONV1_CH + 3), f32)
    w1a = w1a.at[:CH_IN, :CONV1_CH].set(p['w1']).at[CH_IN:, CONV1_CH:].set(eye3)
    b1a = jnp.concatenate([p['b1'], jnp.zeros((3,), f32)])[None, :]
    w2a = jnp.zeros((CONV1_CH + 3, CONV2_CH + 3), f32)
    w2a = w2a.at[:CONV1_CH, :CONV2_CH].set(p['w2']).at[CONV1_CH:, CONV2_CH:].set(eye3)
    b2a = jnp.concatenate([p['b2'], jnp.zeros((3,), f32)])[None, :]

    # fused K/Q/V projection, lanes laid out as
    #   [Q_h0 K_h0 | Q_h1 K_h1 | Q_h2 K_h2 | V_h0 0 | V_h1 0 | V_h2 0]   (64 each)
    # rows: 20 conv2 channels, xc, yc, then the bias row (applied via `valid`).
    zero_w = jnp.zeros((PROJ_IN, NODE), f32)
    zero_b = jnp.zeros((NODE,), f32)
    w_cols, b_cols = [], []
    for h in range(N_HEADS):
        sl = slice(h * NODE, (h + 1) * NODE)
        w_cols += [p['wq'][:, sl], p['wk'][:, sl]]
        b_cols += [p['bq'][sl], p['bk'][sl]]
    for h in range(N_HEADS):
        sl = slice(h * NODE, (h + 1) * NODE)
        w_cols += [p['wv'][:, sl], zero_w]
        b_cols += [p['bv'][sl], zero_b]
    w_full = jnp.concatenate(w_cols, axis=1)                          # (22, 768)
    b_full = jnp.concatenate(b_cols, axis=0)[None, :]                 # (1, 768)
    wp = jnp.concatenate([w_full, b_full], axis=0)                    # (23, 768)

    def pack_pair(a, b):   # two (3,49,64) tensors -> (56, 384), head-interleaved
        m = jnp.concatenate([x for h in range(N_HEADS) for x in (a[h], b[h])], axis=1)
        return jnp.pad(m, ((0, NPAD - N_NODES), (0, 0)))

    zero_g = jnp.zeros((N_HEADS, N_NODES, NODE), f32)
    g_full = jnp.concatenate([pack_pair(p['q_gamma'], p['k_gamma']),
                              pack_pair(p['v_gamma'], zero_g)], axis=1)       # (56, 768)
    beta_full = jnp.concatenate([pack_pair(p['q_beta'], p['k_beta']),
                                 pack_pair(p['v_beta'], zero_g)], axis=1)

    # block-diagonal per-head attention linears at the 128-lane head pitch.
    w_qk = jnp.zeros((QK_W, ATT_W), f32)
    b_qk = jnp.zeros((1, ATT_W), f32)
    w_a = jnp.zeros((ATT_W, ATT_W), f32)
    b_a = jnp.full((1, ATT_W), NEG, f32)          # pad cols -> softmax weight 0
    w_l1 = jnp.zeros((ATT_W, PROJ_OUT), f32)
    for h in range(N_HEADS):
        o = h * HEAD_PITCH
        w_qk = w_qk.at[o:o + NODE, o:o + N_NODES].set(p['wql'])
        w_qk = w_qk.at[o + NODE:o + 2 * NODE, o:o + N_NODES].set(p['wkl'])
        b_qk = b_qk.at[0, o:o + N_NODES].set(p['bql'] + p['bkl'])
        w_a = w_a.at[o:o + N_NODES, o:o + N_NODES].set(p['wal'])
        b_a = b_a.at[0, o:o + N_NODES].set(p['bal'])
        w_l1 = w_l1.at[o:o + NODE, h * NODE:(h + 1) * NODE].set(
            p['wl1'][h * NODE:(h + 1) * NODE])

    w_l2 = jnp.pad(p['wl2'], ((0, 0), (0, OUT_PAD - OUT_DIM)))
    b_l2 = jnp.pad(p['bl2'], (0, OUT_PAD - OUT_DIM))[None, :]

    return dict(w1=w1a, b1=b1a, w2=w2a, b2=b2a, wp=wp, g=g_full, beta=beta_full,
                w_qk=w_qk, b_qk=b_qk, w_a=w_a, b_a=b_a,
                w_l1=w_l1, b_l1=p['bl1'][None, :], w_l2=w_l2, b_l2=b_l2)


@jax.jit
def multi_head_relational_forward(x_nchw, p):
    B = x_nchw.shape[0]
    assert x_nchw.shape[1:] == (CH_IN, HW, HW)
    # batch tile: as big as reasonable, but >= 2 grid steps when B >= 2 so both
    # v7x TensorCores get work.
    if B <= 1:
        bt = 1
    elif B <= 2 * MAX_B_TILE:
        bt = (B + 1) // 2
    else:
        bt = MAX_B_TILE
    n_steps = pl.cdiv(B, bt)
    b_pad = n_steps * bt

    # NHWC, flatten spatially, append [xc, yc, valid], pad nodes 49 -> 56 and
    # batch to a tile multiple.
    xf = jnp.transpose(x_nchw, (0, 2, 3, 1)).reshape(B, N_NODES, CH_IN).astype(jnp.float32)
    xf = jnp.pad(xf, ((0, b_pad - B), (0, NPAD - N_NODES), (0, 0)))
    feats = jnp.broadcast_to(_spatial_features()[None], (b_pad, NPAD, 3))
    xf = jnp.concatenate([xf, feats], axis=-1).reshape(b_pad * NPAD, XCH)

    pk = _pack_params(p)
    args = (xf, pk['w1'], pk['b1'], pk['w2'], pk['b2'], pk['wp'],
            pk['g'], pk['beta'], pk['w_qk'], pk['b_qk'], pk['w_a'], pk['b_a'],
            pk['w_l1'], pk['b_l1'], pk['w_l2'], pk['b_l2'])

    in_specs = [pl.BlockSpec((bt * NPAD, XCH), lambda b: (b, 0))] + \
               [pl.BlockSpec(a.shape, lambda b: (0, 0)) for a in args[1:]]
    out_specs = pl.BlockSpec((1, bt, OUT_PAD), lambda b: (b, 0, 0))

    y = pl.pallas_call(
        functools.partial(relational_kernel, bt=bt),
        grid=(n_steps,),
        in_specs=in_specs,
        out_specs=out_specs,
        out_shape=jax.ShapeDtypeStruct((n_steps, bt, OUT_PAD), jnp.float32),
        compiler_params=pltpu.CompilerParams(
            dimension_semantics=("parallel",),
            vmem_limit_bytes=40 * 1024 * 1024),
    )(*args)
    return y.reshape(b_pad, OUT_PAD)[:B, :OUT_DIM]


# --------------------------- params / reference -------------------------------
def init_params(key):
    ks = jax.random.split(key, 26)
    w = lambda k, shape, s=0.1: (s * jax.random.normal(k, shape)).astype(jnp.float32)
    p = {}
    p['w1'], p['b1'] = w(ks[0], (CH_IN, CONV1_CH)), w(ks[1], (CONV1_CH,))
    p['w2'], p['b2'] = w(ks[2], (CONV1_CH, CONV2_CH)), w(ks[3], (CONV2_CH,))
    p['wk'], p['bk'] = w(ks[4], (PROJ_IN, PROJ_OUT)), w(ks[5], (PROJ_OUT,))
    p['wq'], p['bq'] = w(ks[6], (PROJ_IN, PROJ_OUT)), w(ks[7], (PROJ_OUT,))
    p['wv'], p['bv'] = w(ks[8], (PROJ_IN, PROJ_OUT)), w(ks[9], (PROJ_OUT,))
    shp = (N_HEADS, N_NODES, NODE)
    p['k_gamma'], p['k_beta'] = 1.0 + w(ks[10], shp), w(ks[11], shp)
    p['q_gamma'], p['q_beta'] = 1.0 + w(ks[12], shp), w(ks[13], shp)
    p['v_gamma'], p['v_beta'] = 1.0 + w(ks[14], shp), w(ks[15], shp)
    p['wql'], p['bql'] = w(ks[16], (NODE, N_NODES)), w(ks[17], (N_NODES,))
    p['wkl'], p['bkl'] = w(ks[18], (NODE, N_NODES)), w(ks[19], (N_NODES,))
    p['wal'], p['bal'] = w(ks[20], (N_NODES, N_NODES)), w(ks[21], (N_NODES,))
    p['wl1'], p['bl1'] = w(ks[22], (PROJ_OUT, NODE)), w(ks[23], (NODE,))
    p['wl2'], p['bl2'] = w(ks[24], (NODE, OUT_DIM)), w(ks[25], (OUT_DIM,))
    return p


def reference_forward(x_nchw, p):
    """Pure-JAX replica of the PyTorch forward (for correctness checking)."""
    B, Cin, H, W = x_nchw.shape
    Nn = H * W
    x = jax.nn.relu(jnp.einsum('bchw,cd->bdhw', x_nchw, p['w1']) + p['b1'][None, :, None, None])
    x = jax.nn.relu(jnp.einsum('bchw,cd->bdhw', x, p['w2']) + p['b2'][None, :, None, None])
    xc = jnp.tile((jnp.arange(W, dtype=jnp.float32) / W)[None, :], (H, 1))
    yc = jnp.tile((jnp.arange(H, dtype=jnp.float32) / H)[:, None], (1, W))
    sp = jnp.broadcast_to(jnp.stack([xc, yc], 0)[None], (B, 2, H, W))
    x = jnp.concatenate([x, sp], axis=1)
    x = jnp.transpose(x, (0, 2, 3, 1)).reshape(B, Nn, -1)

    split = lambda t: jnp.transpose(t.reshape(B, Nn, N_HEADS, NODE), (0, 2, 1, 3))

    def ln(z, g, b, axes):
        mu = z.mean(axis=axes, keepdims=True)
        var = ((z - mu) ** 2).mean(axis=axes, keepdims=True)
        zn = (z - mu) / jnp.sqrt(var + EPS)
        return zn if g is None else zn * g + b

    K = ln(split(x @ p['wk'] + p['bk']), p['k_gamma'], p['k_beta'], (1, 2, 3))
    Q = ln(split(x @ p['wq'] + p['bq']), p['q_gamma'], p['q_beta'], (1, 2, 3))
    V = ln(split(x @ p['wv'] + p['bv']), p['v_gamma'], p['v_beta'], (1, 2, 3))

    A = jax.nn.elu(Q @ p['wql'] + p['bql'] + K @ p['wkl'] + p['bkl'])
    A = A @ p['wal'] + p['bal']
    A = jax.nn.softmax(A, axis=3)
    E = jnp.einsum('bhfc,bhcd->bhfd', A, V)
    E = jnp.transpose(E, (0, 2, 1, 3)).reshape(B, Nn, N_HEADS * NODE)
    E = jax.nn.relu(E @ p['wl1'] + p['bl1'])
    E = ln(E, None, None, (1, 2))
    E = E.max(axis=1)
    return jax.nn.elu(E @ p['wl2'] + p['bl2'])


if __name__ == "__main__":
    key = jax.random.PRNGKey(0)
    pkey, xkey = jax.random.split(key)
    params = init_params(pkey)
    x = jax.random.normal(xkey, (2, CH_IN, HW, HW), dtype=jnp.float32)

    y = multi_head_relational_forward(x, params)
    y = jax.block_until_ready(y)

    y_ref = reference_forward(x, params)
    assert y.shape == (2, OUT_DIM)
    assert jnp.allclose(y, y_ref, rtol=5e-2, atol=5e-2), (y, y_ref)
    print("KERNEL_OK")
</pallas_src>

<mosaic_0001>
module attributes {stable_mosaic.version = 11 : i64} {
  func.func @relational_kernel(%arg0: i32, %arg1: memref<56x6xf32, #tpu.memory_space<vmem>>, %arg2: memref<6x19xf32, #tpu.memory_space<vmem>>, %arg3: memref<1x19xf32, #tpu.memory_space<vmem>>, %arg4: memref<19x23xf32, #tpu.memory_space<vmem>>, %arg5: memref<1x23xf32, #tpu.memory_space<vmem>>, %arg6: memref<23x768xf32, #tpu.memory_space<vmem>>, %arg7: memref<56x768xf32, #tpu.memory_space<vmem>>, %arg8: memref<56x768xf32, #tpu.memory_space<vmem>>, %arg9: memref<384x384xf32, #tpu.memory_space<vmem>>, %arg10: memref<1x384xf32, #tpu.memory_space<vmem>>, %arg11: memref<384x384xf32, #tpu.memory_space<vmem>>, %arg12: memref<1x384xf32, #tpu.memory_space<vmem>>, %arg13: memref<384x192xf32, #tpu.memory_space<vmem>>, %arg14: memref<1x64xf32, #tpu.memory_space<vmem>>, %arg15: memref<64x128xf32, #tpu.memory_space<vmem>>, %arg16: memref<1x128xf32, #tpu.memory_space<vmem>>, %arg17: memref<1x1x128xf32, #tpu.memory_space<vmem>>) attributes {dimension_semantics = [#tpu.dimension_semantics<parallel>], iteration_bounds = array<i64: 2>, scalar_prefetch = 0 : i64, scratch_operands = 0 : i64, tpu.core_type = #tpu.core_type<tc>, window_params = [{transform_indices = @transform_0, window_bounds = array<i64: 56, 6>}, {pipeline_mode = #tpu.pipeline_mode<synchronous>, transform_indices = @transform_1, window_bounds = array<i64: 6, 19>}, {pipeline_mode = #tpu.pipeline_mode<synchronous>, transform_indices = @transform_2, window_bounds = array<i64: 1, 19>}, {pipeline_mode = #tpu.pipeline_mode<synchronous>, transform_indices = @transform_3, window_bounds = array<i64: 19, 23>}, {pipeline_mode = #tpu.pipeline_mode<synchronous>, transform_indices = @transform_4, window_bounds = array<i64: 1, 23>}, {pipeline_mode = #tpu.pipeline_mode<synchronous>, transform_indices = @transform_5, window_bounds = array<i64: 23, 768>}, {pipeline_mode = #tpu.pipeline_mode<synchronous>, transform_indices = @transform_6, window_bounds = array<i64: 56, 768>}, {pipeline_mode = #tpu.pipeline_mode<synchronous>, transform_indices = @transform_7, window_bounds = array<i64: 56, 768>}, {pipeline_mode = #tpu.pipeline_mode<synchronous>, transform_indices = @transform_8, window_bounds = array<i64: 384, 384>}, {pipeline_mode = #tpu.pipeline_mode<synchronous>, transform_indices = @transform_9, window_bounds = array<i64: 1, 384>}, {pipeline_mode = #tpu.pipeline_mode<synchronous>, transform_indices = @transform_10, window_bounds = array<i64: 384, 384>}, {pipeline_mode = #tpu.pipeline_mode<synchronous>, transform_indices = @transform_11, window_bounds = array<i64: 1, 384>}, {pipeline_mode = #tpu.pipeline_mode<synchronous>, transform_indices = @transform_12, window_bounds = array<i64: 384, 192>}, {pipeline_mode = #tpu.pipeline_mode<synchronous>, transform_indices = @transform_13, window_bounds = array<i64: 1, 64>}, {pipeline_mode = #tpu.pipeline_mode<synchronous>, transform_indices = @transform_14, window_bounds = array<i64: 64, 128>}, {pipeline_mode = #tpu.pipeline_mode<synchronous>, transform_indices = @transform_15, window_bounds = array<i64: 1, 128>}, {transform_indices = @transform_16, window_bounds = array<i64: 1, 1, 128>}]} {
    %c0 = arith.constant 0 : index
    %c0_0 = arith.constant 0 : index
    %0 = vector.load %arg1[%c0, %c0_0] : memref<56x6xf32, #tpu.memory_space<vmem>>, vector<56x6xf32>
    %c0_1 = arith.constant 0 : index
    %c0_2 = arith.constant 0 : index
    %1 = vector.load %arg2[%c0_1, %c0_2] : memref<6x19xf32, #tpu.memory_space<vmem>>, vector<6x19xf32>
    %cst = arith.constant dense<0.000000e+00> : vector<56x19xf32>
    %2 = tpu.matmul %0, %1, %cst {dimension_numbers = #tpu.dot_dimension_numbers<[1], [0], [0], [1], [0, 0, 1, 1], [], []>} : vector<56x6xf32>, vector<6x19xf32>, vector<56x19xf32> -> vector<56x19xf32>
    %c0_3 = arith.constant 0 : index
    %c0_4 = arith.constant 0 : index
    %3 = vector.load %arg3[%c0_3, %c0_4] : memref<1x19xf32, #tpu.memory_space<vmem>>, vector<1x19xf32>
    %4 = vector.broadcast %3 : vector<1x19xf32> to vector<56x19xf32>
    %5 = arith.addf %2, %4 : vector<56x19xf32>
    %cst_5 = arith.constant 0.000000e+00 : f32
    %6 = vector.broadcast %cst_5 : f32 to vector<56x19xf32>
    %7 = arith.maximumf %5, %6 : vector<56x19xf32>
    %c0_6 = arith.constant 0 : index
    %c0_7 = arith.constant 0 : index
    %8 = vector.load %arg4[%c0_6, %c0_7] : memref<19x23xf32, #tpu.memory_space<vmem>>, vector<19x23xf32>
    %cst_8 = arith.constant dense<0.000000e+00> : vector<56x23xf32>
    %9 = tpu.matmul %7, %8, %cst_8 {dimension_numbers = #tpu.dot_dimension_numbers<[1], [0], [0], [1], [0, 0, 1, 1], [], []>} : vector<56x19xf32>, vector<19x23xf32>, vector<56x23xf32> -> vector<56x23xf32>
    %c0_9 = arith.constant 0 : index
    %c0_10 = arith.constant 0 : index
    %10 = vector.load %arg5[%c0_9, %c0_10] : memref<1x23xf32, #tpu.memory_space<vmem>>, vector<1x23xf32>
    %11 = vector.broadcast %10 : vector<1x23xf32> to vector<56x23xf32>
    %12 = arith.addf %9, %11 : vector<56x23xf32>
    %cst_11 = arith.constant 0.000000e+00 : f32
    %13 = vector.broadcast %cst_11 : f32 to vector<56x23xf32>
    %14 = arith.maximumf %12, %13 : vector<56x23xf32>
    %c0_12 = arith.constant 0 : index
    %c0_13 = arith.constant 0 : index
    %15 = vector.load %arg6[%c0_12, %c0_13] : memref<23x768xf32, #tpu.memory_space<vmem>>, vector<23x768xf32>
    %cst_14 = arith.constant dense<0.000000e+00> : vector<56x768xf32>
    %16 = tpu.matmul %14, %15, %cst_14 {dimension_numbers = #tpu.dot_dimension_numbers<[1], [0], [0], [1], [0, 0, 1, 1], [], []>} : vector<56x23xf32>, vector<23x768xf32>, vector<56x768xf32> -> vector<56x768xf32>
    %17 = tpu.iota {dimensions = array<i32: 1>} : vector<1x56xi32>
    %18 = tpu.iota {dimensions = array<i32: 0>} : vector<1x56xi32>
    %c56_i32 = arith.constant 56 : i32
    %19 = vector.broadcast %c56_i32 : i32 to vector<1x56xi32>
    %20 = arith.muli %18, %19 : vector<1x56xi32>
    %21 = arith.cmpi sge, %17, %20 : vector<1x56xi32>
    %c56_i32_15 = arith.constant 56 : i32
    %22 = vector.broadcast %c56_i32_15 : i32 to vector<1x56xi32>
    %23 = arith.muli %18, %22 : vector<1x56xi32>
    %c49_i32 = arith.constant 49 : i32
    %24 = vector.broadcast %c49_i32 : i32 to vector<1x56xi32>
    %25 = arith.addi %23, %24 : vector<1x56xi32>
    %26 = arith.cmpi slt, %17, %25 : vector<1x56xi32>
    %27 = arith.andi %21, %26 : vector<1x56xi1>
    %28 = arith.extui %27 : vector<1x56xi1> to vector<1x56xi32>
    %29 = arith.sitofp %28 : vector<1x56xi32> to vector<1x56xf32>
    %30 = tpu.iota {dimensions = array<i32: 1>} : vector<1x384xi32>
    %c128_i32 = arith.constant 128 : i32
    %c0_i32 = arith.constant 0 : i32
    %31 = arith.cmpi eq, %c128_i32, %c0_i32 : i32
    %c1_i32 = arith.constant 1 : i32
    %32 = arith.select %31, %c1_i32, %c128_i32 : i32
    %33 = vector.broadcast %32 : i32 to vector<1x384xi32>
    %34 = arith.remsi %30, %33 : vector<1x384xi32>
    %c0_i32_16 = arith.constant 0 : i32
    %35 = vector.broadcast %c0_i32_16 : i32 to vector<1x384xi32>
    %36 = arith.cmpi ne, %34, %35 : vector<1x384xi32>
    %c0_i32_17 = arith.constant 0 : i32
    %37 = vector.broadcast %c0_i32_17 : i32 to vector<1x384xi32>
    %38 = arith.cmpi slt, %34, %37 : vector<1x384xi32>
    %c0_i32_18 = arith.constant 0 : i32
    %39 = arith.cmpi slt, %32, %c0_i32_18 : i32
    %40 = vector.broadcast %39 : i1 to vector<1x384xi1>
    %41 = vector.broadcast %40 : vector<1x384xi1> to vector<1x384xi1>
    %42 = arith.xori %38, %41 : vector<1x384xi1>
    %43 = arith.andi %42, %36 : vector<1x384xi1>
    %44 = vector.broadcast %32 : i32 to vector<1x384xi32>
    %45 = arith.addi %34, %44 : vector<1x384xi32>
    %46 = arith.select %43, %45, %34 : vector<1x384xi1>, vector<1x384xi32>
    %c64_i32 = arith.constant 64 : i32
    %47 = vector.broadcast %c64_i32 : i32 to vector<1x384xi32>
    %48 = arith.cmpi slt, %46, %47 : vector<1x384xi32>
    %49 = arith.extui %48 : vector<1x384xi1> to vector<1x384xi32>
    %50 = arith.sitofp %49 : vector<1x384xi32> to vector<1x384xf32>
    %cst_19 = arith.constant dense<0.000000e+00> : vector<1x768xf32>
    %51 = tpu.matmul %29, %16, %cst_19 {dimension_numbers = #tpu.dot_dimension_numbers<[1], [0], [0], [1], [0, 0, 1, 1], [], []>} : vector<1x56xf32>, vector<56x768xf32>, vector<1x768xf32> -> vector<1x768xf32>
    %52 = arith.mulf %16, %16 : vector<56x768xf32>
    %cst_20 = arith.constant dense<0.000000e+00> : vector<1x768xf32>
    %53 = tpu.matmul %29, %52, %cst_20 {dimension_numbers = #tpu.dot_dimension_numbers<[1], [0], [0], [1], [0, 0, 1, 1], [], []>} : vector<1x56xf32>, vector<56x768xf32>, vector<1x768xf32> -> vector<1x768xf32>
    %54 = vector.extract_strided_slice %51 {offsets = [0, 0], sizes = [1, 384], strides = [1, 1]} : vector<1x768xf32> to vector<1x384xf32>
    %55 = vector.extract_strided_slice %51 {offsets = [0, 384], sizes = [1, 384], strides = [1, 1]} : vector<1x768xf32> to vector<1x384xf32>
    %56 = vector.extract_strided_slice %53 {offsets = [0, 0], sizes = [1, 384], strides = [1, 1]} : vector<1x768xf32> to vector<1x384xf32>
    %57 = vector.extract_strided_slice %53 {offsets = [0, 384], sizes = [1, 384], strides = [1, 1]} : vector<1x768xf32> to vector<1x384xf32>
    %58 = arith.mulf %54, %50 : vector<1x384xf32>
    %cst_21 = arith.constant dense<0.000000e+00> : vector<1xf32>
    %59 = vector.multi_reduction <add>, %58, %cst_21 [1] : vector<1x384xf32> to vector<1xf32>
    %60 = vector.shape_cast %59 : vector<1xf32> to vector<1x1xf32>
    %61 = arith.mulf %56, %50 : vector<1x384xf32>
    %cst_22 = arith.constant dense<0.000000e+00> : vector<1xf32>
    %62 = vector.multi_reduction <add>, %61, %cst_22 [1] : vector<1x384xf32> to vector<1xf32>
    %63 = vector.shape_cast %62 : vector<1xf32> to vector<1x1xf32>
    %cst_23 = arith.constant 1.06292515E-4 : f32
    %64 = vector.broadcast %cst_23 : f32 to vector<1x1xf32>
    %65 = arith.mulf %60, %64 : vector<1x1xf32>
    %cst_24 = arith.constant 1.06292515E-4 : f32
    %66 = vector.broadcast %cst_24 : f32 to vector<1x1xf32>
    %67 = arith.mulf %63, %66 : vector<1x1xf32>
    %68 = arith.mulf %65, %65 : vector<1x1xf32>
    %69 = arith.subf %67, %68 : vector<1x1xf32>
    %cst_25 = arith.constant 9.99999974E-6 : f32
    %70 = vector.broadcast %cst_25 : f32 to vector<1x1xf32>
    %71 = arith.addf %69, %70 : vector<1x1xf32>
    %72 = math.rsqrt %71 : vector<1x1xf32>
    %cst_26 = arith.constant dense<0.000000e+00> : vector<1xf32>
    %73 = vector.multi_reduction <add>, %54, %cst_26 [1] : vector<1x384xf32> to vector<1xf32>
    %74 = vector.shape_cast %73 : vector<1xf32> to vector<1x1xf32>
    %75 = arith.subf %74, %60 : vector<1x1xf32>
    %cst_27 = arith.constant dense<0.000000e+00> : vector<1xf32>
    %76 = vector.multi_reduction <add>, %56, %cst_27 [1] : vector<1x384xf32> to vector<1xf32>
    %77 = vector.shape_cast %76 : vector<1xf32> to vector<1x1xf32>
    %78 = arith.subf %77, %63 : vector<1x1xf32>
    %cst_28 = arith.constant 1.06292515E-4 : f32
    %79 = vector.broadcast %cst_28 : f32 to vector<1x1xf32>
    %80 = arith.mulf %75, %79 : vector<1x1xf32>
    %cst_29 = arith.constant 1.06292515E-4 : f32
    %81 = vector.broadcast %cst_29 : f32 to vector<1x1xf32>
    %82 = arith.mulf %78, %81 : vector<1x1xf32>
    %83 = arith.mulf %80, %80 : vector<1x1xf32>
    %84 = arith.subf %82, %83 : vector<1x1xf32>
    %cst_30 = arith.constant 9.99999974E-6 : f32
    %85 = vector.broadcast %cst_30 : f32 to vector<1x1xf32>
    %86 = arith.addf %84, %85 : vector<1x1xf32>
    %87 = math.rsqrt %86 : vector<1x1xf32>
    %cst_31 = arith.constant dense<0.000000e+00> : vector<1xf32>
    %88 = vector.multi_reduction <add>, %55, %cst_31 [1] : vector<1x384xf32> to vector<1xf32>
    %89 = vector.shape_cast %88 : vector<1xf32> to vector<1x1xf32>
    %cst_32 = arith.constant dense<0.000000e+00> : vector<1xf32>
    %90 = vector.multi_reduction <add>, %57, %cst_32 [1] : vector<1x384xf32> to vector<1xf32>
    %91 = vector.shape_cast %90 : vector<1xf32> to vector<1x1xf32>
    %cst_33 = arith.constant 1.06292515E-4 : f32
    %92 = vector.broadcast %cst_33 : f32 to vector<1x1xf32>
    %93 = arith.mulf %89, %92 : vector<1x1xf32>
    %cst_34 = arith.constant 1.06292515E-4 : f32
    %94 = vector.broadcast %cst_34 : f32 to vector<1x1xf32>
    %95 = arith.mulf %91, %94 : vector<1x1xf32>
    %96 = arith.mulf %93, %93 : vector<1x1xf32>
    %97 = arith.subf %95, %96 : vector<1x1xf32>
    %cst_35 = arith.constant 9.99999974E-6 : f32
    %98 = vector.broadcast %cst_35 : f32 to vector<1x1xf32>
    %99 = arith.addf %97, %98 : vector<1x1xf32>
    %100 = math.rsqrt %99 : vector<1x1xf32>
    %101 = arith.subf %65, %80 : vector<1x1xf32>
    %102 = vector.broadcast %101 : vector<1x1xf32> to vector<1x384xf32>
    %103 = arith.mulf %102, %50 : vector<1x384xf32>
    %104 = vector.broadcast %80 : vector<1x1xf32> to vector<1x384xf32>
    %105 = arith.addf %104, %103 : vector<1x384xf32>
    %106 = arith.subf %72, %87 : vector<1x1xf32>
    %107 = vector.broadcast %106 : vector<1x1xf32> to vector<1x384xf32>
    %108 = arith.mulf %107, %50 : vector<1x384xf32>
    %109 = vector.broadcast %87 : vector<1x1xf32> to vector<1x384xf32>
    %110 = arith.addf %109, %108 : vector<1x384xf32>
    %111 = vector.shape_cast %93 : vector<1x1xf32> to vector<1x1xf32>
    %112 = vector.broadcast %111 : vector<1x1xf32> to vector<1x384xf32>
    %113 = tpu.concatenate %105, %112 in 1 : vector<1x384xf32>, vector<1x384xf32> -> vector<1x768xf32>
    %114 = vector.shape_cast %100 : vector<1x1xf32> to vector<1x1xf32>
    %115 = vector.broadcast %114 : vector<1x1xf32> to vector<1x384xf32>
    %116 = tpu.concatenate %110, %115 in 1 : vector<1x384xf32>, vector<1x384xf32> -> vector<1x768xf32>
    %117 = vector.shape_cast %16 : vector<56x768xf32> to vector<1x56x768xf32>
    %118 = vector.shape_cast %113 : vector<1x768xf32> to vector<1x1x768xf32>
    %119 = vector.broadcast %118 : vector<1x1x768xf32> to vector<1x56x768xf32>
    %120 = arith.subf %117, %119 : vector<1x56x768xf32>
    %121 = vector.shape_cast %116 : vector<1x768xf32> to vector<1x1x768xf32>
    %122 = vector.broadcast %121 : vector<1x1x768xf32> to vector<1x56x768xf32>
    %123 = arith.mulf %120, %122 : vector<1x56x768xf32>
    %c0_36 = arith.constant 0 : index
    %c0_37 = arith.constant 0 : index
    %124 = vector.load %arg7[%c0_36, %c0_37] : memref<56x768xf32, #tpu.memory_space<vmem>>, vector<56x768xf32>
    %125 = vector.shape_cast %124 : vector<56x768xf32> to vector<1x56x768xf32>
    %126 = arith.mulf %123, %125 : vector<1x56x768xf32>
    %c0_38 = arith.constant 0 : index
    %c0_39 = arith.constant 0 : index
    %127 = vector.load %arg8[%c0_38, %c0_39] : memref<56x768xf32, #tpu.memory_space<vmem>>, vector<56x768xf32>
    %128 = vector.shape_cast %127 : vector<56x768xf32> to vector<1x56x768xf32>
    %129 = arith.addf %126, %128 : vector<1x56x768xf32>
    %130 = vector.shape_cast %129 : vector<1x56x768xf32> to vector<56x768xf32>
    %131 = vector.extract_strided_slice %130 {offsets = [0, 0], sizes = [56, 384], strides = [1, 1]} : vector<56x768xf32> to vector<56x384xf32>
    %132 = vector.extract_strided_slice %130 {offsets = [0, 384], sizes = [56, 384], strides = [1, 1]} : vector<56x768xf32> to vector<56x384xf32>
    %c0_40 = arith.constant 0 : index
    %c0_41 = arith.constant 0 : index
    %133 = vector.load %arg9[%c0_40, %c0_41] : memref<384x384xf32, #tpu.memory_space<vmem>>, vector<384x384xf32>
    %cst_42 = arith.constant dense<0.000000e+00> : vector<56x384xf32>
    %134 = tpu.matmul %131, %133, %cst_42 {dimension_numbers = #tpu.dot_dimension_numbers<[1], [0], [0], [1], [0, 0, 1, 1], [], []>} : vector<56x384xf32>, vector<384x384xf32>, vector<56x384xf32> -> vector<56x384xf32>
    %c0_43 = arith.constant 0 : index
    %c0_44 = arith.constant 0 : index
    %135 = vector.load %arg10[%c0_43, %c0_44] : memref<1x384xf32, #tpu.memory_space<vmem>>, vector<1x384xf32>
    %136 = vector.broadcast %135 : vector<1x384xf32> to vector<56x384xf32>
    %137 = arith.addf %134, %136 : vector<56x384xf32>
    %cst_45 = arith.constant 0.000000e+00 : f32
    %138 = vector.broadcast %cst_45 : f32 to vector<56x384xf32>
    %139 = arith.cmpf ogt, %137, %138 : vector<56x384xf32>
    %cst_46 = arith.constant 0.000000e+00 : f32
    %140 = vector.broadcast %cst_46 : f32 to vector<56x384xf32>
    %141 = arith.minimumf %137, %140 : vector<56x384xf32>
    %142 = math.exp %141 : vector<56x384xf32>
    %cst_47 = arith.constant 1.000000e+00 : f32
    %143 = vector.broadcast %cst_47 : f32 to vector<56x384xf32>
    %144 = arith.subf %142, %143 : vector<56x384xf32>
    %145 = arith.select %139, %137, %144 : vector<56x384xi1>, vector<56x384xf32>
    %c0_48 = arith.constant 0 : index
    %c0_49 = arith.constant 0 : index
    %146 = vector.load %arg11[%c0_48, %c0_49] : memref<384x384xf32, #tpu.memory_space<vmem>>, vector<384x384xf32>
    %cst_50 = arith.constant dense<0.000000e+00> : vector<56x384xf32>
    %147 = tpu.matmul %145, %146, %cst_50 {dimension_numbers = #tpu.dot_dimension_numbers<[1], [0], [0], [1], [0, 0, 1, 1], [], []>} : vector<56x384xf32>, vector<384x384xf32>, vector<56x384xf32> -> vector<56x384xf32>
    %c0_51 = arith.constant 0 : index
    %c0_52 = arith.constant 0 : index
    %148 = vector.load %arg12[%c0_51, %c0_52] : memref<1x384xf32, #tpu.memory_space<vmem>>, vector<1x384xf32>
    %149 = vector.broadcast %148 : vector<1x384xf32> to vector<56x384xf32>
    %150 = arith.addf %147, %149 : vector<56x384xf32>
    %c0_53 = arith.constant 0 : index
    %c0_54 = arith.constant 0 : index
    %151 = vector.load %arg13[%c0_53, %c0_54] : memref<384x192xf32, #tpu.memory_space<vmem>>, vector<384x192xf32>
    %cst_55 = arith.constant dense<0.000000e+00> : vector<56x192xf32>
    %152 = tpu.matmul %132, %151, %cst_55 {dimension_numbers = #tpu.dot_dimension_numbers<[1], [0], [0], [1], [0, 0, 1, 1], [], []>} : vector<56x384xf32>, vector<384x192xf32>, vector<56x192xf32> -> vector<56x192xf32>
    %cst_56 = arith.constant 0.000000e+00 : f32
    %153 = vector.broadcast %cst_56 : f32 to vector<1x56x64xf32>
    %154 = vector.extract_strided_slice %150 {offsets = [0, 0], sizes = [56, 128], strides = [1, 1]} : vector<56x384xf32> to vector<56x128xf32>
    %cst_57 = arith.constant dense<0xFF800000> : vector<56xf32>
    %155 = vector.multi_reduction <maximumf>, %154, %cst_57 [1] : vector<56x128xf32> to vector<56xf32>
    %156 = vector.shape_cast %155 : vector<56xf32> to vector<56x1xf32>
    %157 = vector.broadcast %156 : vector<56x1xf32> to vector<56x128xf32>
    %158 = arith.subf %154, %157 : vector<56x128xf32>
    %159 = math.exp %158 : vector<56x128xf32>
    %cst_58 = arith.constant dense<0.000000e+00> : vector<56xf32>
    %160 = vector.multi_reduction <add>, %159, %cst_58 [1] : vector<56x128xf32> to vector<56xf32>
    %161 = vector.shape_cast %160 : vector<56xf32> to vector<56x1xf32>
    %162 = tpu.reciprocal %161 {approx = true} : vector<56x1xf32> -> vector<56x1xf32>
    %163 = vector.broadcast %162 : vector<56x1xf32> to vector<56x128xf32>
    %164 = arith.mulf %159, %163 : vector<56x128xf32>
    %165 = vector.extract_strided_slice %164 {offsets = [0, 0], sizes = [56, 56], strides = [1, 1]} : vector<56x128xf32> to vector<56x56xf32>
    %166 = vector.shape_cast %165 : vector<56x56xf32> to vector<1x56x56xf32>
    %167 = vector.extract_strided_slice %152 {offsets = [0, 0], sizes = [56, 64], strides = [1, 1]} : vector<56x192xf32> to vector<56x64xf32>
    %168 = vector.shape_cast %167 : vector<56x64xf32> to vector<1x56x64xf32>
    "tpu.trace_start"() <{level = 10 : i32, message = "bnc,bcd->bnd"}> : () -> ()
    %cst_59 = arith.constant dense<0.000000e+00> : vector<1x56x64xf32>
    %169 = tpu.matmul %166, %168, %cst_59 {dimension_numbers = #tpu.dot_dimension_numbers<[2], [1], [1], [2], [0, 0, 0, 1, 1, 2], [0], [0]>} : vector<1x56x56xf32>, vector<1x56x64xf32>, vector<1x56x64xf32> -> vector<1x56x64xf32>
    "tpu.trace_stop"() : () -> ()
    %170 = arith.addf %153, %169 : vector<1x56x64xf32>
    %171 = vector.extract_strided_slice %150 {offsets = [0, 128], sizes = [56, 128], strides = [1, 1]} : vector<56x384xf32> to vector<56x128xf32>
    %cst_60 = arith.constant dense<0xFF800000> : vector<56xf32>
    %172 = vector.multi_reduction <maximumf>, %171, %cst_60 [1] : vector<56x128xf32> to vector<56xf32>
    %173 = vector.shape_cast %172 : vector<56xf32> to vector<56x1xf32>
    %174 = vector.broadcast %173 : vector<56x1xf32> to vector<56x128xf32>
    %175 = arith.subf %171, %174 : vector<56x128xf32>
    %176 = math.exp %175 : vector<56x128xf32>
    %cst_61 = arith.constant dense<0.000000e+00> : vector<56xf32>
    %177 = vector.multi_reduction <add>, %176, %cst_61 [1] : vector<56x128xf32> to vector<56xf32>
    %178 = vector.shape_cast %177 : vector<56xf32> to vector<56x1xf32>
    %179 = tpu.reciprocal %178 {approx = true} : vector<56x1xf32> -> vector<56x1xf32>
    %180 = vector.broadcast %179 : vector<56x1xf32> to vector<56x128xf32>
    %181 = arith.mulf %176, %180 : vector<56x128xf32>
    %182 = vector.extract_strided_slice %181 {offsets = [0, 0], sizes = [56, 56], strides = [1, 1]} : vector<56x128xf32> to vector<56x56xf32>
    %183 = vector.shape_cast %182 : vector<56x56xf32> to vector<1x56x56xf32>
    %184 = vector.extract_strided_slice %152 {offsets = [0, 64], sizes = [56, 64], strides = [1, 1]} : vector<56x192xf32> to vector<56x64xf32>
    %185 = vector.shape_cast %184 : vector<56x64xf32> to vector<1x56x64xf32>
    "tpu.trace_start"() <{level = 10 : i32, message = "bnc,bcd->bnd"}> : () -> ()
    %cst_62 = arith.constant dense<0.000000e+00> : vector<1x56x64xf32>
    %186 = tpu.matmul %183, %185, %cst_62 {dimension_numbers = #tpu.dot_dimension_numbers<[2], [1], [1], [2], [0, 0, 0, 1, 1, 2], [0], [0]>} : vector<1x56x56xf32>, vector<1x56x64xf32>, vector<1x56x64xf32> -> vector<1x56x64xf32>
    "tpu.trace_stop"() : () -> ()
    %187 = arith.addf %170, %186 : vector<1x56x64xf32>
    %188 = vector.extract_strided_slice %150 {offsets = [0, 256], sizes = [56, 128], strides = [1, 1]} : vector<56x384xf32> to vector<56x128xf32>
    %cst_63 = arith.constant dense<0xFF800000> : vector<56xf32>
    %189 = vector.multi_reduction <maximumf>, %188, %cst_63 [1] : vector<56x128xf32> to vector<56xf32>
    %190 = vector.shape_cast %189 : vector<56xf32> to vector<56x1xf32>
    %191 = vector.broadcast %190 : vector<56x1xf32> to vector<56x128xf32>
    %192 = arith.subf %188, %191 : vector<56x128xf32>
    %193 = math.exp %192 : vector<56x128xf32>
    %cst_64 = arith.constant dense<0.000000e+00> : vector<56xf32>
    %194 = vector.multi_reduction <add>, %193, %cst_64 [1] : vector<56x128xf32> to vector<56xf32>
    %195 = vector.shape_cast %194 : vector<56xf32> to vector<56x1xf32>
    %196 = tpu.reciprocal %195 {approx = true} : vector<56x1xf32> -> vector<56x1xf32>
    %197 = vector.broadcast %196 : vector<56x1xf32> to vector<56x128xf32>
    %198 = arith.mulf %193, %197 : vector<56x128xf32>
    %199 = vector.extract_strided_slice %198 {offsets = [0, 0], sizes = [56, 56], strides = [1, 1]} : vector<56x128xf32> to vector<56x56xf32>
    %200 = vector.shape_cast %199 : vector<56x56xf32> to vector<1x56x56xf32>
    %201 = vector.extract_strided_slice %152 {offsets = [0, 128], sizes = [56, 64], strides = [1, 1]} : vector<56x192xf32> to vector<56x64xf32>
    %202 = vector.shape_cast %201 : vector<56x64xf32> to vector<1x56x64xf32>
    "tpu.trace_start"() <{level = 10 : i32, message = "bnc,bcd->bnd"}> : () -> ()
    %cst_65 = arith.constant dense<0.000000e+00> : vector<1x56x64xf32>
    %203 = tpu.matmul %200, %202, %cst_65 {dimension_numbers = #tpu.dot_dimension_numbers<[2], [1], [1], [2], [0, 0, 0, 1, 1, 2], [0], [0]>} : vector<1x56x56xf32>, vector<1x56x64xf32>, vector<1x56x64xf32> -> vector<1x56x64xf32>
    "tpu.trace_stop"() : () -> ()
    %204 = arith.addf %187, %203 : vector<1x56x64xf32>
    %205 = tpu.iota {dimensions = array<i32: 1>} : vector<1x56x1xi32>
    %c49_i32_66 = arith.constant 49 : i32
    %206 = vector.broadcast %c49_i32_66 : i32 to vector<1x56x1xi32>
    %207 = arith.cmpi slt, %205, %206 : vector<1x56x1xi32>
    %208 = arith.extui %207 : vector<1x56x1xi1> to vector<1x56x1xi32>
    %209 = arith.sitofp %208 : vector<1x56x1xi32> to vector<1x56x1xf32>
    %210 = vector.shape_cast %209 : vector<1x56x1xf32> to vector<56x1xf32>
    %211 = vector.shape_cast %204 : vector<1x56x64xf32> to vector<56x64xf32>
    %c0_67 = arith.constant 0 : index
    %c0_68 = arith.constant 0 : index
    %212 = vector.load %arg14[%c0_67, %c0_68] : memref<1x64xf32, #tpu.memory_space<vmem>>, vector<1x64xf32>
    %213 = vector.broadcast %212 : vector<1x64xf32> to vector<56x64xf32>
    %214 = arith.addf %211, %213 : vector<56x64xf32>
    %cst_69 = arith.constant 0.000000e+00 : f32
    %215 = vector.broadcast %cst_69 : f32 to vector<56x64xf32>
    %216 = arith.maximumf %214, %215 : vector<56x64xf32>
    %217 = vector.broadcast %210 : vector<56x1xf32> to vector<56x64xf32>
    %218 = arith.mulf %216, %217 : vector<56x64xf32>
    %219 = arith.mulf %218, %218 : vector<56x64xf32>
    %220 = tpu.concatenate %218, %219 in 1 : vector<56x64xf32>, vector<56x64xf32> -> vector<56x128xf32>
    %cst_70 = arith.constant dense<0.000000e+00> : vector<1x128xf32>
    %221 = tpu.matmul %29, %220, %cst_70 {dimension_numbers = #tpu.dot_dimension_numbers<[1], [0], [0], [1], [0, 0, 1, 1], [], []>} : vector<1x56xf32>, vector<56x128xf32>, vector<1x128xf32> -> vector<1x128xf32>
    %222 = vector.extract_strided_slice %221 {offsets = [0, 0], sizes = [1, 64], strides = [1, 1]} : vector<1x128xf32> to vector<1x64xf32>
    %cst_71 = arith.constant dense<0.000000e+00> : vector<1xf32>
    %223 = vector.multi_reduction <add>, %222, %cst_71 [1] : vector<1x64xf32> to vector<1xf32>
    %224 = vector.shape_cast %223 : vector<1xf32> to vector<1x1xf32>
    %cst_72 = arith.constant 3.18877544E-4 : f32
    %225 = vector.broadcast %cst_72 : f32 to vector<1x1xf32>
    %226 = arith.mulf %224, %225 : vector<1x1xf32>
    %227 = vector.extract_strided_slice %221 {offsets = [0, 64], sizes = [1, 64], strides = [1, 1]} : vector<1x128xf32> to vector<1x64xf32>
    %cst_73 = arith.constant dense<0.000000e+00> : vector<1xf32>
    %228 = vector.multi_reduction <add>, %227, %cst_73 [1] : vector<1x64xf32> to vector<1xf32>
    %229 = vector.shape_cast %228 : vector<1xf32> to vector<1x1xf32>
    %cst_74 = arith.constant 3.18877544E-4 : f32
    %230 = vector.broadcast %cst_74 : f32 to vector<1x1xf32>
    %231 = arith.mulf %229, %230 : vector<1x1xf32>
    %232 = arith.mulf %226, %226 : vector<1x1xf32>
    %233 = arith.subf %231, %232 : vector<1x1xf32>
    %cst_75 = arith.constant 9.99999974E-6 : f32
    %234 = vector.broadcast %cst_75 : f32 to vector<1x1xf32>
    %235 = arith.addf %233, %234 : vector<1x1xf32>
    %236 = math.rsqrt %235 : vector<1x1xf32>
    %237 = vector.shape_cast %218 : vector<56x64xf32> to vector<1x56x64xf32>
    %cst_76 = arith.constant dense<0xFF800000> : vector<1x64xf32>
    %238 = vector.multi_reduction <maximumf>, %237, %cst_76 [1] : vector<1x56x64xf32> to vector<1x64xf32>
    %239 = vector.broadcast %226 : vector<1x1xf32> to vector<1x64xf32>
    %240 = arith.subf %238, %239 : vector<1x64xf32>
    %241 = vector.broadcast %236 : vector<1x1xf32> to vector<1x64xf32>
    %242 = arith.mulf %240, %241 : vector<1x64xf32>
    %c0_77 = arith.constant 0 : index
    %c0_78 = arith.constant 0 : index
    %243 = vector.load %arg15[%c0_77, %c0_78] : memref<64x128xf32, #tpu.memory_space<vmem>>, vector<64x128xf32>
    %cst_79 = arith.constant dense<0.000000e+00> : vector<1x128xf32>
    %244 = tpu.matmul %242, %243, %cst_79 {dimension_numbers = #tpu.dot_dimension_numbers<[1], [0], [0], [1], [0, 0, 1, 1], [], []>} : vector<1x64xf32>, vector<64x128xf32>, vector<1x128xf32> -> vector<1x128xf32>
    %c0_80 = arith.constant 0 : index
    %c0_81 = arith.constant 0 : index
    %245 = vector.load %arg16[%c0_80, %c0_81] : memref<1x128xf32, #tpu.memory_space<vmem>>, vector<1x128xf32>
    %246 = arith.addf %244, %245 : vector<1x128xf32>
    %cst_82 = arith.constant 0.000000e+00 : f32
    %247 = vector.broadcast %cst_82 : f32 to vector<1x128xf32>
    %248 = arith.cmpf ogt, %246, %247 : vector<1x128xf32>
    %cst_83 = arith.constant 0.000000e+00 : f32
    %249 = vector.broadcast %cst_83 : f32 to vector<1x128xf32>
    %250 = arith.minimumf %246, %249 : vector<1x128xf32>
    %251 = math.exp %250 : vector<1x128xf32>
    %cst_84 = arith.constant 1.000000e+00 : f32
    %252 = vector.broadcast %cst_84 : f32 to vector<1x128xf32>
    %253 = arith.subf %251, %252 : vector<1x128xf32>
    %254 = arith.select %248, %246, %253 : vector<1x128xi1>, vector<1x128xf32>
    %255 = vector.shape_cast %254 : vector<1x128xf32> to vector<1x1x128xf32>
    %c0_85 = arith.constant 0 : index
    %c0_86 = arith.constant 0 : index
    %c0_87 = arith.constant 0 : index
    %256 = vector.load %arg17[%c0_85, %c0_86, %c0_87] : memref<1x1x128xf32, #tpu.memory_space<vmem>>, vector<1x1x128xf32>
    tpu.vector_store %arg17[%c0_85, %c0_86, %c0_87], %255 {strides = array<i32>} : memref<1x1x128xf32, #tpu.memory_space<vmem>>, vector<1x1x128xf32>,
    return
  }
  func.func @transform_0(%arg0: i32) -> (i32, i32) {
    %c0_i32 = arith.constant 0 : i32
    %c0_i32_0 = arith.constant 0 : i32
    return %arg0, %c0_i32 : i32, i32
  }
  func.func @transform_1(%arg0: i32) -> (i32, i32) {
    %c0_i32 = arith.constant 0 : i32
    %c0_i32_0 = arith.constant 0 : i32
    %c0_i32_1 = arith.constant 0 : i32
    return %c0_i32, %c0_i32_0 : i32, i32
  }
  func.func @transform_2(%arg0: i32) -> (i32, i32) {
    %c0_i32 = arith.constant 0 : i32
    %c0_i32_0 = arith.constant 0 : i32
    %c0_i32_1 = arith.constant 0 : i32
    return %c0_i32, %c0_i32_0 : i32, i32
  }
  func.func @transform_3(%arg0: i32) -> (i32, i32) {
    %c0_i32 = arith.constant 0 : i32
    %c0_i32_0 = arith.constant 0 : i32
    %c0_i32_1 = arith.constant 0 : i32
    return %c0_i32, %c0_i32_0 : i32, i32
  }
  func.func @transform_4(%arg0: i32) -> (i32, i32) {
    %c0_i32 = arith.constant 0 : i32
    %c0_i32_0 = arith.constant 0 : i32
    %c0_i32_1 = arith.constant 0 : i32
    return %c0_i32, %c0_i32_0 : i32, i32
  }
  func.func @transform_5(%arg0: i32) -> (i32, i32) {
    %c0_i32 = arith.constant 0 : i32
    %c0_i32_0 = arith.constant 0 : i32
    %c0_i32_1 = arith.constant 0 : i32
    return %c0_i32, %c0_i32_0 : i32, i32
  }
  func.func @transform_6(%arg0: i32) -> (i32, i32) {
    %c0_i32 = arith.constant 0 : i32
    %c0_i32_0 = arith.constant 0 : i32
    %c0_i32_1 = arith.constant 0 : i32
    return %c0_i32, %c0_i32_0 : i32, i32
  }
  func.func @transform_7(%arg0: i32) -> (i32, i32) {
    %c0_i32 = arith.constant 0 : i32
    %c0_i32_0 = arith.constant 0 : i32
    %c0_i32_1 = arith.constant 0 : i32
    return %c0_i32, %c0_i32_0 : i32, i32
  }
  func.func @transform_8(%arg0: i32) -> (i32, i32) {
    %c0_i32 = arith.constant 0 : i32
    %c0_i32_0 = arith.constant 0 : i32
    %c0_i32_1 = arith.constant 0 : i32
    return %c0_i32, %c0_i32_0 : i32, i32
  }
  func.func @transform_9(%arg0: i32) -> (i32, i32) {
    %c0_i32 = arith.constant 0 : i32
    %c0_i32_0 = arith.constant 0 : i32
    %c0_i32_1 = arith.constant 0 : i32
    return %c0_i32, %c0_i32_0 : i32, i32
  }
  func.func @transform_10(%arg0: i32) -> (i32, i32) {
    %c0_i32 = arith.constant 0 : i32
    %c0_i32_0 = arith.constant 0 : i32
    %c0_i32_1 = arith.constant 0 : i32
    return %c0_i32, %c0_i32_0 : i32, i32
  }
  func.func @transform_11(%arg0: i32) -> (i32, i32) {
    %c0_i32 = arith.constant 0 : i32
    %c0_i32_0 = arith.constant 0 : i32
    %c0_i32_1 = arith.constant 0 : i32
    return %c0_i32, %c0_i32_0 : i32, i32
  }
  func.func @transform_12(%arg0: i32) -> (i32, i32) {
    %c0_i32 = arith.constant 0 : i32
    %c0_i32_0 = arith.constant 0 : i32
    %c0_i32_1 = arith.constant 0 : i32
    return %c0_i32, %c0_i32_0 : i32, i32
  }
  func.func @transform_13(%arg0: i32) -> (i32, i32) {
    %c0_i32 = arith.constant 0 : i32
    %c0_i32_0 = arith.constant 0 : i32
    %c0_i32_1 = arith.constant 0 : i32
    return %c0_i32, %c0_i32_0 : i32, i32
  }
  func.func @transform_14(%arg0: i32) -> (i32, i32) {
    %c0_i32 = arith.constant 0 : i32
    %c0_i32_0 = arith.constant 0 : i32
    %c0_i32_1 = arith.constant 0 : i32
    return %c0_i32, %c0_i32_0 : i32, i32
  }
  func.func @transform_15(%arg0: i32) -> (i32, i32) {
    %c0_i32 = arith.constant 0 : i32
    %c0_i32_0 = arith.constant 0 : i32
    %c0_i32_1 = arith.constant 0 : i32
    return %c0_i32, %c0_i32_0 : i32, i32
  }
  func.func @transform_16(%arg0: i32) -> (i32, i32, i32) {
    %c0_i32 = arith.constant 0 : i32
    %c0_i32_0 = arith.constant 0 : i32
    %c0_i32_1 = arith.constant 0 : i32
    return %arg0, %c0_i32, %c0_i32_0 : i32, i32, i32
  }
}

</mosaic_0001>

<bundles_post_ra>
// kernel: tile.10
= control target key start
LH: loop header
LB: loop body
LE: loop exit
PB: predicated region body
PF: predicated region fallthrough
CT: control target
= control target key end

     0   :  { %s22_s0 = inlined_call_operand.vmem [shape: f32[7], index: 0, kind: input, shape index: {}]   ;;  %s23_s1 = inlined_call_operand.vmem [shape: f32[7,1,1,7], index: 1, kind: output, shape index: {}]  }
   0x1   :  { %v4_v0 = vld [vmem:[%s22_s0] ss:$0 sm:$0xff] }
   0x2   :  { %5 = vst [vmem:[%s23_s1] sm:$0xff] %v4_v0 }

// kernel: tile.14
= control target key start
LH: loop header
LB: loop body
LE: loop exit
PB: predicated region body
PF: predicated region fallthrough
CT: control target
= control target key end

     0   :  { %s59_s10 = smov 42   ;;  %s60_s11 = smov 28   ;;  %vm3_vm0 = vcmask 56320   ;;  %vm9_vm1 = vcmask 400720   ;;  %vm15_vm2 = vcmask 343320   ;;  %vm21_vm3 = vcmask 285920   ;;  %s99_s0 = inlined_call_operand.vmem [shape: f32[7,1,1,7], index: 0, kind: input, shape index: {}]   ;;  %s100_s1 = inlined_call_operand.vmem [shape: f32[49,1], index: 1, kind: output, shape index: {}]  }
   0x1   :  { %v47_v0 = vld [vmem:[%s99_s0 + $0x6] sm:$0x1]   ;;  %v49_v1 = vld [vmem:[%s99_s0 + $0x4] sm:$0x1]   ;;  %v51_v2 = vld [vmem:[%s99_s0 + $0x2] sm:$0x1]  }
   0x2   :  { %7 = vrot.lane.b32.xlu0 %v47_v0, %s59_s10  ;;  %19 = vrot.lane.b32.xlu1 %v49_v1, %s60_s11  ;;  %s61_s14 = smov 14   ;;  %v48_v3 = vld [vmem:[%s99_s0 + $0x5] sm:$0x1]   ;;  %v50_v4 = vld [vmem:[%s99_s0 + $0x3] sm:$0x1]   ;;  %s62_s21 = smov 35  }
   0x3   :  { %31 = vrot.lane.b32.xlu2 %v51_v2, %s61_s14  ;;  %v52_v5 = vld [vmem:[%s99_s0 + $0x1] sm:$0x1]   ;;  %s63_s22 = smov 21   ;;  %s64_s23 = smov 7   ;;  %v2_v6 = vld [vmem:[%s99_s0] sm:$0x1]  }
   0x4   :  { %4 = vst.msk [vmem:[#allocation0] sm:$0x1] %vm3_vm0, %v2_v6   ;;  %vm27_vm4 = vcmask 228520   ;;  %vm33_vm5 = vcmask 171120   ;;  %vm39_vm6 = vcmask 113720  }
   0xa   :  { %13 = vrot.lane.b32.xlu0 %v48_v3, %s62_s21  ;;  %25 = vrot.lane.b32.xlu1 %v50_v4, %s63_s22 }
   0xb   :  { %37 = vrot.lane.b32.xlu2 %v52_v5, %s64_s23 }
  0x5d   :  { %v32_v7 = vpop.permute.xlu2 %31  }
  0x65   :  { %v38_v8 = vpop.permute.xlu2 %37  }
  0x74   :  { %v8_v9 = vpop.permute.xlu0 %7   ;;  %v20_v10 = vpop.permute.xlu1 %19  }
  0x75   :  { %10 = vst.msk [vmem:[#allocation0] sm:$0x1] %vm9_vm1, %v8_v9  }
  0x7c   :  { %v14_v11 = vpop.permute.xlu0 %13   ;;  %v26_v12 = vpop.permute.xlu1 %25  }
  0x7d   :  { %16 = vst.msk [vmem:[#allocation0] sm:$0x1] %vm15_vm2, %v14_v11  }
  0x7e   :  { %22 = vst.msk [vmem:[#allocation0] sm:$0x1] %vm21_vm3, %v20_v10  }
  0x7f   :  { %28 = vst.msk [vmem:[#allocation0] sm:$0x1] %vm27_vm4, %v26_v12  }
  0x80   :  { %34 = vst.msk [vmem:[#allocation0] sm:$0x1] %vm33_vm5, %v32_v7  }
  0x81   :  { %40 = vst.msk [vmem:[#allocation0] sm:$0x1] %vm39_vm6, %v38_v8  }
  0x88   :  { %v43_v13 = vld [vmem:[#allocation0] sm:$0x1] }
  0x89   :  { %46 = vst [vmem:[%s100_s1] sm:$0x1] %v43_v13 }

// kernel: multi_head_relational_forward.1
= control target key start
LH: loop header
LB: loop body
LE: loop exit
PB: predicated region body
PF: predicated region fallthrough
CT: control target
= control target key end

     0   :  { %s7159_s0 = inlined_call_operand.vmem [shape: f32[112,6], index: 0, kind: input, shape index: {}]   ;;  %s7160_s1 = inlined_call_operand.vmem [shape: f32[6,19], index: 1, kind: input, shape index: {}]   ;;  %s7161_s2 = inlined_call_operand.vmem [shape: f32[1,19], index: 2, kind: input, shape index: {}]   ;;  %s7162_s3 = inlined_call_operand.vmem [shape: f32[19,23], index: 3, kind: input, shape index: {}]   ;;  %s7163_s4 = inlined_call_operand.vmem [shape: f32[1,23], index: 4, kind: input, shape index: {}]   ;;  %s7164_s5 = inlined_call_operand.vmem [shape: f32[23,768], index: 5, kind: input, shape index: {}]   ;;  %s7165_s6 = inlined_call_operand.vmem [shape: f32[56,768], index: 6, kind: input, shape index: {}]   ;;  %s7166_s7 = inlined_call_operand.vmem [shape: f32[56,768], index: 7, kind: input, shape index: {}]   ;;  %s7167_s8 = inlined_call_operand.vmem [shape: f32[384,384], index: 8, kind: input, shape index: {}]   ;;  %s7168_s9 = inlined_call_operand.vmem [shape: f32[1,384], index: 9, kind: input, shape index: {}]   ;;  %s7169_s10 = inlined_call_operand.vmem [shape: f32[384,384], index: 10, kind: input, shape index: {}]   ;;  %s7170_s11 = inlined_call_operand.vmem [shape: f32[1,384], index: 11, kind: input, shape index: {}]   ;;  %s7171_s12 = inlined_call_operand.vmem [shape: f32[384,192], index: 12, kind: input, shape index: {}]   ;;  %s7172_s13 = inlined_call_operand.vmem [shape: f32[1,64], index: 13, kind: input, shape index: {}]   ;;  %s7173_s14 = inlined_call_operand.vmem [shape: f32[64,128], index: 14, kind: input, shape index: {}]   ;;  %s7174_s15 = inlined_call_operand.vmem [shape: f32[1,128], index: 15, kind: input, shape index: {}]   ;;  %s7175_s16 = inlined_call_operand.hbm [shape: f32[2,1,128], index: 16, kind: output, shape index: {}]  }
   0x1   :  { %7184 = sst [smem:[#allocation13_spill]] %s7159_s0 }
   0x2   :  { %7185 = sst [smem:[#allocation14_spill]] %s7160_s1 }
   0x3   :  { %7186 = sst [smem:[#allocation15_spill]] %s7161_s2 }
   0x4   :  { %7187 = sst [smem:[#allocation16_spill]] %s7162_s3 }
   0x5   :  { %21 = vsyncpa [#allocation3], 0 }
   0x6   :  { %23 = vsyncpa [#allocation3 + $0x1], 0  ;;  %s4288_s21 = smov 0   ;;  %s4290_s22 = smov 0  }
   0x7   :  { %s4292_s23 = smov 0   ;;  %s4294_s24 = smov 0  }
   0x8 LB: > { %7188 = sst [smem:[#allocation5_spill]] %s4195_s23  ;;  %s4309_s25 = sadd.s32 4294967295, %s4199_s24   ;;  %s4199_s24 = sphi %s4294_s24, %s7216_s24   ;;  %s4195_s23 = sphi %s4292_s23, %s7213_s23   ;;  %s4191_s22 = sphi %s4290_s22, %s7215_s22   ;;  %s4187_s21 = sphi %s4288_s21, %s7214_s21  }
   0x9   : > { %s3791_s26 = sadd.s32 4294967294, %s4199_s24   ;;  %s4313_s27 = sadd.s32 1, %s4199_s24  }
   0xa   : > { %s377_s28 = sadd.s32 1, %s4195_s23  ;;  %s374_s29 = ssub.s32 %s4199_s24, %s4313_s27 }
   0xb   : > { %p387_p0 = scmp.ne.s32.totalorder %s4195_s23, %s4191_s22  ;;  %p375_p1 = scmp.eq.s32.totalorder %s374_s29, 0 }
   0xc   : > { %p388_p2 = scmp.eq.s32.totalorder %s4309_s25, 1  ;;  %p393_p3 = scmp.ne.s32.totalorder %s4191_s22, %s4187_s21 }
   0xd   : > { %p394_p4 = scmp.eq.s32.totalorder %s3791_s26, 1  ;;  %p3794_p7 = scmp.ge.s32.totalorder %s4199_s24, 1 }
   0xe   : > { %s4324_s30 = scalar_select %p375_p1, %s4195_s23, %s377_s28  }
   0xf   : > { %p4326_p5 = por %p388_p2, %p387_p0  ;;  %p4330_p6 = por %p394_p4, %p393_p3 }
  0x10   : > { %7189 = sst [smem:[#allocation6_spill]] %s4324_s30  ;;  %p466_p8 = scmp.lt.s32.totalorder %s4199_s24, 3 }
  0x12   : > { %p467_p9 = pnand %p3794_p7, %p466_p8 }
  0x14   : > { %470 = sbr.rel (%p467_p9) target bundleno = 2439 (0x987), region = 84 }
  0x19   : > { %s7192_s1 = sld [smem:[#allocation14_spill]]  ;;  %vm555_vm0 = vcmask 1045504   ;;  %s515_s20 = smul.u32 7, %s4309_s25  ;;  %vm533_vm1 = vcmask 48128   ;;  %vm633_vm2 = vcmask 1042432   ;;  %vm611_vm3 = vcmask 154624  }
  0x1a   : > { %s7193_s30 = sld [smem:[#allocation13_spill]]  ;;  %v694_v33 = vld [vmem:[%s7164_s5 + $0x60] sm:$0x7f]  ;;  %vm722_vm4 = vcmask 1046528   ;;  %v696_v34 = vld [vmem:[%s7164_s5 + $0x70] sm:$0x7f] }
  0x1b   : > { %p516_p10 = scmp.lt.s32.totalorder %s515_s20, 13  ;;  %s7194_s3 = sld [smem:[#allocation16_spill]]  ;;  %3812 = vmatpush.msk.msra.mxu2 %vm722_vm4, %v694_v33  ;;  %v697_v35 = vld [vmem:[%s7164_s5 + $0x78] sm:$0x7f]  ;;  %v688_v36 = vld [vmem:[%s7164_s5 + $0x30] sm:$0xff]  ;;  %v690_v37 = vld [vmem:[%s7164_s5 + $0x40] sm:$0xff]  ;;  %3924 = vmatpush.msk.msra.mxu3 %vm722_vm4, %v694_v33 }
  0x1c   : > { %s7195_s2 = sld [smem:[#allocation15_spill]]  ;;  %v691_v38 = vld [vmem:[%s7164_s5 + $0x48] sm:$0xff]  ;;  %v682_v39 = vld [vmem:[%s7164_s5] sm:$0xff]  ;;  %v684_v40 = vld [vmem:[%s7164_s5 + $0x10] sm:$0xff]  ;;  %vm700_vm5 = vcmask 187392   ;;  %vm1027_vm9 = vcmask 457728  }
  0x1d   : > { %s7218_s20 = smov (!%p516_p10, %s515_s20), 13  ;;  %755 = vmatpush.msra.mxu2 %v688_v36  ;;  %v685_v41 = vld [vmem:[%s7164_s5 + $0x18] sm:$0xff]  ;;  %3925 = vmatpush.msra.mxu3 %v688_v36  ;;  %v3999_v42 = vld [vmem:[%s7163_s4] ss:$0 sm:$0xff]  ;;  %v692_v52 = vld [vmem:[%s7164_s5 + $0x50] sm:$0xff]  ;;  %vm1316_vm13 = vcmask 1040384  }
  0x1e   : > { %s3795_s26 = sshll.u32 %s7218_s20, 3  ;;  %v698_v50 = vld [vmem:[%s7164_s5 + $0x80] sm:$0x7f]  ;;  %v695_v55 = vld [vmem:[%s7164_s5 + $0x68] sm:$0x7f]  ;;  %v689_v56 = vld [vmem:[%s7164_s5 + $0x38] sm:$0xff] }
  0x1f   : > { %v528_v0 = vld [vmem:[%s7192_s1] sm:$0x3f]  ;;  %756 = vmatpush.msra.mxu2 %v682_v39  ;;  %3926 = vmatpush.msra.mxu3 %v682_v39  ;;  %v683_v58 = vld [vmem:[%s7164_s5 + $0x8] sm:$0xff]  ;;  %s4202_s18 = smov 64   ;;  %s513_s19 = sand.u32 1, %s4191_s22  }
  0x20   : > { %3796 = vmatpush.msk.msra.mxu0 %vm555_vm0, %v528_v0  ;;  %s519_s23 = scalar_lea.vmem %s7193_s30, %s3795_s26  ;;  %v686_v54 = vld [vmem:[%s7164_s5 + $0x20] sm:$0xff]  ;;  %s3732_s26 = scalar_lea.hbm %s7175_s16, %s4309_s25 }
  0x21   : > { %v521_v1 = vld [vmem:[%s519_s23] sm:$0xff]  ;;  %v522_v2 = vld [vmem:[%s519_s23 + $0x8] sm:$0xff]  ;;  %v523_v3 = vld [vmem:[%s519_s23 + $0x10] sm:$0xff]  ;;  %3844 = vmatpush.msk.msrb.mxu2 %vm722_vm4, %v698_v50  ;;  %3820 = vmatpush.msk.msrb.mxu3 %vm722_vm4, %v695_v55  ;;  %s514_s28 = scalar_lea.vmem [#allocation2], %s513_s19  ;;  %s3736_s1 = sshll.u32 %s3732_s26, 4  ;;  %s3737_s1 = int_to_ptr.hbm [resolvable:$true] %s3736_s1 }
  0x22   : > { %3797 = vmatmul.msk.f32.vlgmr.msra.gmra.mxu0 %vm533_vm1, %v521_v1  ;;  %v524_v4 = vld [vmem:[%s519_s23 + $0x18] sm:$0xff]  ;;  %v525_v5 = vld [vmem:[%s519_s23 + $0x20] sm:$0xff]  ;;  %v526_v6 = vld [vmem:[%s519_s23 + $0x28] sm:$0xff]  ;;  %s3734_s29 = sshll.u32 %s514_s28, 4  ;;  %s4157_s20 = scalar_lea.hbm %s7175_s16, 2  ;;  %s3735_s29 = int_to_ptr.vmem [resolvable:$true] %s3734_s29 }
  0x23   : > { %v527_v7 = vld [vmem:[%s519_s23 + $0x30] sm:$0xff]  ;;  %v605_v9 = vld [vmem:[%s7194_s3 + $0x8] sm:$0xff]  ;;  %v604_v10 = vld [vmem:[%s7194_s3] sm:$0xff]  ;;  %3828 = vmatpush.msk.msrb.mxu0 %vm722_vm4, %v696_v34  ;;  %907 = vmatpush.msrb.mxu2 %v692_v52  ;;  %s4151_s23 = sshra.s32 %s3737_s1, 4  ;;  %s4152_s23 = int_to_ptr.hbm [resolvable:$true] %s4151_s23 }
  0x24   : > { %v606_v8 = vld [vmem:[%s7194_s3 + $0x10] sm:$0x7]  ;;  %v3998_v11 = vld [vmem:[%s7195_s2] ss:$0 sm:$0xff]  ;;  %793 = vmatpush.msrb.mxu3 %v689_v56  ;;  %s3724_s2 = scalar_lea.sflag [#allocation3], %s513_s19  ;;  %p4158_p0 = scmp.lt.s32.totalorder %s4152_s23, %s7175_s16 }
  0x25   : > { %3804 = vmatpush.msk.msra.mxu1 %vm633_vm2, %v606_v8  ;;  %831 = vmatpush.msrb.mxu0 %v690_v37  ;;  %v687_v8 = vld [vmem:[%s7164_s5 + $0x28] sm:$0xff] }
  0x26   : > { %908 = vmatpush.msrb.mxu2 %v686_v54  ;;  %794 = vmatpush.msrb.mxu3 %v683_v58 }
  0x27   : > { %651 = vmatpush.msra.mxu1 %v605_v9  ;;  %832 = vmatpush.msrb.mxu0 %v684_v40 }
  0x29   : > { %652 = vmatpush.msra.mxu1 %v604_v10 }
  0x2a   : > { %3798 = vmatmul.msk.f32.gmra.mxu0 %vm533_vm1, %v522_v2 }
  0x2b   : > { %3836 = vmatpush.msk.msrb.mxu1 %vm722_vm4, %v697_v35 }
  0x2d   : > { %869 = vmatpush.msrb.mxu1 %v691_v38 }
  0x2f   : > { %870 = vmatpush.msrb.mxu1 %v685_v41  ;;  %v7177_v41 = vmov 0.0  }
  0x32   : > { %3799 = vmatmul.msk.f32.gmra.mxu0 %vm533_vm1, %v523_v3 }
  0x3a   : > { %3800 = vmatmul.msk.f32.gmra.mxu0 %vm533_vm1, %v524_v4 }
  0x42   : > { %3801 = vmatmul.msk.f32.gmra.mxu0 %vm533_vm1, %v525_v5 }
  0x4a   : > { %3802 = vmatmul.msk.f32.gmra.mxu0 %vm533_vm1, %v526_v6  ;;  %v699_v6 = vld [vmem:[%s7164_s5 + $0x88] sm:$0x7f] }
  0x52   : > { %3803 = vmatmul.msk.f32.gmra.mxu0 %vm533_vm1, %v527_v7  ;;  %v693_v7 = vld [vmem:[%s7164_s5 + $0x58] sm:$0xff] }
  0x9f   : > { %v576_v12 = vpop.f32.mrf.mxu0 }
  0xa0   : > { %v577_v13 = vadd.f32 %v3998_v11, %v576_v12 }
  0xa2   : > { %v597_v14 = vmax.f32 %v577_v13, 0.0 }
  0xa4   : > { %3805 = vmatmul.msk.f32.vlgmr.msra.gmra.mxu1 %vm611_vm3, %v597_v14 }
  0xa7   : > { %v579_v15 = vpop.f32.mrf.mxu0 }
  0xa8   : > { %v580_v16 = vadd.f32 %v3998_v11, %v579_v15 }
  0xaa   : > { %v598_v17 = vmax.f32 %v580_v16, 0.0 }
  0xac   : > { %3806 = vmatmul.msk.f32.gmra.mxu1 %vm611_vm3, %v598_v17 }
  0xaf   : > { %v582_v18 = vpop.f32.mrf.mxu0 }
  0xb0   : > { %v583_v19 = vadd.f32 %v3998_v11, %v582_v18 }
  0xb2   : > { %v599_v20 = vmax.f32 %v583_v19, 0.0 }
  0xb4   : > { %3807 = vmatmul.msk.f32.gmra.mxu1 %vm611_vm3, %v599_v20 }
  0xb7   : > { %v585_v21 = vpop.f32.mrf.mxu0 }
  0xb8   : > { %v586_v22 = vadd.f32 %v3998_v11, %v585_v21 }
  0xba   : > { %v600_v23 = vmax.f32 %v586_v22, 0.0 }
  0xbc   : > { %3808 = vmatmul.msk.f32.gmra.mxu1 %vm611_vm3, %v600_v23 }
  0xbf   : > { %v588_v24 = vpop.f32.mrf.mxu0 }
  0xc0   : > { %v589_v25 = vadd.f32 %v3998_v11, %v588_v24 }
  0xc2   : > { %v601_v26 = vmax.f32 %v589_v25, 0.0 }
  0xc4   : > { %3809 = vmatmul.msk.f32.gmra.mxu1 %vm611_vm3, %v601_v26 }
  0xc7   : > { %v591_v27 = vpop.f32.mrf.mxu0 }
  0xc8   : > { %v592_v28 = vadd.f32 %v3998_v11, %v591_v27 }
  0xca   : > { %v602_v29 = vmax.f32 %v592_v28, 0.0  ;;  %v969_v28 = vlaneseq }
  0xcc   : > { %3810 = vmatmul.msk.f32.gmra.mxu1 %vm611_vm3, %v602_v29  ;;  %v4547_v35 = vand.u32 127, %v969_v28 }
  0xce   : > { %vm1018_vm10 = vcmp.lt.s32.totalorder %v4547_v35, 64 }
  0xcf   : > { %v594_v30 = vpop.f32.mrf.mxu0 }
  0xd0   : > { %v595_v31 = vadd.f32 %v3998_v11, %v594_v30 }
  0xd2   : > { %v603_v32 = vmax.f32 %v595_v31, 0.0  ;;  %v4539_v31 = vshrl.u32 %v969_v28, 7 }
  0xd4   : > { %3811 = vmatmul.msk.f32.gmra.mxu1 %vm611_vm3, %v603_v32  ;;  %7196 = vst [vmem:[#allocation7_spill] sm:$0xff] %v4539_v31  ;;  %v973_v33 = vmul.u32 56, %v4539_v31 }
  0xd6   : > { %v975_v36 = vadd.s32 49, %v973_v33  ;;  %vm974_vm6 = vcmp.ge.s32.totalorder %v4547_v35, %v973_v33 }
  0xd8   : > { %vm976_vm7 = vcmp.lt.s32.totalorder %v4547_v35, %v975_v36 }
  0xd9   : > { %vm977_vm8 = vmand %vm974_vm6, %vm976_vm7 }
 0x121   : > { %v654_v43 = vpop.f32.mrf.mxu1 }
 0x122   : > { %v655_v44 = vadd.f32 %v3999_v42, %v654_v43 }
 0x124   : > { %v4396_v45 = vmax.f32 %v655_v44, 0.0 }
 0x126   : > { %3813 = vmatmul.msk.f32.vlgmr.msra.gmra.mxu2 %vm700_vm5, %v4396_v45  ;;  %3829 = vmatmul.msk.f32.vlgmr.msrb.gmra.mxu0 %vm700_vm5, %v4396_v45 }
 0x127   : > { %3837 = vmatmul.msk.f32.vlgmr.msrb.gmra.mxu1 %vm700_vm5, %v4396_v45 }
 0x129   : > { %v657_v46 = vpop.f32.mrf.mxu1 }
 0x12a   : > { %v658_v47 = vadd.f32 %v3999_v42, %v657_v46 }
 0x12c   : > { %v4404_v48 = vmax.f32 %v658_v47, 0.0 }
 0x12e   : > { %3814 = vmatmul.msk.f32.gmra.mxu2 %vm700_vm5, %v4404_v48  ;;  %3830 = vmatmul.msk.f32.gmra.mxu0 %vm700_vm5, %v4404_v48 }
 0x12f   : > { %3838 = vmatmul.msk.f32.gmra.mxu1 %vm700_vm5, %v4404_v48 }
 0x131   : > { %v660_v49 = vpop.f32.mrf.mxu1 }
 0x132   : > { %v661_v51 = vadd.f32 %v3999_v42, %v660_v49 }
 0x134   : > { %v677_v53 = vmax.f32 %v661_v51, 0.0 }
 0x136   : > { %3815 = vmatmul.msk.f32.gmra.mxu2 %vm700_vm5, %v677_v53  ;;  %3831 = vmatmul.msk.f32.gmra.mxu0 %vm700_vm5, %v677_v53 }
 0x137   : > { %3839 = vmatmul.msk.f32.gmra.mxu1 %vm700_vm5, %v677_v53 }
 0x139   : > { %v663_v57 = vpop.f32.mrf.mxu1 }
 0x13a   : > { %v664_v59 = vadd.f32 %v3999_v42, %v663_v57 }
 0x13c   : > { %v678_v60 = vmax.f32 %v664_v59, 0.0 }
 0x13e   : > { %3816 = vmatmul.msk.f32.gmra.mxu2 %vm700_vm5, %v678_v60  ;;  %3832 = vmatmul.msk.f32.gmra.mxu0 %vm700_vm5, %v678_v60 }
 0x13f   : > { %3840 = vmatmul.msk.f32.gmra.mxu1 %vm700_vm5, %v678_v60 }
 0x141   : > { %v666_v61 = vpop.f32.mrf.mxu1 }
 0x142   : > { %v667_v62 = vadd.f32 %v3999_v42, %v666_v61 }
 0x144   : > { %v679_v63 = vmax.f32 %v667_v62, 0.0 }
 0x146   : > { %3817 = vmatmul.msk.f32.gmra.mxu2 %vm700_vm5, %v679_v63  ;;  %3833 = vmatmul.msk.f32.gmra.mxu0 %vm700_vm5, %v679_v63 }
 0x147   : > { %3841 = vmatmul.msk.f32.gmra.mxu1 %vm700_vm5, %v679_v63 }
 0x149   : > { %v669_v0 = vpop.f32.mrf.mxu1 }
 0x14a   : > { %v670_v1 = vadd.f32 %v3999_v42, %v669_v0 }
 0x14c   : > { %v680_v2 = vmax.f32 %v670_v1, 0.0 }
 0x14e   : > { %3818 = vmatmul.msk.f32.gmra.mxu2 %vm700_vm5, %v680_v2  ;;  %3834 = vmatmul.msk.f32.gmra.mxu0 %vm700_vm5, %v680_v2 }
 0x14f   : > { %3842 = vmatmul.msk.f32.gmra.mxu1 %vm700_vm5, %v680_v2 }
 0x151   : > { %v672_v3 = vpop.f32.mrf.mxu1 }
 0x152   : > { %v673_v4 = vadd.f32 %v3999_v42, %v672_v3  ;;  %v4560_v42 = vsel %vm977_vm8, 1.0, %v7177_v41 }
 0x153   : > { %7197 = vst [vmem:[#allocation8_spill] sm:$0xff] %v4560_v42 }
 0x154   : > { %v681_v5 = vmax.f32 %v673_v4, 0.0 }
 0x156   : > { %3819 = vmatmul.msk.f32.vlgmr.msra.gmra.mxu3 %vm700_vm5, %v681_v5  ;;  %3835 = vmatmul.msk.f32.gmra.mxu0 %vm700_vm5, %v681_v5 }
 0x157   : > { %3843 = vmatmul.msk.f32.gmra.mxu1 %vm700_vm5, %v681_v5  ;;  %3845 = vmatmul.msk.f32.vlgmr.msrb.gmra.mxu2 %vm700_vm5, %v4396_v45 }
 0x158   : > { %3852 = vmatpush.msk.msra.mxu3 %vm722_vm4, %v699_v6 }
 0x15a   : > { %945 = vmatpush.msra.mxu3 %v693_v7 }
 0x15c   : > { %946 = vmatpush.msra.mxu3 %v687_v8 }
 0x15e   : > { %3821 = vmatmul.msk.f32.vlgmr.msrb.gmra.mxu3 %vm700_vm5, %v4396_v45 }
 0x15f   : > { %3846 = vmatmul.msk.f32.gmra.mxu2 %vm700_vm5, %v4404_v48 }
 0x166   : > { %3822 = vmatmul.msk.f32.gmra.mxu3 %vm700_vm5, %v4404_v48 }
 0x167   : > { %3847 = vmatmul.msk.f32.gmra.mxu2 %vm700_vm5, %v677_v53 }
 0x16e   : > { %3823 = vmatmul.msk.f32.gmra.mxu3 %vm700_vm5, %v677_v53 }
 0x16f   : > { %3848 = vmatmul.msk.f32.gmra.mxu2 %vm700_vm5, %v678_v60 }
 0x176   : > { %3824 = vmatmul.msk.f32.gmra.mxu3 %vm700_vm5, %v678_v60 }
 0x177   : > { %3849 = vmatmul.msk.f32.gmra.mxu2 %vm700_vm5, %v679_v63 }
 0x17e   : > { %3825 = vmatmul.msk.f32.gmra.mxu3 %vm700_vm5, %v679_v63 }
 0x17f   : > { %3850 = vmatmul.msk.f32.gmra.mxu2 %vm700_vm5, %v680_v2 }
 0x186   : > { %3826 = vmatmul.msk.f32.gmra.mxu3 %vm700_vm5, %v680_v2 }
 0x187   : > { %3851 = vmatmul.msk.f32.gmra.mxu2 %vm700_vm5, %v681_v5 }
 0x18e   : > { %3827 = vmatmul.msk.f32.gmra.mxu3 %vm700_vm5, %v681_v5 }
 0x196   : > { %3853 = vmatmul.msk.f32.vlgmr.msra.gmra.mxu3 %vm700_vm5, %v4396_v45 }
 0x19e   : > { %3854 = vmatmul.msk.f32.gmra.mxu3 %vm700_vm5, %v4404_v48 }
 0x1a3   : > { %v4479_v9 = vpop.f32.mrf.mxu0 }
 0x1a4   : > { %v4534_v29 = vpop.f32.mrf.mxu1 }
 0x1a6   : > { %3855 = vmatmul.msk.f32.gmra.mxu3 %vm700_vm5, %v677_v53 }
 0x1a9   : > { %v4482_v10 = vpop.f32.mrf.mxu2 }
 0x1aa   : > { %v1151_v40 = vmul.f32 %v4482_v10, %v4482_v10 }
 0x1ab   : > { %v4484_v11 = vpop.f32.mrf.mxu0 }
 0x1ac   : > { %v4562_v43 = vpop.f32.mrf.mxu1  ;;  %v1159_v7 = vmul.f32 %v4484_v11, %v4484_v11 }
 0x1ae   : > { %3856 = vmatmul.msk.f32.gmra.mxu3 %vm700_vm5, %v678_v60 }
 0x1b1   : > { %v4487_v12 = vpop.f32.mrf.mxu2 }
 0x1b2   : > { %v1157_v38 = vmul.f32 %v4487_v12, %v4487_v12 }
 0x1b3   : > { %v4489_v13 = vpop.f32.mrf.mxu0 }
 0x1b4   : > { %v4574_v46 = vpop.f32.mrf.mxu1 }
 0x1b5   : > { %7198 = vst [vmem:[#allocation9_spill] sm:$0xff] %v4574_v46 }
 0x1b6   : > { %3857 = vmatmul.msk.f32.gmra.mxu3 %vm700_vm5, %v679_v63 }
 0x1b9   : > { %v4492_v14 = vpop.f32.mrf.mxu2 }
 0x1ba   : > { %v1163_v34 = vmul.f32 %v4492_v14, %v4492_v14 }
 0x1bb   : > { %v4494_v15 = vpop.f32.mrf.mxu0 }
 0x1bc   : > { %v4580_v49 = vpop.f32.mrf.mxu1  ;;  %v1171_v4 = vmul.f32 %v4494_v15, %v4494_v15 }
 0x1bd   : > { %7199 = vst [vmem:[#allocation10_spill] sm:$0xff] %v4580_v49 }
 0x1be   : > { %3858 = vmatmul.msk.f32.gmra.mxu3 %vm700_vm5, %v680_v2 }
 0x1c1   : > { %v4497_v16 = vpop.f32.mrf.mxu2 }
 0x1c2   : > { %v1169_v32 = vmul.f32 %v4497_v16, %v4497_v16 }
 0x1c3   : > { %v4499_v17 = vpop.f32.mrf.mxu0 }
 0x1c4   : > { %v4590_v54 = vpop.f32.mrf.mxu1  ;;  %v1177_v3 = vmul.f32 %v4499_v17, %v4499_v17 }
 0x1c6   : > { %3859 = vmatmul.msk.f32.gmra.mxu3 %vm700_vm5, %v681_v5  ;;  %v1165_v5 = vmul.f32 %v4489_v13, %v4489_v13 }
 0x1c9   : > { %v4502_v18 = vpop.f32.mrf.mxu2 }
 0x1ca   : > { %v1175_v30 = vmul.f32 %v4502_v18, %v4502_v18 }
 0x1cb   : > { %v4504_v19 = vpop.f32.mrf.mxu0 }
 0x1cc   : > { %v4611_v61 = vpop.f32.mrf.mxu1  ;;  %v1183_v1 = vmul.f32 %v4504_v19, %v4504_v19 }
 0x1d1   : > { %v4506_v20 = vpop.f32.mrf.mxu2 }
 0x1d2   : > { %v1181_v26 = vmul.f32 %v4506_v20, %v4506_v20 }
 0x1d3   : > { %v4508_v21 = vpop.f32.mrf.mxu0 }
 0x1d4   : > { %1080 = vmatpush.msra.mxu2 %v4508_v21  ;;  %v1189_v63 = vmul.f32 %v4508_v21, %v4508_v21  ;;  %v4640_v6 = vpop.f32.mrf.mxu1 }
 0x1d6   : > { %1081 = vmatpush.msra.mxu2 %v4504_v19 }
 0x1d8   : > { %1082 = vmatpush.msra.mxu2 %v4499_v17 }
 0x1d9   : > { %v4513_v22 = vpop.f32.mrf.mxu3 }
 0x1da   : > { %v4515_v23 = vpop.f32.mrf.mxu2  ;;  %1040 = vmatpush.msra.mxu0 %v4513_v22  ;;  %1083 = vmatpush.msra.mxu2 %v4494_v15  ;;  %v1187_v24 = vmul.f32 %v4513_v22, %v4513_v22 }
 0x1db   : > { %v1155_v0 = vmul.f32 %v4515_v23, %v4515_v23 }
 0x1dc   : > { %1041 = vmatpush.msra.mxu0 %v4506_v20  ;;  %1084 = vmatpush.msra.mxu2 %v4489_v13 }
 0x1de   : > { %1042 = vmatpush.msra.mxu0 %v4502_v18  ;;  %1085 = vmatpush.msra.mxu2 %v4484_v11 }
 0x1e0   : > { %1043 = vmatpush.msra.mxu0 %v4497_v16  ;;  %1086 = vmatpush.msra.mxu2 %v4479_v9 }
 0x1e1   : > { %v4527_v25 = vpop.f32.mrf.mxu3  ;;  %3866 = vmatmul.msk.f32.vlgmr.msra.gmra.mxu2 %vm1027_vm9, %v4560_v42 }
 0x1e2   : > { %1202 = vmatpush.msrb.mxu2 %v1187_v24  ;;  %v4531_v27 = vpop.f32.mrf.mxu2  ;;  %1044 = vmatpush.msra.mxu0 %v4492_v14  ;;  %v1153_v24 = vmul.f32 %v4479_v9, %v4479_v9 }
 0x1e3   : > { %v1161_v62 = vmul.f32 %v4531_v27, %v4531_v27 }
 0x1e4   : > { %1203 = vmatpush.msrb.mxu2 %v1181_v26  ;;  %1045 = vmatpush.msra.mxu0 %v4487_v12 }
 0x1e6   : > { %1204 = vmatpush.msrb.mxu2 %v1175_v30  ;;  %1046 = vmatpush.msra.mxu0 %v4482_v10 }
 0x1e7   : > { %3864 = vmatmul.msk.f32.vlgmr.msra.gmra.mxu0 %vm1027_vm9, %v4560_v42 }
 0x1e8   : > { %1205 = vmatpush.msrb.mxu2 %v1169_v32 }
 0x1e9   : > { %v4549_v37 = vpop.f32.mrf.mxu3 }
 0x1ea   : > { %1206 = vmatpush.msrb.mxu2 %v1163_v34  ;;  %v4553_v39 = vpop.f32.mrf.mxu2 }
 0x1eb   : > { %v1167_v60 = vmul.f32 %v4553_v39, %v4553_v39 }
 0x1ec   : > { %1207 = vmatpush.msrb.mxu2 %v1157_v38  ;;  %v1158_v38 = vmul.f32 %v4549_v37, %v4549_v37 }
 0x1ee   : > { %1208 = vmatpush.msrb.mxu2 %v1151_v40  ;;  %v1152_v40 = vmul.f32 %v4527_v25, %v4527_v25 }
 0x1ef   : > { %3870 = vmatmul.msk.f32.vlgmr.msrb.gmra.mxu2 %vm1027_vm9, %v4560_v42 }
 0x1f1   : > { %v4568_v44 = vpop.f32.mrf.mxu3 }
 0x1f2   : > { %v4570_v45 = vpop.f32.mrf.mxu2  ;;  %v1164_v36 = vmul.f32 %v4568_v44, %v4568_v44 }
 0x1f3   : > { %v1173_v59 = vmul.f32 %v4570_v45, %v4570_v45 }
 0x1f9   : > { %v4576_v47 = vpop.f32.mrf.mxu3 }
 0x1fa   : > { %v4578_v48 = vpop.f32.mrf.mxu2  ;;  %v1170_v34 = vmul.f32 %v4576_v47, %v4576_v47 }
 0x1fb   : > { %v1179_v57 = vmul.f32 %v4578_v48, %v4578_v48 }
 0x201   : > { %v4582_v50 = vpop.f32.mrf.mxu3 }
 0x202   : > { %v4584_v51 = vpop.f32.mrf.mxu2  ;;  %v1176_v32 = vmul.f32 %v4582_v50, %v4582_v50 }
 0x203   : > { %v1185_v56 = vmul.f32 %v4584_v51, %v4584_v51 }
 0x209   : > { %v4586_v52 = vpop.f32.mrf.mxu3 }
 0x20a   : > { %v4588_v53 = vpop.f32.mrf.mxu2  ;;  %v1182_v30 = vmul.f32 %v4586_v52, %v4586_v52 }
 0x20b   : > { %v1191_v55 = vmul.f32 %v4588_v53, %v4588_v53  ;;  %1120 = vmatpush.msrb.mxu0 %v4588_v53 }
 0x20d   : > { %1121 = vmatpush.msrb.mxu0 %v4584_v51  ;;  %1282 = vmatpush.msra.mxu2 %v1191_v55 }
 0x20f   : > { %1122 = vmatpush.msrb.mxu0 %v4578_v48  ;;  %1283 = vmatpush.msra.mxu2 %v1185_v56 }
 0x211   : > { %1123 = vmatpush.msrb.mxu0 %v4570_v45  ;;  %1284 = vmatpush.msra.mxu2 %v1179_v57  ;;  %v4602_v58 = vpop.f32.mrf.mxu3 }
 0x212   : > { %1060 = vmatpush.msrb.mxu3 %v4602_v58  ;;  %v1188_v28 = vmul.f32 %v4602_v58, %v4602_v58 }
 0x213   : > { %1124 = vmatpush.msrb.mxu0 %v4553_v39  ;;  %1285 = vmatpush.msra.mxu2 %v1173_v59 }
 0x214   : > { %1061 = vmatpush.msrb.mxu3 %v4586_v52 }
 0x215   : > { %1125 = vmatpush.msrb.mxu0 %v4531_v27  ;;  %1286 = vmatpush.msra.mxu2 %v1167_v60 }
 0x216   : > { %1062 = vmatpush.msrb.mxu3 %v4582_v50 }
 0x217   : > { %1126 = vmatpush.msrb.mxu0 %v4515_v23  ;;  %1287 = vmatpush.msra.mxu2 %v1161_v62 }
 0x218   : > { %1063 = vmatpush.msrb.mxu3 %v4576_v47  ;;  %3868 = vmatmul.msk.f32.vlgmr.msrb.gmra.mxu0 %vm1027_vm9, %v4560_v42 }
 0x219   : > { %1242 = vmatpush.msra.mxu0 %v1189_v63  ;;  %1288 = vmatpush.msra.mxu2 %v1155_v0  ;;  %v4625_v2 = vpop.f32.mrf.mxu3 }
 0x21a   : > { %1064 = vmatpush.msrb.mxu3 %v4568_v44  ;;  %3874 = vmatmul.msk.f32.vlgmr.msra.gmra.mxu2 %vm1027_vm9, %v4560_v42 }
 0x21b   : > { %1243 = vmatpush.msra.mxu0 %v1183_v1 }
 0x21c   : > { %1065 = vmatpush.msrb.mxu3 %v4549_v37 }
 0x21d   : > { %1244 = vmatpush.msra.mxu0 %v1177_v3  ;;  %v1190_v3 = vmul.f32 %v4640_v6, %v4640_v6 }
 0x21e   : > { %1066 = vmatpush.msrb.mxu3 %v4527_v25 }
 0x21f   : > { %1245 = vmatpush.msra.mxu0 %v1171_v4  ;;  %3865 = vmatmul.msk.f32.vlgmr.msrb.gmra.mxu3 %vm1027_vm9, %v4560_v42  ;;  %v1156_v4 = vmul.f32 %v4625_v2, %v4625_v2 }
 0x220   : > { %1100 = vmatpush.msra.mxu3 %v4640_v6 }
 0x221   : > { %1246 = vmatpush.msra.mxu0 %v1165_v5  ;;  %v4647_v8 = vpop.f32.mrf.mxu3  ;;  %v1184_v5 = vmul.f32 %v4611_v61, %v4611_v61 }
 0x222   : > { %1101 = vmatpush.msra.mxu3 %v4611_v61  ;;  %v1162_v1 = vmul.f32 %v4647_v8, %v4647_v8 }
 0x223   : > { %1247 = vmatpush.msra.mxu0 %v1159_v7  ;;  %v1178_v7 = vmul.f32 %v4590_v54, %v4590_v54 }
 0x224   : > { %1102 = vmatpush.msra.mxu3 %v4590_v54 }
 0x225   : > { %1248 = vmatpush.msra.mxu0 %v1153_v24  ;;  %v1172_v24 = vmul.f32 %v4580_v49, %v4580_v49 }
 0x226   : > { %3872 = vmatmul.msk.f32.vlgmr.msra.gmra.mxu0 %vm1027_vm9, %v4560_v42  ;;  %1103 = vmatpush.msra.mxu3 %v4580_v49 }
 0x228   : > { %1104 = vmatpush.msra.mxu3 %v4574_v46 }
 0x229   : > { %v4657_v26 = vpop.f32.mrf.mxu3 }
 0x22a   : > { %1105 = vmatpush.msra.mxu3 %v4562_v43  ;;  %v1168_v0 = vmul.f32 %v4657_v26, %v4657_v26 }
 0x22c   : > { %1106 = vmatpush.msra.mxu3 %v4534_v29 }
 0x22d   : > { %3867 = vmatmul.msk.f32.vlgmr.msra.gmra.mxu3 %vm1027_vm9, %v4560_v42 }
 0x22e   : > { %1222 = vmatpush.msrb.mxu3 %v1188_v28  ;;  %v1166_v28 = vmul.f32 %v4574_v46, %v4574_v46 }
 0x230   : > { %1223 = vmatpush.msrb.mxu3 %v1182_v30  ;;  %v1160_v30 = vmul.f32 %v4562_v43, %v4562_v43 }
 0x231   : > { %v4669_v33 = vpop.f32.mrf.mxu3 }
 0x232   : > { %1224 = vmatpush.msrb.mxu3 %v1176_v32  ;;  %v1174_v63 = vmul.f32 %v4669_v33, %v4669_v33  ;;  %v1154_v32 = vmul.f32 %v4534_v29, %v4534_v29 }
 0x234   : > { %1225 = vmatpush.msrb.mxu3 %v1170_v34  ;;  %v981_v34 = vadd.s32 256, %v4547_v35 }
 0x236   : > { %1226 = vmatpush.msrb.mxu3 %v1164_v36  ;;  %v980_v36 = vadd.s32 128, %v4547_v35 }
 0x238   : > { %1227 = vmatpush.msrb.mxu3 %v1158_v38  ;;  %v1000_v38 = vand.u32 127, %v981_v34 }
 0x239   : > { %v4679_v55 = vpop.f32.mrf.mxu3 }
 0x23a   : > { %1228 = vmatpush.msrb.mxu3 %v1152_v40  ;;  %v1180_v62 = vmul.f32 %v4679_v55, %v4679_v55  ;;  %v993_v40 = vand.u32 127, %v980_v36  ;;  %vm1020_vm11 = vcmp.lt.s32.totalorder %v1000_v38, 64 }
 0x23b   : > { %3871 = vmatmul.msk.f32.vlgmr.msrb.gmra.mxu3 %vm1027_vm9, %v4560_v42 }
 0x23c   : > { %vm1019_vm12 = vcmp.lt.s32.totalorder %v993_v40, 64 }
 0x241   : > { %v4683_v56 = vpop.f32.mrf.mxu3 }
 0x242   : > { %7200 = vst [vmem:[#allocation11_spill] sm:$0xff] %v4683_v56  ;;  %v1186_v60 = vmul.f32 %v4683_v56, %v4683_v56 }
 0x249   : > { %v4685_v57 = vpop.f32.mrf.mxu3 }
 0x24a   : > { %7201 = vst [vmem:[#allocation12_spill] sm:$0xff] %v4685_v57  ;;  %v1192_v59 = vmul.f32 %v4685_v57, %v4685_v57  ;;  %1140 = vmatpush.msra.mxu1 %v4685_v57 }
 0x24c   : > { %1141 = vmatpush.msra.mxu1 %v4683_v56  ;;  %1302 = vmatpush.msra.mxu3 %v1192_v59  ;;  %v4732_v59 = vsel %vm1018_vm10, 1.0, %v7177_v41 }
 0x24e   : > { %1142 = vmatpush.msra.mxu1 %v4679_v55  ;;  %1303 = vmatpush.msra.mxu3 %v1186_v60 }
 0x250   : > { %1143 = vmatpush.msra.mxu1 %v4669_v33  ;;  %1304 = vmatpush.msra.mxu3 %v1180_v62 }
 0x252   : > { %1144 = vmatpush.msra.mxu1 %v4657_v26  ;;  %1305 = vmatpush.msra.mxu3 %v1174_v63  ;;  %v4735_v63 = vsel %vm1020_vm11, 1.0, %v7177_v41 }
 0x254   : > { %1145 = vmatpush.msra.mxu1 %v4647_v8  ;;  %1306 = vmatpush.msra.mxu3 %v1168_v0 }
 0x256   : > { %1146 = vmatpush.msra.mxu1 %v4625_v2  ;;  %1307 = vmatpush.msra.mxu3 %v1162_v1  ;;  %v4739_v1 = vsel %vm1019_vm12, 1.0, %v7177_v41 }
 0x257   : > { %3869 = vmatmul.msk.f32.vlgmr.msra.gmra.mxu1 %vm1027_vm9, %v4560_v42 }
 0x258   : > { %1262 = vmatpush.msrb.mxu1 %v1190_v3  ;;  %1308 = vmatpush.msra.mxu3 %v1156_v4 }
 0x259   : > { %3875 = vmatmul.msk.f32.vlgmr.msra.gmra.mxu3 %vm1027_vm9, %v4560_v42 }
 0x25a   : > { %1263 = vmatpush.msrb.mxu1 %v1184_v5 }
 0x25c   : > { %1264 = vmatpush.msrb.mxu1 %v1178_v7 }
 0x25e   : > { %1265 = vmatpush.msrb.mxu1 %v1172_v24 }
 0x260   : > { %1266 = vmatpush.msrb.mxu1 %v1166_v28 }
 0x262   : > { %1267 = vmatpush.msrb.mxu1 %v1160_v30 }
 0x264   : > { %1268 = vmatpush.msrb.mxu1 %v1154_v32  ;;  %v1048_v60 = vpop.f32.mrf.mxu0  ;;  %v1088_v62 = vpop.f32.mrf.mxu2 }
 0x265   : > { %3873 = vmatmul.msk.f32.vlgmr.msrb.gmra.mxu1 %vm1027_vm9, %v4560_v42  ;;  %v1313_v0 = vmul.f32 %v4732_v59, %v1048_v60  ;;  %v1315_v3 = vmul.f32 %v4735_v63, %v1088_v62  ;;  %v1349_v30 = vsel %vm1316_vm13, %v1048_v60, 0.0  ;;  %v1352_v38 = vsel %vm1316_vm13, %v1088_v62, 0.0 }
 0x267   : > { %v1317_v5 = vsel %vm1316_vm13, %v1313_v0, 0.0  ;;  %v1320_v24 = vsel %vm1316_vm13, %v1315_v3, 0.0 }
 0x272   : > { %v1210_v31 = vpop.f32.mrf.mxu2 }
 0x295   : > { %v1128_v41 = vpop.f32.mrf.mxu0 }
 0x2a2   : > { %v1068_v35 = vpop.f32.mrf.mxu3 }
 0x2a3   : > { %v1314_v4 = vmul.f32 %v4739_v1, %v1068_v35  ;;  %v1350_v32 = vsel %vm1316_vm13, %v1068_v35, 0.0  ;;  %v1250_v0 = vpop.f32.mrf.mxu0 }
 0x2a4   : > { %v1351_v36 = vadd.f32 %v1350_v32, %v1349_v30  ;;  %v1326_v3 = vmul.f32 %v4735_v63, %v1250_v0  ;;  %v1357_v30 = vsel %vm1316_vm13, %v1210_v31, 0.0 }
 0x2a5   : > { %v1318_v7 = vsel %vm1316_vm13, %v1314_v4, 0.0  ;;  %v1324_v4 = vmul.f32 %v4732_v59, %v1210_v31 }
 0x2a6   : > { %v1319_v28 = vadd.f32 %v1318_v7, %v1317_v5  ;;  %v1353_v40 = vadd.f32 %v1352_v38, %v1351_v36  ;;  %v1360_v36 = vsel %vm1316_vm13, %v1250_v0, 0.0 }
 0x2a7   : > { %v1327_v35 = vsel %vm1316_vm13, %v1324_v4, 0.0  ;;  %v1381_v4 = vsel %vm1316_vm13, %v1128_v41, 0.0  ;;  %v1728_v41 = vld [vmem:[%s7167_s8 + $0x168] sm:$0xff] }
 0x2a8   : > { %v1321_v34 = vadd.f32 %v1320_v24, %v1319_v28  ;;  %v1330_v24 = vsel %vm1316_vm13, %v1326_v3, 0.0  ;;  %1835 = vmatpush.msrb.mxu0 %v1728_v41  ;;  %v1717_v41 = vld [vmem:[%s7167_s8 + $0x110] sm:$0xff] }
 0x2aa   : > { %1322 = vadd.xlane.f32.xlu0 %v1321_v34 }
 0x2b0   : > { %v1108_v42 = vpop.f32.mrf.mxu3 }
 0x2b2   : > { %1354 = vadd.xlane.f32.xlu0 %v1353_v40  ;;  %v1380_v40 = vsel %vm1316_vm13, %v1108_v42, 0.0  ;;  %v1776_v42 = vld [vmem:[%s7167_s8 + $0x2e8] sm:$0xff] }
 0x2b3   : > { %1873 = vmatpush.msra.mxu1 %v1776_v42  ;;  %v1713_v42 = vld [vmem:[%s7167_s8 + $0xf0] sm:$0xff] }
 0x2be   : > { %v1230_v5 = vpop.f32.mrf.mxu3 }
 0x2bf   : > { %v1325_v60 = vmul.f32 %v4739_v1, %v1230_v5  ;;  %v1358_v32 = vsel %vm1316_vm13, %v1230_v5, 0.0 }
 0x2c0   : > { %v1359_v34 = vadd.f32 %v1358_v32, %v1357_v30  ;;  %v1729_v32 = vld [vmem:[%s7167_s8 + $0x170] sm:$0xff] }
 0x2c1   : > { %v1328_v7 = vsel %vm1316_vm13, %v1325_v60, 0.0  ;;  %v1382_v60 = vadd.f32 %v1381_v4, %v1380_v40  ;;  %1949 = vmatpush.msrb.mxu3 %v1729_v32  ;;  %v1726_v40 = vld [vmem:[%s7167_s8 + $0x158] sm:$0xff]  ;;  %v1809_v32 = vld [vmem:[%s7167_s8 + $0x3f0] sm:$0xff] }
 0x2c2   : > { %v1329_v62 = vadd.f32 %v1328_v7, %v1327_v35  ;;  %v1361_v38 = vadd.f32 %v1360_v36, %v1359_v34  ;;  %v1290_v7 = vpop.f32.mrf.mxu2  ;;  %v1725_v34 = vld [vmem:[%s7167_s8 + $0x150] sm:$0xff]  ;;  %v1722_v4 = vld [vmem:[%s7167_s8 + $0x138] sm:$0xff] }
 0x2c3   : > { %v1388_v5 = vsel %vm1316_vm13, %v1290_v7, 0.0  ;;  %v1773_v36 = vld [vmem:[%s7167_s8 + $0x2d0] sm:$0xff]  ;;  %1836 = vmatpush.msrb.mxu0 %v1725_v34  ;;  %1950 = vmatpush.msrb.mxu3 %v1726_v40  ;;  %v1723_v7 = vld [vmem:[%s7167_s8 + $0x140] sm:$0xff]  ;;  %v1714_v34 = vld [vmem:[%s7167_s8 + $0xf8] sm:$0xff] }
 0x2c4   : > { %v1331_v28 = vadd.f32 %v1330_v24, %v1329_v62  ;;  %1874 = vmatpush.msra.mxu1 %v1773_v36  ;;  %v1758_v40 = vld [vmem:[%s7167_s8 + $0x258] sm:$0xff] }
 0x2c5   : > { %1837 = vmatpush.msrb.mxu0 %v1722_v4  ;;  %1951 = vmatpush.msrb.mxu3 %v1723_v7  ;;  %v1806_v4 = vld [vmem:[%s7167_s8 + $0x3d8] sm:$0xff]  ;;  %v1755_v7 = vld [vmem:[%s7167_s8 + $0x240] sm:$0xff] }
 0x2c6   : > { %1332 = vadd.xlane.f32.xlu1 %v1331_v28 }
 0x2ce   : > { %1362 = vadd.xlane.f32.xlu1 %v1361_v38  ;;  %v1821_v38 = vld [vmem:[%s7167_s8 + $0x450] sm:$0xff] }
 0x2d4   : > { %v1148_v49 = vpop.f32.mrf.mxu1 }
 0x2d5   : > { %v1383_v3 = vsel %vm1316_vm13, %v1148_v49, 0.0  ;;  %v1824_v49 = vld [vmem:[%s7167_s8 + $0x468] sm:$0xff] }
 0x2d6   : > { %v1384_v35 = vadd.f32 %v1383_v3, %v1382_v60  ;;  %1911 = vmatpush.msrb.mxu2 %v1824_v49  ;;  %v1770_v60 = vld [vmem:[%s7167_s8 + $0x2b8] sm:$0xff]  ;;  %v1761_v49 = vld [vmem:[%s7167_s8 + $0x270] sm:$0xff] }
 0x2d7   : > { %v1818_v3 = vld [vmem:[%s7167_s8 + $0x438] sm:$0xff]  ;;  %1875 = vmatpush.msra.mxu1 %v1770_v60  ;;  %v1711_v60 = vld [vmem:[%s7167_s8 + $0xe0] sm:$0xff] }
 0x2d8   : > { %1385 = vadd.xlane.f32.xlu2 %v1384_v35  ;;  %1912 = vmatpush.msrb.mxu2 %v1821_v38  ;;  %v1710_v38 = vld [vmem:[%s7167_s8 + $0xd8] sm:$0xff] }
 0x2da   : > { %1913 = vmatpush.msrb.mxu2 %v1818_v3  ;;  %v1707_v3 = vld [vmem:[%s7167_s8 + $0xc0] sm:$0xff] }
 0x2dc   : > { %v1310_v31 = vpop.f32.mrf.mxu3 }
 0x2dd   : > { %v1390_v0 = vsel %vm1316_vm13, %v1310_v31, 0.0  ;;  %v1719_v31 = vld [vmem:[%s7167_s8 + $0x120] sm:$0xff] }
 0x2de   : > { %1838 = vmatpush.msrb.mxu0 %v1719_v31  ;;  %v1803_v31 = vld [vmem:[%s7167_s8 + $0x3c0] sm:$0xff] }
 0x2e2   : > { %v1270_v24 = vpop.f32.mrf.mxu1 }
 0x2e3   : > { %v1387_v62 = vsel %vm1316_vm13, %v1270_v24, 0.0  ;;  %v1815_v24 = vld [vmem:[%s7167_s8 + $0x420] sm:$0xff] }
 0x2e4   : > { %v1389_v28 = vadd.f32 %v1388_v5, %v1387_v62  ;;  %v1767_v5 = vld [vmem:[%s7167_s8 + $0x2a0] sm:$0xff]  ;;  %v1720_v62 = vld [vmem:[%s7167_s8 + $0x128] sm:$0xff]  ;;  %1914 = vmatpush.msrb.mxu2 %v1815_v24 }
 0x2e5   : > { %1876 = vmatpush.msra.mxu1 %v1767_v5  ;;  %1952 = vmatpush.msrb.mxu3 %v1720_v62  ;;  %v1708_v62 = vld [vmem:[%s7167_s8 + $0xc8] sm:$0xff] }
 0x2e6   : > { %v1391_v30 = vadd.f32 %v1390_v0, %v1389_v28  ;;  %v1716_v0 = vld [vmem:[%s7167_s8 + $0x108] sm:$0xff] }
 0x2e7   : > { %v1764_v28 = vld [vmem:[%s7167_s8 + $0x288] sm:$0xff]  ;;  %1839 = vmatpush.msrb.mxu0 %v1716_v0  ;;  %1953 = vmatpush.msrb.mxu3 %v1717_v41 }
 0x2e8   : > { %1392 = vadd.xlane.f32.xlu2 %v1391_v30  ;;  %v1812_v30 = vld [vmem:[%s7167_s8 + $0x408] sm:$0xff]  ;;  %1877 = vmatpush.msra.mxu1 %v1764_v28 }
 0x2e9   : > { %1915 = vmatpush.msrb.mxu2 %v1812_v30  ;;  %1840 = vmatpush.msrb.mxu0 %v1713_v42  ;;  %v1704_v30 = vld [vmem:[%s7167_s8 + $0xa8] sm:$0xff] }
 0x2ea   : > { %1878 = vmatpush.msra.mxu1 %v1761_v49  ;;  %1954 = vmatpush.msrb.mxu3 %v1714_v34  ;;  %v1752_v41 = vld [vmem:[%s7167_s8 + $0x228] sm:$0xff]  ;;  %v1705_v49 = vld [vmem:[%s7167_s8 + $0xb0] sm:$0xff] }
 0x2eb   : > { %1916 = vmatpush.msrb.mxu2 %v1809_v32  ;;  %1841 = vmatpush.msrb.mxu0 %v1710_v38  ;;  %v1800_v42 = vld [vmem:[%s7167_s8 + $0x3a8] sm:$0xff]  ;;  %v1701_v38 = vld [vmem:[%s7167_s8 + $0x90] sm:$0xff] }
 0x2ec   : > { %1879 = vmatpush.msra.mxu1 %v1758_v40  ;;  %1955 = vmatpush.msrb.mxu3 %v1711_v60  ;;  %v1749_v40 = vld [vmem:[%s7167_s8 + $0x210] sm:$0xff] }
 0x2ed   : > { %1917 = vmatpush.msrb.mxu2 %v1806_v4  ;;  %1842 = vmatpush.msrb.mxu0 %v1707_v3  ;;  %v1797_v4 = vld [vmem:[%s7167_s8 + $0x390] sm:$0xff]  ;;  %v1698_v3 = vld [vmem:[%s7167_s8 + $0x78] sm:$0xff] }
 0x2ee   : > { %1880 = vmatpush.msra.mxu1 %v1755_v7  ;;  %1956 = vmatpush.msrb.mxu3 %v1708_v62  ;;  %v1746_v7 = vld [vmem:[%s7167_s8 + $0x1f8] sm:$0xff] }
 0x2ef   : > { %1918 = vmatpush.msrb.mxu2 %v1803_v31  ;;  %1843 = vmatpush.msrb.mxu0 %v1704_v30  ;;  %v1794_v31 = vld [vmem:[%s7167_s8 + $0x378] sm:$0xff]  ;;  %v1791_v30 = vld [vmem:[%s7167_s8 + $0x360] sm:$0xff] }
 0x2f0   : > { %1881 = vmatpush.msra.mxu1 %v1752_v41  ;;  %1957 = vmatpush.msrb.mxu3 %v1705_v49 }
 0x2f1   : > { %1919 = vmatpush.msrb.mxu2 %v1800_v42  ;;  %1844 = vmatpush.msrb.mxu0 %v1701_v38  ;;  %v1696_v42 = vld [vmem:[%s7167_s8 + $0x68] sm:$0xff] }
 0x2f2   : > { %1882 = vmatpush.msra.mxu1 %v1749_v40  ;;  %v1788_v38 = vld [vmem:[%s7167_s8 + $0x348] sm:$0xff] }
 0x2f3   : > { %1920 = vmatpush.msrb.mxu2 %v1797_v4  ;;  %1845 = vmatpush.msrb.mxu0 %v1698_v3  ;;  %v1737_v3 = vld [vmem:[%s7167_s8 + $0x1b0] sm:$0xff] }
 0x2f4   : > { %1883 = vmatpush.msra.mxu1 %v1746_v7  ;;  %v1785_v7 = vld [vmem:[%s7167_s8 + $0x330] sm:$0xff] }
 0x2f5   : > { %1921 = vmatpush.msrb.mxu2 %v1794_v31  ;;  %v1690_v31 = vld [vmem:[%s7167_s8 + $0x38] sm:$0xff] }
 0x2f7   : > { %1922 = vmatpush.msrb.mxu2 %v1791_v30  ;;  %v1734_v30 = vld [vmem:[%s7167_s8 + $0x198] sm:$0xff] }
 0x2f9   : > { %1923 = vmatpush.msrb.mxu2 %v1788_v38  ;;  %v1731_v38 = vld [vmem:[%s7167_s8 + $0x180] sm:$0xff] }
 0x2fb   : > { %1924 = vmatpush.msrb.mxu2 %v1785_v7 }
 0x31d   : > { %v4797_v35 = vpop.xlane.xlu0 %1322 }
 0x31e   : > { %v4839_v36 = vmul.f32 0.000106292515, %v4797_v35 }
 0x320   : > { %v1336_v0 = vmul.f32 %v4839_v36, %v4839_v36 }
 0x325   : > { %v1355_v5 = vpop.xlane.xlu0 %1354 }
 0x326   : > { %v1356_v32 = vsub.f32 %v1355_v5, %v4797_v35  ;;  %v1702_v35 = vld [vmem:[%s7167_s8 + $0x98] sm:$0xff]  ;;  %v1699_v5 = vld [vmem:[%s7167_s8 + $0x80] sm:$0xff] }
 0x327   : > { %1958 = vmatpush.msrb.mxu3 %v1702_v35  ;;  %v1689_v35 = vld [vmem:[%s7167_s8 + $0x30] sm:$0xff] }
 0x328   : > { %v4906_v62 = vmul.f32 0.000106292515, %v1356_v32  ;;  %v1692_v32 = vld [vmem:[%s7167_s8 + $0x48] sm:$0xff] }
 0x329   : > { %1959 = vmatpush.msrb.mxu3 %v1699_v5 }
 0x32a   : > { %v1367_v40 = vmul.f32 %v4906_v62, %v4906_v62  ;;  %v1409_v7 = vsub.f32 %v4839_v36, %v4906_v62 }
 0x32b   : > { %1960 = vmatpush.msrb.mxu3 %v1696_v42 }
 0x339   : > { %v1333_v24 = vpop.xlane.xlu1 %1332 }
 0x33a   : > { %v1335_v28 = vmul.f32 0.000106292515, %v1333_v24 }
 0x33c   : > { %v1337_v34 = vsub.f32 %v1335_v28, %v1336_v0  ;;  %v1695_v0 = vld [vmem:[%s7167_s8 + $0x60] sm:$0xff] }
 0x33d   : > { %v1743_v28 = vld [vmem:[%s7167_s8 + $0x1e0] sm:$0xff]  ;;  %1846 = vmatpush.msrb.mxu0 %v1695_v0 }
 0x33e   : > { %v4892_v60 = vadd.f32 1e-05, %v1337_v34  ;;  %1884 = vmatpush.msra.mxu1 %v1743_v28  ;;  %v1740_v34 = vld [vmem:[%s7167_s8 + $0x1c8] sm:$0xff]  ;;  %v1686_v28 = vld [vmem:[%s7167_s8 + $0x18] sm:$0xff] }
 0x33f   : > { %1847 = vmatpush.msrb.mxu0 %v1692_v32 }
 0x340   : > { %4001 = vrsqrt.f32 %v4892_v60  ;;  %1885 = vmatpush.msra.mxu1 %v1740_v34  ;;  %v1683_v34 = vld [vmem:[%s7167_s8] sm:$0xff]  ;;  %vm1345_vm0 = vweird.f32 %v4892_v60 }
 0x341   : > { %v1363_v41 = vpop.xlane.xlu1 %1362  ;;  %1848 = vmatpush.msrb.mxu0 %v1689_v35 }
 0x342   : > { %v1364_v49 = vsub.f32 %v1363_v41, %v1333_v24  ;;  %v1693_v24 = vld [vmem:[%s7167_s8 + $0x50] sm:$0xff]  ;;  %1886 = vmatpush.msra.mxu1 %v1737_v3  ;;  %v1782_v41 = vld [vmem:[%s7167_s8 + $0x318] sm:$0xff] }
 0x343   : > { %1961 = vmatpush.msrb.mxu3 %v1693_v24  ;;  %1849 = vmatpush.msrb.mxu0 %v1686_v28  ;;  %v1779_v24 = vld [vmem:[%s7167_s8 + $0x300] sm:$0xff] }
 0x344   : > { %v1366_v4 = vmul.f32 0.000106292515, %v1364_v49  ;;  %1887 = vmatpush.msra.mxu1 %v1734_v30  ;;  %v1687_v49 = vld [vmem:[%s7167_s8 + $0x20] sm:$0xff]  ;;  %1925 = vmatpush.msrb.mxu2 %v1782_v41  ;;  %v1410_v30 = vmul.f32 %v4732_v59, %v1409_v7 }
 0x345   : > { %1962 = vmatpush.msrb.mxu3 %v1690_v31  ;;  %1850 = vmatpush.msrb.mxu0 %v1683_v34 }
 0x346   : > { %v4002_v5 = vpop.eup %4001  ;;  %v1368_v0 = vsub.f32 %v1366_v4, %v1367_v40  ;;  %1888 = vmatpush.msra.mxu1 %v1731_v38  ;;  %v1684_v40 = vld [vmem:[%s7167_s8 + $0x8] sm:$0xff]  ;;  %1926 = vmatpush.msrb.mxu2 %v1779_v24  ;;  %v1412_v38 = vmul.f32 %v4735_v63, %v1409_v7 }
 0x347   : > { %v1340_v42 = vmul.f32 %v4002_v5, %v4892_v60  ;;  %1963 = vmatpush.msrb.mxu3 %v1687_v49  ;;  %v1411_v49 = vmul.f32 %v4739_v1, %v1409_v7  ;;  %vm1346_vm14 = vweird.f32 %v4002_v5 }
 0x348   : > { %v1369_v32 = vadd.f32 1e-05, %v1368_v0  ;;  %vm1347_vm1 = vmor %vm1345_vm0, %vm1346_vm14 }
 0x349   : > { %1964 = vmatpush.msrb.mxu3 %v1684_v40  ;;  %v1341_v4 = vmul.f32 %v4002_v5, %v1340_v42  ;;  %v1413_v42 = vadd.f32 %v1410_v30, %v4906_v62  ;;  %v1414_v36 = vadd.f32 %v1411_v49, %v4906_v62 }
 0x34a   : > { %4003 = vrsqrt.f32 %v1369_v32  ;;  %vm1376_vm2 = vweird.f32 %v1369_v32 }
 0x34b   : > { %v1342_v35 = vmul.f32 0.5, %v1341_v4  ;;  %v1386_v41 = vpop.xlane.xlu2 %1385  ;;  %v4985_v46 = vperm.slane %v1414_v36, 0 }
 0x34d   : > { %v1343_v0 = vsub.f32 1.5, %v1342_v35  ;;  %v4980_v35 = vmul.f32 0.000106292515, %v1386_v41  ;;  %v1428_v36 = vsub.f32 %v4527_v25, %v4985_v46  ;;  %v1517_v25 = vld [vmem:[%s7165_s6 + $0x10] sm:$0xff] }
 0x34f   : > { %v1344_v24 = vmul.f32 %v4002_v5, %v1343_v0  ;;  %v1396_v60 = vmul.f32 %v4980_v35, %v4980_v35 }
 0x350   : > { %v4004_v3 = vpop.eup %4003 }
 0x351   : > { %v1371_v31 = vmul.f32 %v4004_v3, %v1369_v32  ;;  %vm1377_vm15 = vweird.f32 %v4004_v3 }
 0x352   : > { %vm1378_vm3 = vmor %vm1376_vm2, %vm1377_vm15 }
 0x353   : > { %v1372_v28 = vmul.f32 %v4004_v3, %v1371_v31  ;;  %v1415_v31 = vadd.f32 %v1412_v38, %v4906_v62 }
 0x355   : > { %v1373_v34 = vmul.f32 0.5, %v1372_v28  ;;  %v1348_v28 = vsel %vm1347_vm1, %v4002_v5, %v1344_v24  ;;  %v4989_v49 = vperm.slane %v1415_v31, 0 }
 0x357   : > { %v1374_v40 = vsub.f32 1.5, %v1373_v34  ;;  %v4983_v34 = vperm.slane %v1413_v42, 0 }
 0x359   : > { %v1375_v4 = vmul.f32 %v4004_v3, %v1374_v40  ;;  %v1427_v42 = vsub.f32 %v4482_v10, %v4983_v34  ;;  %v1429_v10 = vsub.f32 %v4479_v9, %v4989_v49 }
 0x35b   : > { %v1379_v7 = vsel %vm1378_vm3, %v4004_v3, %v1375_v4  ;;  %v1393_v0 = vpop.xlane.xlu2 %1392 }
 0x35c   : > { %v1416_v57 = vsub.f32 %v1348_v28, %v1379_v7  ;;  %v1395_v30 = vmul.f32 0.000106292515, %v1393_v0  ;;  %v1825_v28 = vld [vmem:[%s7167_s8 + $0x470] sm:$0xff]  ;;  %v1599_v0 = vld [vmem:[%s7166_s7] sm:$0xff] }
 0x35d   : > { %2025 = vmatpush.msrb.mxu1 %v1825_v28 }
 0x35e   : > { %v1417_v32 = vmul.f32 %v4732_v59, %v1416_v57  ;;  %v1418_v41 = vmul.f32 %v4739_v1, %v1416_v57  ;;  %v1419_v62 = vmul.f32 %v4735_v63, %v1416_v57  ;;  %v1397_v5 = vsub.f32 %v1395_v30, %v1396_v60  ;;  %v1515_v57 = vld [vmem:[%s7165_s6] sm:$0xff]  ;;  %v1516_v63 = vld [vmem:[%s7165_s6 + $0x8] sm:$0xff]  ;;  %v1777_v1 = vld [vmem:[%s7167_s8 + $0x2f0] sm:$0xff] }
 0x35f   : > { %1987 = vmatpush.msra.mxu0 %v1777_v1 }
 0x360   : > { %v1420_v3 = vadd.f32 %v1417_v32, %v1379_v7  ;;  %v1421_v38 = vadd.f32 %v1418_v41, %v1379_v7  ;;  %v1422_v24 = vadd.f32 %v1419_v62, %v1379_v7  ;;  %v4994_v40 = vadd.f32 1e-05, %v1397_v5  ;;  %v1730_v7 = vld [vmem:[%s7167_s8 + $0x178] sm:$0xff]  ;;  %v1600_v41 = vld [vmem:[%s7166_s7 + $0x8] sm:$0xff]  ;;  %v1601_v62 = vld [vmem:[%s7166_s7 + $0x10] sm:$0xff] }
 0x361   : > { %v1778_v32 = vld [vmem:[%s7167_s8 + $0x2f8] sm:$0xff]  ;;  %v1433_v5 = vsub.f32 %v4487_v12, %v4983_v34  ;;  %2063 = vmatpush.msra.mxu2 %v1730_v7  ;;  %v1435_v12 = vsub.f32 %v4484_v11, %v4989_v49 }
 0x362   : > { %v5000_v4 = vperm.slane %v1420_v3, 0  ;;  %v5002_v31 = vperm.slane %v1421_v38, 0  ;;  %v5004_v59 = vperm.slane %v1422_v24, 0  ;;  %4005 = vrsqrt.f32 %v4994_v40  ;;  %v1774_v3 = vld [vmem:[%s7167_s8 + $0x2d8] sm:$0xff]  ;;  %2101 = vmatpush.msra.mxu3 %v1778_v32  ;;  %v1771_v32 = vld [vmem:[%s7167_s8 + $0x2c0] sm:$0xff] }
 0x363   : > { %1988 = vmatpush.msra.mxu0 %v1774_v3  ;;  %v1522_v11 = vld [vmem:[%s7165_s6 + $0x38] sm:$0xff]  ;;  %vm1405_vm5 = vweird.f32 %v4994_v40 }
 0x364   : > { %v1473_v9 = vmul.f32 %v5000_v4, %v1427_v42  ;;  %v1474_v60 = vmul.f32 %v5002_v31, %v1428_v36  ;;  %v1475_v30 = vmul.f32 %v5004_v59, %v1429_v10  ;;  %v1434_v36 = vsub.f32 %v4549_v37, %v4985_v46  ;;  %v1822_v10 = vld [vmem:[%s7167_s8 + $0x458] sm:$0xff]  ;;  %v1521_v37 = vld [vmem:[%s7165_s6 + $0x30] sm:$0xff] }
 0x365   : > { %v1479_v1 = vmul.f32 %v5000_v4, %v1433_v5  ;;  %v1481_v7 = vmul.f32 %v5004_v59, %v1435_v12  ;;  %2026 = vmatpush.msrb.mxu1 %v1822_v10  ;;  %v1772_v5 = vld [vmem:[%s7167_s8 + $0x2c8] sm:$0xff]  ;;  %v1606_v12 = vld [vmem:[%s7166_s7 + $0x38] sm:$0xff]  ;;  %1989 = vmatpush.msra.mxu0 %v1771_v32  ;;  %v1441_v32 = vsub.f32 %v4489_v13, %v4989_v49 }
 0x366   : > { %v1557_v38 = vmul.f32 %v1515_v57, %v1473_v9  ;;  %v1558_v24 = vmul.f32 %v1516_v63, %v1474_v60  ;;  %v1559_v42 = vmul.f32 %v1517_v25, %v1475_v30  ;;  %v1480_v63 = vmul.f32 %v5002_v31, %v1434_v36  ;;  %v1727_v9 = vld [vmem:[%s7167_s8 + $0x160] sm:$0xff]  ;;  %v1768_v36 = vld [vmem:[%s7167_s8 + $0x2a8] sm:$0xff] }
 0x367   : > { %v1523_v30 = vld [vmem:[%s7165_s6 + $0x40] sm:$0xff]  ;;  %2064 = vmatpush.msra.mxu2 %v1727_v9  ;;  %v1816_v10 = vld [vmem:[%s7167_s8 + $0x428] sm:$0xff]  ;;  %1990 = vmatpush.msra.mxu0 %v1768_v36  ;;  %v1487_v36 = vmul.f32 %v5004_v59, %v1441_v32  ;;  %v1445_v32 = vsub.f32 %v4497_v16, %v4983_v34 }
 0x368   : > { %v5055_v28 = vadd.f32 %v1599_v0, %v1557_v38  ;;  %v5057_v56 = vadd.f32 %v1600_v41, %v1558_v24  ;;  %v5059_v57 = vadd.f32 %v1601_v62, %v1559_v42  ;;  %v5065_v25 = vpop.eup %4005  ;;  %v1775_v0 = vld [vmem:[%s7167_s8 + $0x2e0] sm:$0xff]  ;;  %v1724_v62 = vld [vmem:[%s7167_s8 + $0x148] sm:$0xff]  ;;  %v1563_v38 = vmul.f32 %v1521_v37, %v1479_v1  ;;  %v1605_v24 = vld [vmem:[%s7166_s7 + $0x30] sm:$0xff] }
 0x369   : > { %v1400_v60 = vmul.f32 %v5065_v25, %v4994_v40  ;;  %v1819_v41 = vld [vmem:[%s7167_s8 + $0x440] sm:$0xff]  ;;  %v1564_v42 = vmul.f32 %v1522_v11, %v1480_v63  ;;  %2102 = vmatpush.msra.mxu3 %v1775_v0  ;;  %v1565_v1 = vmul.f32 %v1523_v30, %v1481_v7  ;;  %v1439_v37 = vsub.f32 %v4492_v14, %v4983_v34  ;;  %v1721_v63 = vld [vmem:[%s7167_s8 + $0x130] sm:$0xff]  ;;  %v1528_v13 = vld [vmem:[%s7165_s6 + $0x68] sm:$0xff] }
 0x36a   : > { %1851 = vmatmul.f32.vlgmr.msrb.gmra.mxu0 %v5055_v28  ;;  %1889 = vmatmul.f32.vlgmr.msra.gmra.mxu1 %v5057_v56  ;;  %v1769_v11 = vld [vmem:[%s7167_s8 + $0x2b0] sm:$0xff]  ;;  %v1607_v9 = vld [vmem:[%s7166_s7 + $0x40] sm:$0xff]  ;;  %v1440_v7 = vsub.f32 %v4568_v44, %v4985_v46  ;;  %v1756_v16 = vld [vmem:[%s7167_s8 + $0x248] sm:$0xff]  ;;  %vm1406_vm4 = vweird.f32 %v5065_v25  ;;  %v5233_v40 = vperm.slane %v4980_v35, 0 }
 0x36b   : > { %1927 = vmatmul.f32.vlgmr.msrb.gmra.mxu2 %v5059_v57  ;;  %1965 = vmatmul.f32.vlgmr.msrb.gmra.mxu3 %v5055_v28  ;;  %v1401_v3 = vmul.f32 %v5065_v25, %v1400_v60  ;;  %v1765_v14 = vld [vmem:[%s7167_s8 + $0x290] sm:$0xff]  ;;  %v1485_v30 = vmul.f32 %v5000_v4, %v1439_v37  ;;  %v5135_v44 = vadd.f32 %v1606_v12, %v1564_v42  ;;  %v1810_v12 = vld [vmem:[%s7167_s8 + $0x3f8] sm:$0xff]  ;;  %v1715_v37 = vld [vmem:[%s7167_s8 + $0x100] sm:$0xff] }
 0x36c   : > { %2027 = vmatpush.msrb.mxu1 %v1819_v41  ;;  %2065 = vmatpush.msra.mxu2 %v1724_v62  ;;  %v1813_v0 = vld [vmem:[%s7167_s8 + $0x410] sm:$0xff]  ;;  %v5133_v41 = vadd.f32 %v1605_v24, %v1563_v38  ;;  %v1527_v62 = vld [vmem:[%s7165_s6 + $0x60] sm:$0xff]  ;;  %v1718_v38 = vld [vmem:[%s7167_s8 + $0x118] sm:$0xff] }
 0x36d   : > { %2103 = vmatpush.msra.mxu3 %v1772_v5  ;;  %v1402_v60 = vmul.f32 0.5, %v1401_v3  ;;  %v1486_v5 = vmul.f32 %v5002_v31, %v1440_v7  ;;  %v5141_v3 = vadd.f32 %v1607_v9, %v1565_v1  ;;  %1991 = vmatpush.msra.mxu0 %v1765_v14  ;;  %v1766_v24 = vld [vmem:[%s7167_s8 + $0x298] sm:$0xff]  ;;  %v1529_v42 = vld [vmem:[%s7165_s6 + $0x70] sm:$0xff]  ;;  %v1611_v9 = vld [vmem:[%s7166_s7 + $0x60] sm:$0xff] }
 0x36e   : > { %2028 = vmatpush.msrb.mxu1 %v1816_v10  ;;  %2066 = vmatpush.msra.mxu2 %v1721_v63  ;;  %v1762_v10 = vld [vmem:[%s7167_s8 + $0x278] sm:$0xff]  ;;  %v1763_v63 = vld [vmem:[%s7167_s8 + $0x280] sm:$0xff]  ;;  %vm5237_vm6 = vmor %vm1405_vm5, %vm1406_vm4 }
 0x36f   : > { %2104 = vmatpush.msra.mxu3 %v1769_v11  ;;  %v1403_v1 = vsub.f32 1.5, %v1402_v60  ;;  %v1569_v11 = vmul.f32 %v1527_v62, %v1485_v30  ;;  %v1570_v7 = vmul.f32 %v1528_v13, %v1486_v5  ;;  %v1759_v14 = vld [vmem:[%s7167_s8 + $0x260] sm:$0xff]  ;;  %v1612_v60 = vld [vmem:[%s7166_s7 + $0x68] sm:$0xff]  ;;  %v1571_v30 = vmul.f32 %v1529_v42, %v1487_v36  ;;  %1992 = vmatpush.msra.mxu0 %v1762_v10  ;;  %v1613_v13 = vld [vmem:[%s7166_s7 + $0x70] sm:$0xff] }
 0x370   : > { %2029 = vmatpush.msrb.mxu1 %v1813_v0  ;;  %2067 = vmatpush.msra.mxu2 %v1718_v38  ;;  %v1807_v0 = vld [vmem:[%s7167_s8 + $0x3e0] sm:$0xff]  ;;  %v1712_v62 = vld [vmem:[%s7167_s8 + $0xe8] sm:$0xff]  ;;  %v1446_v36 = vsub.f32 %v4576_v47, %v4985_v46  ;;  %v1491_v42 = vmul.f32 %v5000_v4, %v1445_v32  ;;  %v1447_v10 = vsub.f32 %v4494_v15, %v4989_v49 }
 0x371   : > { %2105 = vmatpush.msra.mxu3 %v1766_v24  ;;  %v1760_v5 = vld [vmem:[%s7167_s8 + $0x268] sm:$0xff]  ;;  %v1404_v24 = vmul.f32 %v5065_v25, %v1403_v1  ;;  %1993 = vmatpush.msra.mxu0 %v1759_v14  ;;  %v5208_v47 = vadd.f32 %v1611_v9, %v1569_v11  ;;  %v1534_v1 = vld [vmem:[%s7165_s6 + $0x98] sm:$0xff]  ;;  %v5220_v15 = vadd.f32 %v1613_v13, %v1571_v30  ;;  %v1535_v9 = vld [vmem:[%s7165_s6 + $0xa0] sm:$0xff] }
 0x372   : > { %1854 = vmatmul.f32.gmra.mxu0 %v5133_v41  ;;  %1892 = vmatmul.f32.gmra.mxu1 %v5135_v44  ;;  %v1804_v38 = vld [vmem:[%s7167_s8 + $0x3c8] sm:$0xff]  ;;  %v1493_v11 = vmul.f32 %v5004_v59, %v1447_v10  ;;  %v1757_v14 = vld [vmem:[%s7167_s8 + $0x250] sm:$0xff]  ;;  %v1754_v13 = vld [vmem:[%s7167_s8 + $0x238] sm:$0xff] }
 0x373   : > { %1930 = vmatmul.f32.gmra.mxu2 %v5141_v3  ;;  %1968 = vmatmul.f32.gmra.mxu3 %v5133_v41  ;;  %v1801_v30 = vld [vmem:[%s7167_s8 + $0x3b0] sm:$0xff]  ;;  %v1408_v35 = vsel %vm5237_vm6, %v5065_v25, %v1404_v24  ;;  %v1798_v24 = vld [vmem:[%s7167_s8 + $0x398] sm:$0xff] }
 0x374   : > { %2030 = vmatpush.msrb.mxu1 %v1810_v12  ;;  %2068 = vmatpush.msra.mxu2 %v1715_v37  ;;  %v5210_v12 = vadd.f32 %v1612_v60, %v1570_v7  ;;  %v1533_v37 = vld [vmem:[%s7165_s6 + $0x90] sm:$0xff]  ;;  %v1577_v10 = vmul.f32 %v1535_v9, %v1493_v11  ;;  %v1619_v11 = vld [vmem:[%s7166_s7 + $0xa0] sm:$0xff] }
 0x375   : > { %2106 = vmatpush.msra.mxu3 %v1763_v63  ;;  %v1492_v63 = vmul.f32 %v5002_v31, %v1446_v36  ;;  %1994 = vmatpush.msra.mxu0 %v1756_v16  ;;  %v1709_v7 = vld [vmem:[%s7167_s8 + $0xd0] sm:$0xff]  ;;  %v1575_v32 = vmul.f32 %v1533_v37, %v1491_v42  ;;  %v1452_v16 = vsub.f32 %v4582_v50, %v4985_v46  ;;  %v1618_v42 = vld [vmem:[%s7166_s7 + $0x98] sm:$0xff]  ;;  %v1703_v37 = vld [vmem:[%s7167_s8 + $0xa0] sm:$0xff] }
 0x376   : > { %2031 = vmatpush.msrb.mxu1 %v1807_v0  ;;  %2069 = vmatpush.msra.mxu2 %v1712_v62  ;;  %v1753_v60 = vld [vmem:[%s7167_s8 + $0x230] sm:$0xff]  ;;  %v1451_v62 = vsub.f32 %v4502_v18, %v4983_v34  ;;  %v1750_v18 = vld [vmem:[%s7167_s8 + $0x218] sm:$0xff]  ;;  %v1457_v50 = vsub.f32 %v4506_v20, %v4983_v34  ;;  %v1795_v0 = vld [vmem:[%s7167_s8 + $0x380] sm:$0xff] }
 0x377   : > { %2107 = vmatpush.msra.mxu3 %v1760_v5  ;;  %v1706_v5 = vld [vmem:[%s7167_s8 + $0xb8] sm:$0xff]  ;;  %v1617_v25 = vld [vmem:[%s7166_s7 + $0x90] sm:$0xff]  ;;  %v1576_v36 = vmul.f32 %v1534_v1, %v1492_v63  ;;  %1995 = vmatpush.msra.mxu0 %v1753_v60  ;;  %v1751_v63 = vld [vmem:[%s7167_s8 + $0x220] sm:$0xff]  ;;  %v5288_v1 = vperm.slane %v1408_v35, 0  ;;  %v1454_v60 = vsub.f32 %v4590_v54, %v5233_v40 }
 0x378   : > { %2032 = vmatpush.msrb.mxu1 %v1804_v38  ;;  %v1453_v38 = vsub.f32 %v4499_v17, %v4989_v49  ;;  %2070 = vmatpush.msra.mxu2 %v1709_v7  ;;  %v1458_v17 = vsub.f32 %v4586_v52, %v4985_v46  ;;  %v1497_v9 = vmul.f32 %v5000_v4, %v1451_v62  ;;  %v1539_v35 = vld [vmem:[%s7165_s6 + $0xc0] sm:$0xff]  ;;  %v1540_v54 = vld [vmem:[%s7165_s6 + $0xc8] sm:$0xff]  ;;  %v1545_v20 = vld [vmem:[%s7165_s6 + $0xf0] sm:$0xff] }
 0x379   : > { %2108 = vmatpush.msra.mxu3 %v1757_v14  ;;  %v1747_v14 = vld [vmem:[%s7167_s8 + $0x200] sm:$0xff]  ;;  %1996 = vmatpush.msra.mxu0 %v1750_v18  ;;  %v1460_v62 = vsub.f32 %v4611_v61, %v5233_v40  ;;  %v1498_v7 = vmul.f32 %v5002_v31, %v1452_v16  ;;  %v1541_v61 = vld [vmem:[%s7165_s6 + $0xd0] sm:$0xff]  ;;  %v1431_v16 = vsub.f32 %v4515_v23, %v5233_v40 }
 0x37a   : > { %1857 = vmatmul.f32.gmra.mxu0 %v5208_v47  ;;  %1895 = vmatmul.f32.gmra.mxu1 %v5210_v12  ;;  %v1581_v18 = vmul.f32 %v1539_v35, %v1497_v9  ;;  %v1443_v23 = vsub.f32 %v4553_v39, %v5233_v40  ;;  %v1741_v35 = vld [vmem:[%s7167_s8 + $0x1d0] sm:$0xff] }
 0x37b   : > { %1933 = vmatmul.f32.gmra.mxu2 %v5220_v15  ;;  %1971 = vmatmul.f32.gmra.mxu3 %v5208_v47  ;;  %v5366_v9 = vmul.f32 %v5288_v1, %v1431_v16  ;;  %v1738_v16 = vld [vmem:[%s7167_s8 + $0x1b8] sm:$0xff] }
 0x37c   : > { %2033 = vmatpush.msrb.mxu1 %v1801_v30  ;;  %2071 = vmatpush.msra.mxu2 %v1706_v5  ;;  %v5304_v30 = vadd.f32 %v1617_v25, %v1575_v32  ;;  %v1466_v5 = vsub.f32 %v4640_v6, %v5233_v40  ;;  %v1499_v32 = vmul.f32 %v5004_v59, %v1453_v38  ;;  %v1700_v6 = vld [vmem:[%s7167_s8 + $0x88] sm:$0xff] }
 0x37d   : > { %2109 = vmatpush.msra.mxu3 %v1754_v13  ;;  %v5313_v13 = vadd.f32 %v1618_v42, %v1576_v36  ;;  %v5320_v25 = vadd.f32 %v1619_v11, %v1577_v10  ;;  %1997 = vmatpush.msra.mxu0 %v1747_v14  ;;  %v1748_v36 = vld [vmem:[%s7167_s8 + $0x208] sm:$0xff]  ;;  %v1437_v38 = vsub.f32 %v4531_v27, %v5233_v40  ;;  %v1623_v27 = vld [vmem:[%s7166_s7 + $0xc0] sm:$0xff] }
 0x37e   : > { %2034 = vmatpush.msrb.mxu1 %v1798_v24  ;;  %2072 = vmatpush.msra.mxu2 %v1703_v37  ;;  %v1744_v24 = vld [vmem:[%s7167_s8 + $0x1e8] sm:$0xff]  ;;  %v5344_v10 = vmul.f32 %v5288_v1, %v1454_v60  ;;  %v1697_v37 = vld [vmem:[%s7167_s8 + $0x70] sm:$0xff]  ;;  %v5360_v11 = vmul.f32 %v5288_v1, %v1460_v62  ;;  %v5363_v39 = vmul.f32 %v5288_v1, %v1466_v5 }
 0x37f   : > { %2110 = vmatpush.msra.mxu3 %v1751_v63  ;;  %v1792_v42 = vld [vmem:[%s7167_s8 + $0x368] sm:$0xff]  ;;  %v1745_v63 = vld [vmem:[%s7167_s8 + $0x1f0] sm:$0xff]  ;;  %v1582_v14 = vmul.f32 %v1540_v54, %v1498_v7  ;;  %v1583_v60 = vmul.f32 %v1541_v61, %v1499_v32  ;;  %v1449_v5 = vsub.f32 %v4570_v45, %v5233_v40  ;;  %1998 = vmatpush.msra.mxu0 %v1744_v24  ;;  %v1694_v54 = vld [vmem:[%s7167_s8 + $0x58] sm:$0xff] }
 0x380   : > { %2035 = vmatpush.msrb.mxu1 %v1795_v0  ;;  %v1624_v0 = vld [vmem:[%s7166_s7 + $0xc8] sm:$0xff]  ;;  %2073 = vmatpush.msra.mxu2 %v1700_v6  ;;  %v1789_v62 = vld [vmem:[%s7167_s8 + $0x350] sm:$0xff]  ;;  %v1742_v32 = vld [vmem:[%s7167_s8 + $0x1d8] sm:$0xff]  ;;  %v1455_v61 = vsub.f32 %v4578_v48, %v5233_v40  ;;  %v1461_v45 = vsub.f32 %v4584_v51, %v5233_v40  ;;  %v1467_v6 = vsub.f32 %v4588_v53, %v5233_v40 }
 0x381   : > { %2111 = vmatpush.msra.mxu3 %v1748_v36  ;;  %v1625_v7 = vld [vmem:[%s7166_s7 + $0xd0] sm:$0xff]  ;;  %v5394_v36 = vadd.f32 %v1623_v27, %v1581_v18  ;;  %v1786_v24 = vld [vmem:[%s7167_s8 + $0x338] sm:$0xff]  ;;  %v5403_v48 = vmul.f32 %v5288_v1, %v1437_v38  ;;  %v5406_v51 = vmul.f32 %v5288_v1, %v1443_v23  ;;  %v1503_v53 = vmul.f32 %v5000_v4, %v1457_v50  ;;  %v1691_v50 = vld [vmem:[%s7167_s8 + $0x40] sm:$0xff] }
 0x382   : > { %1860 = vmatmul.f32.gmra.mxu0 %v5304_v30  ;;  %1898 = vmatmul.f32.gmra.mxu1 %v5313_v13  ;;  %v1504_v18 = vmul.f32 %v5002_v31, %v1458_v17  ;;  %v5420_v38 = vadd.f32 %v1624_v0, %v1582_v14  ;;  %v5422_v23 = vadd.f32 %v1625_v7, %v1583_v60  ;;  %v1739_v17 = vld [vmem:[%s7167_s8 + $0x1c0] sm:$0xff] }
 0x383   : > { %1936 = vmatmul.f32.gmra.mxu2 %v5320_v25  ;;  %1974 = vmatmul.f32.gmra.mxu3 %v5304_v30  ;;  %v5428_v52 = vmul.f32 %v5288_v1, %v1449_v5  ;;  %v5446_v14 = vmul.f32 %v5288_v1, %v1467_v6  ;;  %v1547_v0 = vld [vmem:[%s7165_s6 + $0x100] sm:$0xff]  ;;  %v1736_v5 = vld [vmem:[%s7167_s8 + $0x1a8] sm:$0xff]  ;;  %v1587_v7 = vmul.f32 %v1545_v20, %v1503_v53  ;;  %v1630_v6 = vld [vmem:[%s7166_s7 + $0xf8] sm:$0xff] }
 0x384   : > { %2036 = vmatpush.msrb.mxu1 %v1792_v42  ;;  %2074 = vmatpush.msra.mxu2 %v1697_v37  ;;  %v7204_v42 = vsub.f32 %v4504_v19, %v4989_v49  ;;  %v1546_v19 = vld [vmem:[%s7165_s6 + $0xf8] sm:$0xff]  ;;  %v5440_v37 = vmul.f32 %v5288_v1, %v1455_v61  ;;  %v1735_v60 = vld [vmem:[%s7167_s8 + $0x1a0] sm:$0xff]  ;;  %v1732_v61 = vld [vmem:[%s7167_s8 + $0x188] sm:$0xff] }
 0x385   : > { %2112 = vmatpush.msra.mxu3 %v1745_v63  ;;  %1999 = vmatpush.msra.mxu0 %v1741_v35  ;;  %v5443_v63 = vmul.f32 %v5288_v1, %v1461_v45  ;;  %v1783_v35 = vld [vmem:[%s7167_s8 + $0x320] sm:$0xff]  ;;  %v1780_v45 = vld [vmem:[%s7167_s8 + $0x308] sm:$0xff]  ;;  %v1685_v53 = vld [vmem:[%s7167_s8 + $0x10] sm:$0xff] }
 0x386   : > { %v1505_v27 = vmul.f32 %v5004_v59, %v7204_v42  ;;  %2037 = vmatpush.msrb.mxu1 %v1789_v62  ;;  %2075 = vmatpush.msra.mxu2 %v1694_v54  ;;  %v1688_v62 = vld [vmem:[%s7167_s8 + $0x28] sm:$0xff]  ;;  %v1629_v54 = vld [vmem:[%s7166_s7 + $0xf0] sm:$0xff]  ;;  %v1631_v42 = vld [vmem:[%s7166_s7 + $0x100] sm:$0xff] }
 0x387   : > { %2113 = vmatpush.msra.mxu3 %v1742_v32  ;;  %2000 = vmatpush.msra.mxu0 %v1738_v16  ;;  %v1588_v32 = vmul.f32 %v1546_v19, %v1504_v18  ;;  %v1733_v18 = vld [vmem:[%s7167_s8 + $0x190] sm:$0xff]  ;;  %v5495_v20 = vadd.f32 %v1629_v54, %v1587_v7  ;;  %v1826_v54 = vld [vmem:[%s7167_s8 + $0x478] sm:$0xff] }
 0x388   : > { %2038 = vmatpush.msrb.mxu1 %v1786_v24  ;;  %2076 = vmatpush.msra.mxu2 %v1691_v50  ;;  %v1589_v16 = vmul.f32 %v1547_v0, %v1505_v27  ;;  %v1463_v24 = vsub.f32 %v4513_v22, %v4983_v34  ;;  %v1464_v27 = vsub.f32 %v4602_v58, %v4985_v46  ;;  %v1551_v46 = vld [vmem:[%s7165_s6 + $0x120] sm:$0xff] }
 0x389   : > { %2114 = vmatpush.msra.mxu3 %v1739_v17  ;;  %2001 = vmatpush.msra.mxu0 %v1735_v60  ;;  %v1465_v34 = vsub.f32 %v4508_v21, %v4989_v49  ;;  %v5497_v19 = vadd.f32 %v1630_v6, %v1588_v32  ;;  %v1552_v21 = vld [vmem:[%s7165_s6 + $0x128] sm:$0xff]  ;;  %v1553_v49 = vld [vmem:[%s7165_s6 + $0x130] sm:$0xff]  ;;  %v1635_v0 = vld [vmem:[%s7166_s7 + $0x120] sm:$0xff] }
 0x38a   : > { %1863 = vmatmul.f32.gmra.mxu0 %v5394_v36  ;;  %1901 = vmatmul.f32.gmra.mxu1 %v5420_v38  ;;  %v1509_v22 = vmul.f32 %v5000_v4, %v1463_v24  ;;  %v1510_v50 = vmul.f32 %v5002_v31, %v1464_v27  ;;  %v5500_v17 = vadd.f32 %v1631_v42, %v1589_v16  ;;  %v1823_v32 = vld [vmem:[%s7167_s8 + $0x460] sm:$0xff]  ;;  %v1814_v6 = vld [vmem:[%s7167_s8 + $0x418] sm:$0xff]  ;;  %v1808_v24 = vld [vmem:[%s7167_s8 + $0x3e8] sm:$0xff] }
 0x38b   : > { %1939 = vmatmul.f32.gmra.mxu2 %v5422_v23  ;;  %1977 = vmatmul.f32.gmra.mxu3 %v5394_v36  ;;  %v1511_v58 = vmul.f32 %v5004_v59, %v1465_v34  ;;  %v1636_v59 = vld [vmem:[%s7166_s7 + $0x128] sm:$0xff]  ;;  %v1811_v16 = vld [vmem:[%s7167_s8 + $0x400] sm:$0xff]  ;;  %v2345_v42 = vld [vmem:[%s7169_s10 + $0x150] sm:$0xff] }
 0x38c   : > { %2039 = vmatpush.msrb.mxu1 %v1783_v35  ;;  %2077 = vmatpush.msra.mxu2 %v1688_v62  ;;  %v1593_v4 = vmul.f32 %v1551_v46, %v1509_v22  ;;  %v1594_v31 = vmul.f32 %v1552_v21, %v1510_v50  ;;  %v1637_v35 = vld [vmem:[%s7166_s7 + $0x130] sm:$0xff]  ;;  %v1784_v27 = vld [vmem:[%s7167_s8 + $0x328] sm:$0xff]  ;;  %v2339_v22 = vld [vmem:[%s7169_s10 + $0x120] sm:$0xff] }
 0x38d   : > { %2115 = vmatpush.msra.mxu3 %v1736_v5  ;;  %2002 = vmatpush.msra.mxu0 %v1732_v61  ;;  %v1595_v60 = vmul.f32 %v1553_v49, %v1511_v58  ;;  %v1820_v61 = vld [vmem:[%s7167_s8 + $0x448] sm:$0xff]  ;;  %v2349_v50 = vld [vmem:[%s7169_s10 + $0x170] sm:$0xff]  ;;  %v2318_v21 = vld [vmem:[%s7169_s10 + $0x78] sm:$0xff] }
 0x38e   : > { %2040 = vmatpush.msrb.mxu1 %v1780_v45  ;;  %2078 = vmatpush.msra.mxu2 %v1685_v53  ;;  %v5525_v62 = vadd.f32 %v1635_v0, %v1593_v4  ;;  %v5527_v5 = vadd.f32 %v1636_v59, %v1594_v31  ;;  %v1817_v45 = vld [vmem:[%s7167_s8 + $0x430] sm:$0xff]  ;;  %v1799_v53 = vld [vmem:[%s7167_s8 + $0x3a0] sm:$0xff]  ;;  %v2336_v34 = vld [vmem:[%s7169_s10 + $0x108] sm:$0xff] }
 0x38f   : > { %2116 = vmatpush.msra.mxu3 %v1733_v18  ;;  %v5529_v7 = vadd.f32 %v1637_v35, %v1595_v60  ;;  %2139 = vmatpush.msrb.mxu0 %v1826_v54  ;;  %v1790_v18 = vld [vmem:[%s7167_s8 + $0x358] sm:$0xff]  ;;  %v2321_v46 = vld [vmem:[%s7169_s10 + $0x90] sm:$0xff]  ;;  %v2343_v58 = vld [vmem:[%s7169_s10 + $0x140] sm:$0xff] }
 0x390   : > { %v5658_v49 = vld [vmem:[%s7168_s9] sm:$0x7]  ;;  %v2340_v31 = vld [vmem:[%s7169_s10 + $0x128] sm:$0xff]  ;;  %v2309_v60 = vld [vmem:[%s7169_s10 + $0x30] sm:$0xff] }
 0x391   : > { %2140 = vmatpush.msrb.mxu0 %v1823_v32  ;;  %v2315_v4 = vld [vmem:[%s7169_s10 + $0x60] sm:$0xff]  ;;  %v2312_v0 = vld [vmem:[%s7169_s10 + $0x48] sm:$0xff]  ;;  %v5673_v59 = vperm.slane %v5658_v49, 0  ;;  %v2334_v35 = vld [vmem:[%s7169_s10 + $0xf8] sm:$0xff] }
 0x392   : > { %1866 = vmatmul.f32.gmra.mxu0 %v5495_v20  ;;  %1904 = vmatmul.f32.gmra.mxu1 %v5497_v19  ;;  %v2306_v54 = vld [vmem:[%s7169_s10 + $0x18] sm:$0xff]  ;;  %v2331_v32 = vld [vmem:[%s7169_s10 + $0xe0] sm:$0xff] }
 0x393   : > { %1942 = vmatmul.f32.gmra.mxu2 %v5500_v17  ;;  %1980 = vmatmul.f32.gmra.mxu3 %v5495_v20 }
 0x394   : > { %2141 = vmatpush.msrb.mxu0 %v1820_v61 }
 0x396   : > { %2142 = vmatpush.msrb.mxu0 %v1817_v45  ;;  %v2303_v45 = vld [vmem:[%s7169_s10] sm:$0xff] }
 0x398   : > { %2143 = vmatpush.msrb.mxu0 %v1814_v6  ;;  %v2328_v6 = vld [vmem:[%s7169_s10 + $0xc8] sm:$0xff] }
 0x39a   : > { %1869 = vmatmul.f32.gmra.mxu0 %v5525_v62  ;;  %1907 = vmatmul.f32.gmra.mxu1 %v5527_v5 }
 0x39b   : > { %1945 = vmatmul.f32.gmra.mxu2 %v5529_v7  ;;  %1983 = vmatmul.f32.gmra.mxu3 %v5525_v62 }
 0x39c   : > { %2144 = vmatpush.msrb.mxu0 %v1811_v16  ;;  %v2325_v16 = vld [vmem:[%s7169_s10 + $0xb0] sm:$0xff] }
 0x39e   : > { %2145 = vmatpush.msrb.mxu0 %v1808_v24 }
 0x3a2   : > { %2003 = vmatmul.f32.vlgmr.msra.gmra.mxu0 %v5057_v56  ;;  %2041 = vmatmul.f32.vlgmr.msrb.gmra.mxu1 %v5059_v57 }
 0x3a3   : > { %2079 = vmatmul.f32.vlgmr.msra.gmra.mxu2 %v5055_v28  ;;  %2117 = vmatmul.f32.vlgmr.msra.gmra.mxu3 %v5057_v56  ;;  %v1805_v56 = vld [vmem:[%s7167_s8 + $0x3d0] sm:$0xff]  ;;  %v1802_v28 = vld [vmem:[%s7167_s8 + $0x3b8] sm:$0xff] }
 0x3a4   : > { %2146 = vmatpush.msrb.mxu0 %v1805_v56 }
 0x3a6   : > { %2147 = vmatpush.msrb.mxu0 %v1802_v28 }
 0x3a8   : > { %2148 = vmatpush.msrb.mxu0 %v1799_v53 }
 0x3aa   : > { %2006 = vmatmul.f32.gmra.mxu0 %v5135_v44  ;;  %2044 = vmatmul.f32.gmra.mxu1 %v5141_v3 }
 0x3ab   : > { %2082 = vmatmul.f32.gmra.mxu2 %v5133_v41  ;;  %2120 = vmatmul.f32.gmra.mxu3 %v5135_v44  ;;  %v1796_v41 = vld [vmem:[%s7167_s8 + $0x388] sm:$0xff]  ;;  %v1793_v44 = vld [vmem:[%s7167_s8 + $0x370] sm:$0xff] }
 0x3ac   : > { %2149 = vmatpush.msrb.mxu0 %v1796_v41 }
 0x3ae   : > { %2150 = vmatpush.msrb.mxu0 %v1793_v44  ;;  %v2319_v44 = vld [vmem:[%s7169_s10 + $0x80] sm:$0xff] }
 0x3b0   : > { %2151 = vmatpush.msrb.mxu0 %v1790_v18 }
 0x3b2   : > { %2009 = vmatmul.f32.gmra.mxu0 %v5210_v12  ;;  %2047 = vmatmul.f32.gmra.mxu1 %v5220_v15 }
 0x3b3   : > { %2085 = vmatmul.f32.gmra.mxu2 %v5208_v47  ;;  %2123 = vmatmul.f32.gmra.mxu3 %v5210_v12  ;;  %v2348_v47 = vld [vmem:[%s7169_s10 + $0x168] sm:$0xff]  ;;  %v1787_v12 = vld [vmem:[%s7167_s8 + $0x340] sm:$0xff] }
 0x3b4   : > { %2455 = vmatpush.msra.mxu1 %v2348_v47  ;;  %2152 = vmatpush.msrb.mxu0 %v1787_v12  ;;  %v2316_v12 = vld [vmem:[%s7169_s10 + $0x68] sm:$0xff] }
 0x3b6   : > { %2456 = vmatpush.msra.mxu1 %v2345_v42  ;;  %2153 = vmatpush.msrb.mxu0 %v1784_v27  ;;  %v2313_v27 = vld [vmem:[%s7169_s10 + $0x50] sm:$0xff] }
 0x3ba   : > { %2012 = vmatmul.f32.gmra.mxu0 %v5313_v13  ;;  %2050 = vmatmul.f32.gmra.mxu1 %v5320_v25 }
 0x3bb   : > { %2088 = vmatmul.f32.gmra.mxu2 %v5304_v30  ;;  %2126 = vmatmul.f32.gmra.mxu3 %v5313_v13  ;;  %v1781_v30 = vld [vmem:[%s7167_s8 + $0x310] sm:$0xff]  ;;  %v2342_v13 = vld [vmem:[%s7169_s10 + $0x138] sm:$0xff] }
 0x3bc   : > { %2154 = vmatpush.msrb.mxu0 %v1781_v30  ;;  %2457 = vmatpush.msra.mxu1 %v2342_v13 }
 0x3be   : > { %2458 = vmatpush.msra.mxu1 %v2339_v22  ;;  %2569 = vmatpush.msra.mxu0 %v2349_v50  ;;  %v2310_v22 = vld [vmem:[%s7169_s10 + $0x38] sm:$0xff] }
 0x3c0   : > { %2459 = vmatpush.msra.mxu1 %v2336_v34 }
 0x3c2   : > { %2015 = vmatmul.f32.gmra.mxu0 %v5420_v38  ;;  %2053 = vmatmul.f32.gmra.mxu1 %v5422_v23 }
 0x3c3   : > { %2091 = vmatmul.f32.gmra.mxu2 %v5394_v36  ;;  %2129 = vmatmul.f32.gmra.mxu3 %v5420_v38  ;;  %v2333_v36 = vld [vmem:[%s7169_s10 + $0xf0] sm:$0xff]  ;;  %v2330_v38 = vld [vmem:[%s7169_s10 + $0xd8] sm:$0xff] }
 0x3c4   : > { %2460 = vmatpush.msra.mxu1 %v2333_v36 }
 0x3c6   : > { %2461 = vmatpush.msra.mxu1 %v2330_v38 }
 0x3ca   : > { %2018 = vmatmul.f32.gmra.mxu0 %v5497_v19  ;;  %2056 = vmatmul.f32.gmra.mxu1 %v5500_v17 }
 0x3cb   : > { %2094 = vmatmul.f32.gmra.mxu2 %v5495_v20  ;;  %2132 = vmatmul.f32.gmra.mxu3 %v5497_v19  ;;  %v2327_v20 = vld [vmem:[%s7169_s10 + $0xc0] sm:$0xff]  ;;  %v2324_v19 = vld [vmem:[%s7169_s10 + $0xa8] sm:$0xff] }
 0x3cc   : > { %2462 = vmatpush.msra.mxu1 %v2327_v20  ;;  %v2307_v20 = vld [vmem:[%s7169_s10 + $0x20] sm:$0xff] }
 0x3ce   : > { %2463 = vmatpush.msra.mxu1 %v2324_v19 }
 0x3d0   : > { %2464 = vmatpush.msra.mxu1 %v2321_v46  ;;  %v2304_v46 = vld [vmem:[%s7169_s10 + $0x8] sm:$0xff] }
 0x3d2   : > { %2021 = vmatmul.f32.gmra.mxu0 %v5527_v5  ;;  %2059 = vmatmul.f32.gmra.mxu1 %v5529_v7 }
 0x3d3   : > { %2097 = vmatmul.f32.gmra.mxu2 %v5525_v62  ;;  %2135 = vmatmul.f32.gmra.mxu3 %v5527_v5 }
 0x3d4   : > { %2465 = vmatpush.msra.mxu1 %v2318_v21 }
 0x3d6   : > { %2466 = vmatpush.msra.mxu1 %v2315_v4 }
 0x3d8   : > { %2467 = vmatpush.msra.mxu1 %v2312_v0  ;;  %v2397_v0 = vld [vmem:[%s7169_s10 + $0x2f0] sm:$0xff] }
 0x3da   : > { %2155 = vmatmul.f32.vlgmr.msrb.gmra.mxu0 %v5059_v57  ;;  %v2346_v57 = vld [vmem:[%s7169_s10 + $0x158] sm:$0xff]  ;;  %2468 = vmatpush.msra.mxu1 %v2309_v60 }
 0x3db   : > { %2570 = vmatpush.msra.mxu0 %v2346_v57 }
 0x3dc   : > { %2469 = vmatpush.msra.mxu1 %v2306_v54 }
 0x3dd   : > { %2571 = vmatpush.msra.mxu0 %v2343_v58 }
 0x3de   : > { %2470 = vmatpush.msra.mxu1 %v2303_v45 }
 0x3df   : > { %2572 = vmatpush.msra.mxu0 %v2340_v31  ;;  %v2393_v31 = vld [vmem:[%s7169_s10 + $0x2d0] sm:$0xff] }
 0x3e0   : > { %2607 = vmatpush.msrb.mxu1 %v2397_v0  ;;  %v2379_v0 = vld [vmem:[%s7169_s10 + $0x260] sm:$0xff] }
 0x3e2   : > { %2158 = vmatmul.f32.gmra.mxu0 %v5141_v3  ;;  %v2337_v3 = vld [vmem:[%s7169_s10 + $0x110] sm:$0xff] }
 0x3e3   : > { %2573 = vmatpush.msra.mxu0 %v2337_v3 }
 0x3e5   : > { %2574 = vmatpush.msra.mxu0 %v2334_v35  ;;  %v2394_v35 = vld [vmem:[%s7169_s10 + $0x2d8] sm:$0xff] }
 0x3e6   : > { %2608 = vmatpush.msrb.mxu1 %v2394_v35 }
 0x3e7   : > { %v1852_v62 = vpop.f32.mrf.mxu0  ;;  %v1890_v5 = vpop.f32.mrf.mxu1  ;;  %2575 = vmatpush.msra.mxu0 %v2331_v32  ;;  %v2387_v32 = vld [vmem:[%s7169_s10 + $0x2a0] sm:$0xff] }
 0x3e8   : > { %v1853_v61 = vadd.f32 %v1852_v62, %v5673_v59 }
 0x3e9   : > { %2576 = vmatpush.msra.mxu0 %v2328_v6 }
 0x3ea   : > { %2161 = vmatmul.f32.gmra.mxu0 %v5220_v15  ;;  %v1891_v24 = vadd.f32 %v1890_v5, %v1853_v61  ;;  %v2322_v15 = vld [vmem:[%s7169_s10 + $0x98] sm:$0xff]  ;;  %v2391_v61 = vld [vmem:[%s7169_s10 + $0x2c0] sm:$0xff] }
 0x3eb   : > { %2577 = vmatpush.msra.mxu0 %v2325_v16  ;;  %v2384_v16 = vld [vmem:[%s7169_s10 + $0x288] sm:$0xff]  ;;  %2609 = vmatpush.msrb.mxu1 %v2391_v61 }
 0x3ed   : > { %2578 = vmatpush.msra.mxu0 %v2322_v15 }
 0x3ee   : > { %v1928_v56 = vpop.f32.mrf.mxu2 }
 0x3ef   : > { %v1929_v28 = vadd.f32 %v1928_v56, %v1891_v24  ;;  %v1855_v53 = vpop.f32.mrf.mxu0  ;;  %v1893_v41 = vpop.f32.mrf.mxu1  ;;  %2579 = vmatpush.msra.mxu0 %v2319_v44  ;;  %v2388_v44 = vld [vmem:[%s7169_s10 + $0x2a8] sm:$0xff] }
 0x3f0   : > { %v1856_v47 = vadd.f32 %v1855_v53, %v5673_v59  ;;  %v5751_v24 = vpop.f32.mrf.mxu3  ;;  %2610 = vmatpush.msrb.mxu1 %v2388_v44  ;;  %v2373_v44 = vld [vmem:[%s7169_s10 + $0x230] sm:$0xff] }
 0x3f1   : > { %v2198_v18 = vmin.f32 %v1929_v28, 0.0  ;;  %2580 = vmatpush.msra.mxu0 %v2316_v12  ;;  %vm2177_vm7 = vcmp.gt.f32.partialorder %v1929_v28, 0.0 }
 0x3f2   : > { %2164 = vmatmul.f32.gmra.mxu0 %v5320_v25  ;;  %v1894_v30 = vadd.f32 %v1893_v41, %v1856_v47  ;;  %v2396_v25 = vld [vmem:[%s7169_s10 + $0x2e8] sm:$0xff]  ;;  %v2381_v41 = vld [vmem:[%s7169_s10 + $0x270] sm:$0xff] }
 0x3f3   : > { %v2219_v42 = vmul.f32 1.442695, %v2198_v18  ;;  %2581 = vmatpush.msra.mxu0 %v2313_v27  ;;  %2493 = vmatpush.msrb.mxu2 %v2396_v25 }
 0x3f5   : > { %4007 = vpow2.f32 %v2219_v42  ;;  %2582 = vmatpush.msra.mxu0 %v2310_v22  ;;  %2494 = vmatpush.msrb.mxu2 %v2393_v31 }
 0x3f6   : > { %v1931_v13 = vpop.f32.mrf.mxu2 }
 0x3f7   : > { %v1932_v34 = vadd.f32 %v1931_v13, %v1894_v30  ;;  %v1858_v36 = vpop.f32.mrf.mxu0  ;;  %v1896_v38 = vpop.f32.mrf.mxu1  ;;  %2583 = vmatpush.msra.mxu0 %v2307_v20 }
 0x3f8   : > { %v1859_v50 = vadd.f32 %v1858_v36, %v5673_v59  ;;  %v5765_v25 = vpop.f32.mrf.mxu3 }
 0x3f9   : > { %v2201_v19 = vmin.f32 %v1932_v34, 0.0  ;;  %2584 = vmatpush.msra.mxu0 %v2304_v46  ;;  %vm2180_vm8 = vcmp.gt.f32.partialorder %v1932_v34, 0.0 }
 0x3fa   : > { %2167 = vmatmul.f32.gmra.mxu0 %v5422_v23  ;;  %v1897_v4 = vadd.f32 %v1896_v38, %v1859_v50  ;;  %v2390_v23 = vld [vmem:[%s7169_s10 + $0x2b8] sm:$0xff] }
 0x3fb   : > { %v4008_v57 = vpop.eup %4007  ;;  %v2225_v21 = vmul.f32 1.442695, %v2201_v19  ;;  %2495 = vmatpush.msrb.mxu2 %v2390_v23  ;;  %v2372_v23 = vld [vmem:[%s7169_s10 + $0x228] sm:$0xff] }
 0x3fc   : > { %v3876_v58 = vadd.f32 -1.0, %v4008_v57  ;;  %v2385_v57 = vld [vmem:[%s7169_s10 + $0x290] sm:$0xff] }
 0x3fd   : > { %4009 = vpow2.f32 %v2225_v21  ;;  %2496 = vmatpush.msrb.mxu2 %v2387_v32  ;;  %v2375_v21 = vld [vmem:[%s7169_s10 + $0x240] sm:$0xff]  ;;  %2611 = vmatpush.msrb.mxu1 %v2385_v57  ;;  %v2364_v57 = vld [vmem:[%s7169_s10 + $0x1e8] sm:$0xff] }
 0x3fe   : > { %v1934_v3 = vpop.f32.mrf.mxu2  ;;  %v5735_v60 = vsel %vm2177_vm7, %v1929_v28, %v3876_v58  ;;  %v2382_v58 = vld [vmem:[%s7169_s10 + $0x278] sm:$0xff]  ;;  %v2395_v32 = vld [vmem:[%s7169_s10 + $0x2e0] sm:$0xff] }
 0x3ff   : > { %v1935_v62 = vadd.f32 %v1934_v3, %v1897_v4  ;;  %2471 = vmatmul.f32.vlgmr.msra.gmra.mxu1 %v5735_v60  ;;  %v1861_v5 = vpop.f32.mrf.mxu0  ;;  %v1899_v54 = vpop.f32.mrf.mxu1  ;;  %2497 = vmatpush.msrb.mxu2 %v2384_v16 }
 0x400   : > { %v1862_v6 = vadd.f32 %v1861_v5, %v5673_v59  ;;  %2612 = vmatpush.msrb.mxu1 %v2382_v58  ;;  %v2398_v5 = vld [vmem:[%s7169_s10 + $0x2f8] sm:$0xff]  ;;  %v5808_v16 = vpop.f32.mrf.mxu3 }
 0x401   : > { %v2204_v45 = vmin.f32 %v1935_v62, 0.0  ;;  %2498 = vmatpush.msrb.mxu2 %v2381_v41  ;;  %vm2183_vm10 = vcmp.gt.f32.partialorder %v1935_v62, 0.0  ;;  %2721 = vmatpush.msrb.mxu0 %v2398_v5 }
 0x402   : > { %2170 = vmatmul.f32.gmra.mxu0 %v5500_v17  ;;  %v1900_v53 = vadd.f32 %v1899_v54, %v1862_v6  ;;  %2613 = vmatpush.msrb.mxu1 %v2379_v0  ;;  %v2366_v6 = vld [vmem:[%s7169_s10 + $0x1f8] sm:$0xff] }
 0x403   : > { %v4010_v56 = vpop.eup %4009  ;;  %v2231_v15 = vmul.f32 1.442695, %v2204_v45  ;;  %v2376_v45 = vld [vmem:[%s7169_s10 + $0x248] sm:$0xff]  ;;  %2722 = vmatpush.msrb.mxu0 %v2395_v32 }
 0x404   : > { %v3879_v28 = vadd.f32 -1.0, %v4010_v56  ;;  %2614 = vmatpush.msrb.mxu1 %v2376_v45 }
 0x405   : > { %4011 = vpow2.f32 %v2231_v15 }
 0x406   : > { %v1937_v18 = vpop.f32.mrf.mxu2  ;;  %v5760_v47 = vsel %vm2180_vm8, %v1932_v34, %v3879_v28  ;;  %2615 = vmatpush.msrb.mxu1 %v2373_v44 }
 0x407   : > { %v1938_v17 = vadd.f32 %v1937_v18, %v1900_v53  ;;  %2474 = vmatmul.f32.gmra.mxu1 %v5760_v47  ;;  %v1864_v12 = vpop.f32.mrf.mxu0  ;;  %v1902_v42 = vpop.f32.mrf.mxu1  ;;  %v2363_v18 = vld [vmem:[%s7169_s10 + $0x1e0] sm:$0xff] }
 0x408   : > { %v1865_v30 = vadd.f32 %v1864_v12, %v5673_v59 }
 0x409   : > { %v2207_v27 = vmin.f32 %v1938_v17, 0.0  ;;  %vm2186_vm11 = vcmp.gt.f32.partialorder %v1938_v17, 0.0 }
 0x40a   : > { %2173 = vmatmul.f32.gmra.mxu0 %v5529_v7  ;;  %v1903_v34 = vadd.f32 %v1902_v42, %v1865_v30  ;;  %v2378_v7 = vld [vmem:[%s7169_s10 + $0x258] sm:$0xff]  ;;  %v2389_v30 = vld [vmem:[%s7169_s10 + $0x2b0] sm:$0xff] }
 0x40b   : > { %v4012_v13 = vpop.eup %4011  ;;  %v2237_v22 = vmul.f32 1.442695, %v2207_v27  ;;  %2499 = vmatpush.msrb.mxu2 %v2378_v7  ;;  %v2370_v27 = vld [vmem:[%s7169_s10 + $0x218] sm:$0xff] }
 0x40c   : > { %v3882_v36 = vadd.f32 -1.0, %v4012_v13  ;;  %v5833_v13 = vperm.slane %v5658_v49, 1  ;;  %2616 = vmatpush.msrb.mxu1 %v2370_v27 }
 0x40d   : > { %4013 = vpow2.f32 %v2237_v22  ;;  %2500 = vmatpush.msrb.mxu2 %v2375_v21  ;;  %v2360_v22 = vld [vmem:[%s7169_s10 + $0x1c8] sm:$0xff]  ;;  %v2383_v21 = vld [vmem:[%s7169_s10 + $0x280] sm:$0xff] }
 0x40e   : > { %v1940_v38 = vpop.f32.mrf.mxu2  ;;  %v5767_v20 = vsel %vm2183_vm10, %v1935_v62, %v3882_v36  ;;  %v2369_v62 = vld [vmem:[%s7169_s10 + $0x210] sm:$0xff]  ;;  %v1967_v58 = vadd.f32 %v5751_v24, %v5833_v13  ;;  %v5867_v24 = vpop.f32.mrf.mxu3 }
 0x40f   : > { %v5769_v19 = vadd.f32 %v1940_v38, %v1903_v34  ;;  %2477 = vmatmul.f32.gmra.mxu1 %v5767_v20  ;;  %v1867_v50 = vpop.f32.mrf.mxu0  ;;  %v1905_v46 = vpop.f32.mrf.mxu1  ;;  %2501 = vmatpush.msrb.mxu2 %v2372_v23  ;;  %v2367_v38 = vld [vmem:[%s7169_s10 + $0x200] sm:$0xff]  ;;  %v2354_v23 = vld [vmem:[%s7169_s10 + $0x198] sm:$0xff] }
 0x410   : > { %v1868_v31 = vadd.f32 %v1867_v50, %v5673_v59  ;;  %2617 = vmatpush.msrb.mxu1 %v2367_v38 }
 0x411   : > { %v2210_v4 = vmin.f32 %v5769_v19, 0.0  ;;  %2502 = vmatpush.msrb.mxu2 %v2369_v62  ;;  %vm2189_vm12 = vcmp.gt.f32.partialorder %v5769_v19, 0.0  ;;  %v2361_v62 = vld [vmem:[%s7169_s10 + $0x1d0] sm:$0xff] }
 0x412   : > { %2585 = vmatmul.f32.vlgmr.msra.gmra.mxu0 %v5735_v60  ;;  %v1906_v61 = vadd.f32 %v1905_v46, %v1868_v31  ;;  %v2357_v46 = vld [vmem:[%s7169_s10 + $0x1b0] sm:$0xff]  ;;  %2618 = vmatpush.msrb.mxu1 %v2364_v57 }
 0x413   : > { %v4014_v3 = vpop.eup %4013  ;;  %v2243_v35 = vmul.f32 1.442695, %v2210_v4  ;;  %2503 = vmatpush.msrb.mxu2 %v2366_v6  ;;  %v2377_v6 = vld [vmem:[%s7169_s10 + $0x250] sm:$0xff] }
 0x414   : > { %v3885_v54 = vadd.f32 -1.0, %v4014_v3  ;;  %2619 = vmatpush.msrb.mxu1 %v2361_v62 }
 0x415   : > { %4015 = vpow2.f32 %v2243_v35  ;;  %2504 = vmatpush.msrb.mxu2 %v2363_v18 }
 0x416   : > { %v1943_v56 = vpop.f32.mrf.mxu2  ;;  %v5810_v15 = vsel %vm2186_vm11, %v1938_v17, %v3885_v54  ;;  %v2392_v17 = vld [vmem:[%s7169_s10 + $0x2c8] sm:$0xff] }
 0x417   : > { %v5812_v28 = vadd.f32 %v1943_v56, %v1906_v61  ;;  %2480 = vmatmul.f32.gmra.mxu1 %v5810_v15  ;;  %v1870_v53 = vpop.f32.mrf.mxu0  ;;  %v1908_v41 = vpop.f32.mrf.mxu1  ;;  %2723 = vmatpush.msrb.mxu0 %v2392_v17  ;;  %v2380_v54 = vld [vmem:[%s7169_s10 + $0x268] sm:$0xff]  ;;  %v2358_v61 = vld [vmem:[%s7169_s10 + $0x1b8] sm:$0xff] }
 0x418   : > { %v1871_v42 = vadd.f32 %v1870_v53, %v5673_v59  ;;  %v2386_v59 = vld [vmem:[%s7169_s10 + $0x298] sm:$0xff]  ;;  %2505 = vmatpush.msrb.mxu2 %v2360_v22  ;;  %2620 = vmatpush.msrb.mxu1 %v2358_v61  ;;  %v2371_v22 = vld [vmem:[%s7169_s10 + $0x220] sm:$0xff]  ;;  %v2441_v61 = vld [vmem:[%s7169_s10 + $0x450] sm:$0xff] }
 0x419   : > { %v2213_v12 = vmin.f32 %v5812_v28, 0.0  ;;  %2724 = vmatpush.msrb.mxu0 %v2389_v30  ;;  %v2374_v17 = vld [vmem:[%s7169_s10 + $0x238] sm:$0xff]  ;;  %vm2192_vm13 = vcmp.gt.f32.partialorder %v5812_v28, 0.0 }
 0x41a   : > { %2588 = vmatmul.f32.gmra.mxu0 %v5760_v47  ;;  %v1909_v7 = vadd.f32 %v1908_v41, %v1871_v42  ;;  %2506 = vmatpush.msrb.mxu2 %v2357_v46  ;;  %v2355_v41 = vld [vmem:[%s7169_s10 + $0x1a0] sm:$0xff]  ;;  %v1970_v42 = vadd.f32 %v5765_v25, %v5833_v13  ;;  %v2368_v25 = vld [vmem:[%s7169_s10 + $0x208] sm:$0xff] }
 0x41b   : > { %v4016_v36 = vpop.eup %4015  ;;  %v2249_v34 = vmul.f32 1.442695, %v2213_v12  ;;  %2725 = vmatpush.msrb.mxu0 %v2386_v59  ;;  %v2352_v12 = vld [vmem:[%s7169_s10 + $0x188] sm:$0xff]  ;;  %2621 = vmatpush.msrb.mxu1 %v2355_v41  ;;  %v2442_v41 = vld [vmem:[%s7169_s10 + $0x458] sm:$0xff] }
 0x41c   : > { %v3888_v50 = vadd.f32 -1.0, %v4016_v36  ;;  %2507 = vmatpush.msrb.mxu2 %v2354_v23 }
 0x41d   : > { %4017 = vpow2.f32 %v2249_v34  ;;  %2726 = vmatpush.msrb.mxu0 %v2383_v21  ;;  %2622 = vmatpush.msrb.mxu1 %v2352_v12  ;;  %v2362_v21 = vld [vmem:[%s7169_s10 + $0x1d8] sm:$0xff]  ;;  %v1976_v12 = vadd.f32 %v5867_v24, %v5833_v13 }
 0x41e   : > { %v1946_v4 = vpop.f32.mrf.mxu2  ;;  %v5858_v31 = vsel %vm2189_vm12, %v5769_v19, %v3888_v50  ;;  %v2351_v19 = vld [vmem:[%s7169_s10 + $0x180] sm:$0xff]  ;;  %v2365_v50 = vld [vmem:[%s7169_s10 + $0x1f0] sm:$0xff]  ;;  %v2446_v24 = vld [vmem:[%s7169_s10 + $0x478] sm:$0xff] }
 0x41f   : > { %v1947_v0 = vadd.f32 %v1946_v4, %v1909_v7  ;;  %2483 = vmatmul.f32.gmra.mxu1 %v5858_v31  ;;  %v2004_v3 = vpop.f32.mrf.mxu0  ;;  %v2042_v35 = vpop.f32.mrf.mxu1  ;;  %2508 = vmatpush.msrb.mxu2 %v2351_v19  ;;  %v1973_v4 = vadd.f32 %v5808_v16, %v5833_v13  ;;  %v2356_v16 = vld [vmem:[%s7169_s10 + $0x1a8] sm:$0xff] }
 0x420   : > { %v2005_v5 = vadd.f32 %v2004_v3, %v1967_v58  ;;  %2727 = vmatpush.msrb.mxu0 %v2380_v54  ;;  %2759 = vmatpush.msra.mxu1 %v2446_v24 }
 0x421   : > { %v2216_v32 = vmin.f32 %v1947_v0, 0.0  ;;  %vm2195_vm14 = vcmp.gt.f32.partialorder %v1947_v0, 0.0 }
 0x422   : > { %v2043_v45 = vadd.f32 %v2042_v35, %v2005_v5  ;;  %2591 = vmatmul.f32.gmra.mxu0 %v5767_v20  ;;  %v2359_v35 = vld [vmem:[%s7169_s10 + $0x1c0] sm:$0xff] }
 0x423   : > { %v4018_v56 = vpop.eup %4017  ;;  %v2255_v53 = vmul.f32 1.442695, %v2216_v32  ;;  %2728 = vmatpush.msrb.mxu0 %v2377_v6  ;;  %v2445_v6 = vld [vmem:[%s7169_s10 + $0x470] sm:$0xff] }
 0x424   : > { %v2199_v44 = vmin.f32 %v2043_v45, 0.0  ;;  %v3891_v18 = vadd.f32 -1.0, %v4018_v56  ;;  %vm2178_vm15 = vcmp.gt.f32.partialorder %v2043_v45, 0.0  ;;  %2645 = vmatpush.msra.mxu2 %v2445_v6 }
 0x425   : > { %4019 = vpow2.f32 %v2255_v53  ;;  %2729 = vmatpush.msrb.mxu0 %v2374_v17  ;;  %v2438_v53 = vld [vmem:[%s7169_s10 + $0x438] sm:$0xff] }
 0x426   : > { %v2221_v27 = vmul.f32 1.442695, %v2199_v44  ;;  %v5895_v30 = vsel %vm2192_vm13, %v5812_v28, %v3891_v18  ;;  %v5904_v28 = vpop.f32.mrf.mxu3  ;;  %2646 = vmatpush.msra.mxu2 %v2442_v41 }
 0x427   : > { %2486 = vmatmul.f32.gmra.mxu1 %v5895_v30  ;;  %v2007_v59 = vpop.f32.mrf.mxu0  ;;  %v2045_v36 = vpop.f32.mrf.mxu1  ;;  %2730 = vmatpush.msrb.mxu0 %v2371_v22 }
 0x428   : > { %4021 = vpow2.f32 %v2221_v27  ;;  %v2008_v34 = vadd.f32 %v2007_v59, %v1970_v42 }
 0x429   : > { %2731 = vmatpush.msrb.mxu0 %v2368_v25  ;;  %v2439_v25 = vld [vmem:[%s7169_s10 + $0x440] sm:$0xff] }
 0x42a   : > { %v2046_v38 = vadd.f32 %v2045_v36, %v2008_v34  ;;  %2594 = vmatmul.f32.gmra.mxu0 %v5810_v15  ;;  %v2435_v34 = vld [vmem:[%s7169_s10 + $0x420] sm:$0xff]  ;;  %2647 = vmatpush.msra.mxu2 %v2439_v25 }
 0x42b   : > { %v4020_v46 = vpop.eup %4019  ;;  %2732 = vmatpush.msrb.mxu0 %v2365_v50 }
 0x42c   : > { %v2202_v7 = vmin.f32 %v2046_v38, 0.0  ;;  %v3894_v57 = vadd.f32 -1.0, %v4020_v46  ;;  %vm2181_vm0 = vcmp.gt.f32.partialorder %v2046_v38, 0.0  ;;  %v2432_v46 = vld [vmem:[%s7169_s10 + $0x408] sm:$0xff] }
 0x42d   : > { %2733 = vmatpush.msrb.mxu0 %v2362_v21  ;;  %v2429_v21 = vld [vmem:[%s7169_s10 + $0x3f0] sm:$0xff] }
 0x42e   : > { %v4022_v58 = vpop.eup %4021  ;;  %v2227_v23 = vmul.f32 1.442695, %v2202_v7  ;;  %v5915_v3 = vsel %vm2195_vm14, %v1947_v0, %v3894_v57  ;;  %v2444_v0 = vld [vmem:[%s7169_s10 + $0x468] sm:$0xff]  ;;  %v5948_v44 = vpop.f32.mrf.mxu3 }
 0x42f   : > { %v3877_v62 = vadd.f32 -1.0, %v4022_v58  ;;  %2489 = vmatmul.f32.gmra.mxu1 %v5915_v3  ;;  %v2010_v5 = vpop.f32.mrf.mxu0  ;;  %v2048_v19 = vpop.f32.mrf.mxu1  ;;  %2734 = vmatpush.msrb.mxu0 %v2359_v35  ;;  %v2436_v7 = vld [vmem:[%s7169_s10 + $0x428] sm:$0xff]  ;;  %v2433_v58 = vld [vmem:[%s7169_s10 + $0x410] sm:$0xff] }
 0x430   : > { %4023 = vpow2.f32 %v2227_v23  ;;  %v2011_v54 = vadd.f32 %v2010_v5, %v1973_v4  ;;  %2531 = vmatpush.msrb.mxu3 %v2444_v0  ;;  %2648 = vmatpush.msra.mxu2 %v2436_v7  ;;  %v2426_v23 = vld [vmem:[%s7169_s10 + $0x3d8] sm:$0xff]  ;;  %v2440_v35 = vld [vmem:[%s7169_s10 + $0x448] sm:$0xff] }
 0x431   : > { %v5927_v32 = vsel %vm2178_vm15, %v2043_v45, %v3877_v62  ;;  %v2353_v45 = vld [vmem:[%s7169_s10 + $0x190] sm:$0xff]  ;;  %2735 = vmatpush.msrb.mxu0 %v2356_v16  ;;  %v2430_v62 = vld [vmem:[%s7169_s10 + $0x3f8] sm:$0xff]  ;;  %vm3609_vm15 = vcmask 523264  }
 0x432   : > { %v5935_v56 = vadd.f32 %v2048_v19, %v2011_v54  ;;  %2509 = vmatmul.f32.vlgmr.msrb.gmra.mxu2 %v5927_v32  ;;  %2597 = vmatmul.f32.gmra.mxu0 %v5858_v31  ;;  %v1979_v19 = vadd.f32 %v5904_v28, %v5833_v13  ;;  %v2437_v28 = vld [vmem:[%s7169_s10 + $0x430] sm:$0xff] }
 0x433   : > { %2532 = vmatpush.msrb.mxu3 %v2441_v61  ;;  %2736 = vmatpush.msrb.mxu0 %v2353_v45 }
 0x434   : > { %v2205_v18 = vmin.f32 %v5935_v56, 0.0  ;;  %2649 = vmatpush.msra.mxu2 %v2433_v58  ;;  %vm2184_vm1 = vcmp.gt.f32.partialorder %v5935_v56, 0.0 }
 0x435   : > { %2533 = vmatpush.msrb.mxu3 %v2438_v53 }
 0x436   : > { %v4024_v17 = vpop.eup %4023  ;;  %v2233_v42 = vmul.f32 1.442695, %v2205_v18  ;;  %v5993_v54 = vpop.f32.mrf.mxu3  ;;  %2650 = vmatpush.msra.mxu2 %v2430_v62  ;;  %v2418_v62 = vld [vmem:[%s7169_s10 + $0x398] sm:$0xff] }
 0x437   : > { %2623 = vmatmul.f32.vlgmr.msrb.gmra.mxu1 %v5927_v32  ;;  %v2013_v27 = vpop.f32.mrf.mxu0  ;;  %v2051_v22 = vpop.f32.mrf.mxu1  ;;  %v3880_v59 = vadd.f32 -1.0, %v4024_v17  ;;  %2534 = vmatpush.msrb.mxu3 %v2435_v34  ;;  %v2424_v34 = vld [vmem:[%s7169_s10 + $0x3c8] sm:$0xff] }
 0x438   : > { %4025 = vpow2.f32 %v2233_v42  ;;  %v2014_v36 = vadd.f32 %v2013_v27, %v1976_v12  ;;  %v6007_v18 = vpop.f32.mrf.mxu2  ;;  %v2423_v12 = vld [vmem:[%s7169_s10 + $0x3c0] sm:$0xff]  ;;  %v2434_v42 = vld [vmem:[%s7169_s10 + $0x418] sm:$0xff] }
 0x439   : > { %v5963_v50 = vsel %vm2181_vm0, %v2046_v38, %v3880_v59  ;;  %v2443_v38 = vld [vmem:[%s7169_s10 + $0x460] sm:$0xff]  ;;  %2535 = vmatpush.msrb.mxu3 %v2432_v46  ;;  %vm3637_vm0 = vcmask 516096  }
 0x43a   : > { %v2052_v57 = vadd.f32 %v2051_v22, %v2014_v36  ;;  %2512 = vmatmul.f32.gmra.mxu2 %v5963_v50  ;;  %2600 = vmatmul.f32.gmra.mxu0 %v5895_v30  ;;  %v1982_v22 = vadd.f32 %v5948_v44, %v5833_v13  ;;  %v2420_v36 = vld [vmem:[%s7169_s10 + $0x3a8] sm:$0xff]  ;;  %v2431_v44 = vld [vmem:[%s7169_s10 + $0x400] sm:$0xff] }
 0x43b   : > { %2760 = vmatpush.msra.mxu1 %v2443_v38  ;;  %2536 = vmatpush.msrb.mxu3 %v2429_v21  ;;  %v2417_v38 = vld [vmem:[%s7169_s10 + $0x390] sm:$0xff] }
 0x43c   : > { %v2208_v4 = vmin.f32 %v2052_v57, 0.0  ;;  %vm2187_vm2 = vcmp.gt.f32.partialorder %v2052_v57, 0.0 }
 0x43d   : > { %2537 = vmatpush.msrb.mxu3 %v2426_v23  ;;  %2761 = vmatpush.msra.mxu1 %v2440_v35  ;;  %v2428_v35 = vld [vmem:[%s7169_s10 + $0x3e8] sm:$0xff] }
 0x43e   : > { %v4026_v5 = vpop.eup %4025  ;;  %v2239_v16 = vmul.f32 1.442695, %v2208_v4  ;;  %v6034_v21 = vpop.f32.mrf.mxu3  ;;  %v2421_v4 = vld [vmem:[%s7169_s10 + $0x3b0] sm:$0xff] }
 0x43f   : > { %2626 = vmatmul.f32.gmra.mxu1 %v5963_v50  ;;  %v2016_v0 = vpop.f32.mrf.mxu0  ;;  %v2054_v61 = vpop.f32.mrf.mxu1  ;;  %v3883_v6 = vadd.f32 -1.0, %v4026_v5  ;;  %2538 = vmatpush.msrb.mxu3 %v2423_v12  ;;  %v2408_v12 = vld [vmem:[%s7169_s10 + $0x348] sm:$0xff] }
 0x440   : > { %4027 = vpow2.f32 %v2239_v16  ;;  %v2017_v45 = vadd.f32 %v2016_v0, %v1979_v19  ;;  %2762 = vmatpush.msra.mxu1 %v2437_v28  ;;  %v2891_v19 = vld [vmem:[%s7171_s12 + $0x2f0] sm:$0xff]  ;;  %v6061_v16 = vpop.f32.mrf.mxu2  ;;  %v6072_v28 = vperm.slane %v5658_v49, 2  ;;  %v2422_v49 = vld [vmem:[%s7169_s10 + $0x3b8] sm:$0xff] }
 0x441   : > { %v6001_v53 = vsel %vm2184_vm1, %v5935_v56, %v3883_v6  ;;  %v2427_v56 = vld [vmem:[%s7169_s10 + $0x3e0] sm:$0xff]  ;;  %2539 = vmatpush.msrb.mxu3 %v2420_v36  ;;  %v2425_v0 = vld [vmem:[%s7169_s10 + $0x3d0] sm:$0xff]  ;;  %2969 = vmatpush.msra.mxu0 %v2891_v19 }
 0x442   : > { %v6003_v41 = vadd.f32 %v2054_v61, %v2017_v45  ;;  %2515 = vmatmul.f32.gmra.mxu2 %v6001_v53  ;;  %2603 = vmatmul.f32.gmra.mxu0 %v5915_v3  ;;  %v2415_v61 = vld [vmem:[%s7169_s10 + $0x380] sm:$0xff]  ;;  %v1985_v45 = vadd.f32 %v5993_v54, %v5833_v13  ;;  %v2412_v54 = vld [vmem:[%s7169_s10 + $0x368] sm:$0xff]  ;;  %v2405_v36 = vld [vmem:[%s7169_s10 + $0x330] sm:$0xff] }
 0x443   : > { %2651 = vmatpush.msra.mxu2 %v2427_v56  ;;  %2763 = vmatpush.msra.mxu1 %v2434_v42  ;;  %v2889_v56 = vld [vmem:[%s7171_s12 + $0x2e0] sm:$0xff]  ;;  %v2883_v19 = vld [vmem:[%s7171_s12 + $0x2b0] sm:$0xff] }
 0x444   : > { %v2211_v17 = vmin.f32 %v6003_v41, 0.0  ;;  %2540 = vmatpush.msrb.mxu3 %v2417_v38  ;;  %vm2190_vm3 = vcmp.gt.f32.partialorder %v6003_v41, 0.0  ;;  %2970 = vmatpush.msra.mxu0 %v2889_v56  ;;  %v2406_v38 = vld [vmem:[%s7169_s10 + $0x338] sm:$0xff]  ;;  %v2881_v56 = vld [vmem:[%s7171_s12 + $0x2a0] sm:$0xff] }
 0x445   : > { %2652 = vmatpush.msra.mxu2 %v2424_v34  ;;  %2764 = vmatpush.msra.mxu1 %v2431_v44  ;;  %v2887_v34 = vld [vmem:[%s7171_s12 + $0x2d0] sm:$0xff]  ;;  %v2885_v44 = vld [vmem:[%s7171_s12 + $0x2c0] sm:$0xff] }
 0x446   : > { %v4028_v27 = vpop.eup %4027  ;;  %v2245_v59 = vmul.f32 1.442695, %v2211_v17  ;;  %2971 = vmatpush.msra.mxu0 %v2887_v34 }
 0x447   : > { %2629 = vmatmul.f32.gmra.mxu1 %v6001_v53  ;;  %v2019_v25 = vpop.f32.mrf.mxu0  ;;  %v2057_v24 = vpop.f32.mrf.mxu1  ;;  %v3886_v46 = vadd.f32 -1.0, %v4028_v27  ;;  %2653 = vmatpush.msra.mxu2 %v2421_v4  ;;  %v2416_v4 = vld [vmem:[%s7169_s10 + $0x388] sm:$0xff] }
 0x448   : > { %4029 = vpow2.f32 %v2245_v59  ;;  %v2020_v7 = vadd.f32 %v2019_v25, %v1982_v22  ;;  %2765 = vmatpush.msra.mxu1 %v2428_v35  ;;  %v2081_v25 = vadd.f32 %v6007_v18, %v6072_v28  ;;  %v2402_v18 = vld [vmem:[%s7169_s10 + $0x318] sm:$0xff]  ;;  %v2399_v35 = vld [vmem:[%s7169_s10 + $0x300] sm:$0xff]  ;;  %2972 = vmatpush.msra.mxu0 %v2885_v44 }
 0x449   : > { %v6036_v58 = vsel %vm2187_vm2, %v2052_v57, %v3886_v46  ;;  %v2414_v57 = vld [vmem:[%s7169_s10 + $0x378] sm:$0xff]  ;;  %2654 = vmatpush.msra.mxu2 %v2418_v62  ;;  %v2409_v46 = vld [vmem:[%s7169_s10 + $0x350] sm:$0xff] }
 0x44a   : > { %v6041_v23 = vadd.f32 %v2057_v24, %v2020_v7  ;;  %2518 = vmatmul.f32.gmra.mxu2 %v6036_v58  ;;  %2737 = vmatmul.f32.vlgmr.msrb.gmra.mxu0 %v5927_v32  ;;  %v2411_v32 = vld [vmem:[%s7169_s10 + $0x360] sm:$0xff]  ;;  %v2121_v7 = vpop.f32.mrf.mxu3  ;;  %v2119_v62 = vadd.f32 %v6034_v21, %v2081_v25  ;;  %v2413_v21 = vld [vmem:[%s7169_s10 + $0x370] sm:$0xff] }
 0x44b   : > { %2541 = vmatpush.msrb.mxu3 %v2414_v57  ;;  %2766 = vmatpush.msra.mxu1 %v2425_v0  ;;  %v2086_v0 = vpop.f32.mrf.mxu2 }
 0x44c   : > { %v2214_v5 = vmin.f32 %v6041_v23, 0.0  ;;  %2655 = vmatpush.msra.mxu2 %v2415_v61  ;;  %vm2193_vm4 = vcmp.gt.f32.partialorder %v6041_v23, 0.0  ;;  %2973 = vmatpush.msra.mxu0 %v2883_v19  ;;  %v2350_v19 = vld [vmem:[%s7169_s10 + $0x178] sm:$0xff] }
 0x44d   : > { %2542 = vmatpush.msrb.mxu3 %v2411_v32  ;;  %2767 = vmatpush.msra.mxu1 %v2422_v49  ;;  %v2403_v32 = vld [vmem:[%s7169_s10 + $0x320] sm:$0xff] }
 0x44e   : > { %v4030_v6 = vpop.eup %4029  ;;  %v2251_v17 = vmul.f32 1.442695, %v2214_v5  ;;  %2656 = vmatpush.msra.mxu2 %v2412_v54  ;;  %2974 = vmatpush.msra.mxu0 %v2881_v56  ;;  %v2867_v56 = vld [vmem:[%s7171_s12 + $0x230] sm:$0xff] }
 0x44f   : > { %2632 = vmatmul.f32.gmra.mxu1 %v6036_v58  ;;  %v2022_v42 = vpop.f32.mrf.mxu0  ;;  %v3889_v27 = vadd.f32 -1.0, %v4030_v6  ;;  %v2060_v22 = vpop.f32.mrf.mxu1  ;;  %2543 = vmatpush.msrb.mxu3 %v2408_v12 }
 0x450   : > { %4031 = vpow2.f32 %v2251_v17  ;;  %v2023_v13 = vadd.f32 %v2022_v42, %v1985_v45  ;;  %2657 = vmatpush.msra.mxu2 %v2409_v46  ;;  %v2400_v17 = vld [vmem:[%s7169_s10 + $0x308] sm:$0xff]  ;;  %v2084_v42 = vadd.f32 %v6061_v16, %v6072_v28  ;;  %v2407_v16 = vld [vmem:[%s7169_s10 + $0x340] sm:$0xff] }
 0x451   : > { %v6089_v59 = vsel %vm2190_vm3, %v6003_v41, %v3889_v27  ;;  %v2419_v41 = vld [vmem:[%s7169_s10 + $0x3a0] sm:$0xff]  ;;  %2544 = vmatpush.msrb.mxu3 %v2405_v36  ;;  %v2404_v46 = vld [vmem:[%s7169_s10 + $0x328] sm:$0xff] }
 0x452   : > { %v6099_v24 = vadd.f32 %v2060_v22, %v2023_v13  ;;  %2521 = vmatmul.f32.gmra.mxu2 %v6089_v59  ;;  %2740 = vmatmul.f32.gmra.mxu0 %v5963_v50  ;;  %v2410_v13 = vld [vmem:[%s7169_s10 + $0x358] sm:$0xff]  ;;  %v2124_v54 = vpop.f32.mrf.mxu3  ;;  %v2122_v36 = vadd.f32 %v2121_v7, %v2084_v42  ;;  %v2875_v7 = vld [vmem:[%s7171_s12 + $0x270] sm:$0xff]  ;;  %v2347_v42 = vld [vmem:[%s7169_s10 + $0x160] sm:$0xff] }
 0x453   : > { %2768 = vmatpush.msra.mxu1 %v2419_v41  ;;  %2545 = vmatpush.msrb.mxu3 %v2402_v18  ;;  %v2089_v18 = vpop.f32.mrf.mxu2 }
 0x454   : > { %v2217_v50 = vmin.f32 %v6099_v24, 0.0  ;;  %2658 = vmatpush.msra.mxu2 %v2406_v38  ;;  %vm2196_vm5 = vcmp.gt.f32.partialorder %v6099_v24, 0.0 }
 0x455   : > { %2769 = vmatpush.msra.mxu1 %v2416_v4  ;;  %2546 = vmatpush.msrb.mxu3 %v2399_v35  ;;  %v2401_v4 = vld [vmem:[%s7169_s10 + $0x310] sm:$0xff]  ;;  %v2873_v35 = vld [vmem:[%s7171_s12 + $0x260] sm:$0xff] }
 0x456   : > { %v4032_v57 = vpop.eup %4031  ;;  %v2257_v5 = vmul.f32 1.442695, %v2217_v50  ;;  %2659 = vmatpush.msra.mxu2 %v2403_v32  ;;  %v2087_v50 = vadd.f32 %v2086_v0, %v6072_v28  ;;  %v2869_v32 = vld [vmem:[%s7171_s12 + $0x240] sm:$0xff] }
 0x457   : > { %2635 = vmatmul.f32.gmra.mxu1 %v6089_v59  ;;  %v2156_v61 = vpop.f32.mrf.mxu0  ;;  %v3892_v6 = vadd.f32 -1.0, %v4032_v57  ;;  %2683 = vmatpush.msra.mxu3 %v2350_v19 }
 0x458   : > { %4033 = vpow2.f32 %v2257_v5  ;;  %v2157_v45 = vadd.f32 %v2156_v61, %v2119_v62  ;;  %2770 = vmatpush.msra.mxu1 %v2413_v21  ;;  %2660 = vmatpush.msra.mxu2 %v2400_v17  ;;  %v2871_v62 = vld [vmem:[%s7171_s12 + $0x250] sm:$0xff] }
 0x459   : > { %v6141_v12 = vsel %vm2193_vm4, %v6041_v23, %v3892_v6  ;;  %v2879_v23 = vld [vmem:[%s7171_s12 + $0x290] sm:$0xff]  ;;  %2684 = vmatpush.msra.mxu3 %v2347_v42  ;;  %v2817_v42 = vld [vmem:[%s7171_s12 + $0xa0] sm:$0xff] }
 0x45a   : > { %v2200_v27 = vmin.f32 %v2157_v45, 0.0  ;;  %2524 = vmatmul.f32.gmra.mxu2 %v6141_v12  ;;  %2743 = vmatmul.f32.gmra.mxu0 %v6001_v53  ;;  %v2877_v53 = vld [vmem:[%s7171_s12 + $0x280] sm:$0xff]  ;;  %vm2179_vm6 = vcmp.gt.f32.partialorder %v2157_v45, 0.0  ;;  %v2127_v0 = vpop.f32.mrf.mxu3  ;;  %v2827_v21 = vld [vmem:[%s7171_s12 + $0xf0] sm:$0xff] }
 0x45b   : > { %2771 = vmatpush.msra.mxu1 %v2410_v13  ;;  %2975 = vmatpush.msra.mxu0 %v2879_v23  ;;  %v2865_v23 = vld [vmem:[%s7171_s12 + $0x220] sm:$0xff] }
 0x45c   : > { %v2223_v49 = vmul.f32 1.442695, %v2200_v27  ;;  %2893 = vmatpush.msrb.mxu2 %v2827_v21  ;;  %v2090_v27 = vadd.f32 %v2089_v18, %v6072_v28 }
 0x45d   : > { %2772 = vmatpush.msra.mxu1 %v2407_v16  ;;  %2976 = vmatpush.msra.mxu0 %v2877_v53 }
 0x45e   : > { %v4034_v22 = vpop.eup %4033  ;;  %4035 = vpow2.f32 %v2223_v49  ;;  %v2344_v49 = vld [vmem:[%s7169_s10 + $0x148] sm:$0xff] }
 0x45f   : > { %2638 = vmatmul.f32.gmra.mxu1 %v6141_v12  ;;  %v2159_v34 = vpop.f32.mrf.mxu0  ;;  %v3895_v25 = vadd.f32 -1.0, %v4034_v22  ;;  %2977 = vmatpush.msra.mxu0 %v2875_v7  ;;  %v2863_v22 = vld [vmem:[%s7171_s12 + $0x210] sm:$0xff] }
 0x460   : > { %v6163_v41 = vadd.f32 %v2159_v34, %v2122_v36  ;;  %2773 = vmatpush.msra.mxu1 %v2404_v46  ;;  %2685 = vmatpush.msra.mxu3 %v2344_v49  ;;  %v2861_v34 = vld [vmem:[%s7171_s12 + $0x200] sm:$0xff]  ;;  %v2823_v46 = vld [vmem:[%s7171_s12 + $0xd0] sm:$0xff] }
 0x461   : > { %v6173_v44 = vsel %vm2196_vm5, %v6099_v24, %v3895_v25  ;;  %2978 = vmatpush.msra.mxu0 %v2873_v35  ;;  %v2341_v25 = vld [vmem:[%s7169_s10 + $0x130] sm:$0xff] }
 0x462   : > { %v2203_v38 = vmin.f32 %v6163_v41, 0.0  ;;  %2527 = vmatmul.f32.gmra.mxu2 %v6173_v44  ;;  %2746 = vmatmul.f32.gmra.mxu0 %v6036_v58  ;;  %v2125_v58 = vadd.f32 %v2124_v54, %v2087_v50  ;;  %v2092_v54 = vpop.f32.mrf.mxu2  ;;  %vm2182_vm7 = vcmp.gt.f32.partialorder %v6163_v41, 0.0  ;;  %v2130_v35 = vpop.f32.mrf.mxu3 }
 0x463   : > { %2774 = vmatpush.msra.mxu1 %v2401_v4  ;;  %2979 = vmatpush.msra.mxu0 %v2871_v62  ;;  %v2338_v4 = vld [vmem:[%s7169_s10 + $0x118] sm:$0xff]  ;;  %v2826_v62 = vld [vmem:[%s7171_s12 + $0xe8] sm:$0xff] }
 0x464   : > { %v4036_v24 = vpop.eup %4035  ;;  %v2229_v57 = vmul.f32 1.442695, %v2203_v38  ;;  %v2828_v38 = vld [vmem:[%s7171_s12 + $0xf8] sm:$0xff]  ;;  %2686 = vmatpush.msra.mxu3 %v2341_v25  ;;  %v2323_v25 = vld [vmem:[%s7169_s10 + $0xa0] sm:$0xff] }
 0x465   : > { %v3878_v5 = vadd.f32 -1.0, %v4036_v24  ;;  %2980 = vmatpush.msra.mxu0 %v2869_v32  ;;  %v2093_v24 = vadd.f32 %v2092_v54, %v6072_v28  ;;  %3007 = vmatpush.msrb.mxu1 %v2828_v38  ;;  %v2815_v54 = vld [vmem:[%s7171_s12 + $0x90] sm:$0xff] }
 0x466   : > { %4037 = vpow2.f32 %v2229_v57  ;;  %2687 = vmatpush.msra.mxu3 %v2338_v4  ;;  %v1604_v4 = vld [vmem:[%s7166_s7 + $0x28] sm:$0xff] }
 0x467   : > { %2641 = vmatmul.f32.gmra.mxu1 %v6173_v44  ;;  %v2162_v61 = vpop.f32.mrf.mxu0  ;;  %v2284_v6 = vsel %vm2179_vm6, %v2157_v45, %v3878_v5  ;;  %v2825_v45 = vld [vmem:[%s7171_s12 + $0xe0] sm:$0xff]  ;;  %2981 = vmatpush.msra.mxu0 %v2867_v56  ;;  %v2131_v21 = vadd.f32 %v2130_v35, %v2093_v24  ;;  %v1432_v56 = vsub.f32 %v4625_v2, %v5233_v40  ;;  %v2822_v2 = vld [vmem:[%s7171_s12 + $0xc8] sm:$0xff] }
 0x468   : > { %v6198_v17 = vadd.f32 %v2162_v61, %v2125_v58  ;;  %2547 = vmatmul.f32.vlgmr.msrb.gmra.mxu3 %v2284_v6  ;;  %2894 = vmatpush.msrb.mxu2 %v2825_v45  ;;  %v2335_v5 = vld [vmem:[%s7169_s10 + $0x100] sm:$0xff]  ;;  %v2819_v58 = vld [vmem:[%s7171_s12 + $0xb0] sm:$0xff]  ;;  %v2818_v35 = vld [vmem:[%s7171_s12 + $0xa8] sm:$0xff]  ;;  %v1438_v24 = vsub.f32 %v4647_v8, %v5233_v40 }
 0x469   : > { %2982 = vmatpush.msra.mxu0 %v2865_v23  ;;  %3008 = vmatpush.msrb.mxu1 %v2826_v62  ;;  %v2329_v45 = vld [vmem:[%s7169_s10 + $0xd0] sm:$0xff]  ;;  %v1478_v49 = vmul.f32 %v5288_v1, %v1432_v56  ;;  %v2809_v62 = vld [vmem:[%s7171_s12 + $0x60] sm:$0xff] }
 0x46a   : > { %v2206_v13 = vmin.f32 %v6198_v17, 0.0  ;;  %2661 = vmatmul.f32.vlgmr.msra.gmra.mxu2 %v2284_v6  ;;  %2749 = vmatmul.f32.gmra.mxu0 %v6089_v59  ;;  %v2128_v59 = vadd.f32 %v2127_v0, %v2090_v27  ;;  %v2095_v0 = vpop.f32.mrf.mxu2  ;;  %vm2185_vm8 = vcmp.gt.f32.partialorder %v6198_v17, 0.0  ;;  %v1484_v8 = vmul.f32 %v5288_v1, %v1438_v24  ;;  %v2799_v24 = vld [vmem:[%s7171_s12 + $0x10] sm:$0xff] }
 0x46b   : > { %2983 = vmatpush.msra.mxu0 %v2863_v22  ;;  %2895 = vmatpush.msrb.mxu2 %v2823_v46 }
 0x46c   : > { %v4038_v16 = vpop.eup %4037  ;;  %v2235_v53 = vmul.f32 1.442695, %v2206_v13  ;;  %2688 = vmatpush.msra.mxu3 %v2335_v5 }
 0x46d   : > { %v3881_v36 = vadd.f32 -1.0, %v4038_v16  ;;  %2984 = vmatpush.msra.mxu0 %v2861_v34  ;;  %v1520_v16 = vld [vmem:[%s7165_s6 + $0x28] sm:$0xff]  ;;  %v2133_v34 = vpop.f32.mrf.mxu3 }
 0x46e   : > { %4039 = vpow2.f32 %v2235_v53  ;;  %v2096_v53 = vadd.f32 %v2095_v0, %v6072_v28  ;;  %v2816_v0 = vld [vmem:[%s7171_s12 + $0x98] sm:$0xff] }
 0x46f   : > { %2775 = vmatmul.f32.vlgmr.msra.gmra.mxu1 %v2284_v6  ;;  %v2165_v7 = vpop.f32.mrf.mxu0  ;;  %v2287_v18 = vsel %vm2182_vm7, %v6163_v41, %v3881_v36  ;;  %v2821_v41 = vld [vmem:[%s7171_s12 + $0xc0] sm:$0xff]  ;;  %v2824_v6 = vld [vmem:[%s7171_s12 + $0xd8] sm:$0xff] }
 0x470   : > { %v6232_v50 = vadd.f32 %v2165_v7, %v2128_v59  ;;  %2550 = vmatmul.f32.gmra.mxu3 %v2287_v18  ;;  %2896 = vmatpush.msrb.mxu2 %v2821_v41  ;;  %v2820_v36 = vld [vmem:[%s7171_s12 + $0xb8] sm:$0xff]  ;;  %v2813_v59 = vld [vmem:[%s7171_s12 + $0x80] sm:$0xff]  ;;  %v2134_v41 = vadd.f32 %v2133_v34, %v2096_v53  ;;  %v2308_v34 = vld [vmem:[%s7169_s10 + $0x28] sm:$0xff] }
 0x471   : > { %3009 = vmatpush.msrb.mxu1 %v2824_v6  ;;  %v2807_v6 = vld [vmem:[%s7171_s12 + $0x50] sm:$0xff]  ;;  %v2812_v53 = vld [vmem:[%s7171_s12 + $0x78] sm:$0xff] }
 0x472   : > { %v2209_v57 = vmin.f32 %v6232_v50, 0.0  ;;  %2664 = vmatmul.f32.gmra.mxu2 %v2287_v18  ;;  %2752 = vmatmul.f32.gmra.mxu0 %v6141_v12  ;;  %v2332_v12 = vld [vmem:[%s7169_s10 + $0xe8] sm:$0xff]  ;;  %vm2188_vm10 = vcmp.gt.f32.partialorder %v6232_v50, 0.0  ;;  %v2098_v5 = vpop.f32.mrf.mxu2 }
 0x473   : > { %2897 = vmatpush.msrb.mxu2 %v2819_v58  ;;  %2689 = vmatpush.msra.mxu3 %v2332_v12 }
 0x474   : > { %v4040_v32 = vpop.eup %4039  ;;  %v2241_v19 = vmul.f32 1.442695, %v2209_v57  ;;  %3010 = vmatpush.msrb.mxu1 %v2822_v2  ;;  %v2320_v57 = vld [vmem:[%s7169_s10 + $0x88] sm:$0xff]  ;;  %v2311_v2 = vld [vmem:[%s7169_s10 + $0x40] sm:$0xff] }
 0x475   : > { %v3884_v61 = vadd.f32 -1.0, %v4040_v32  ;;  %2898 = vmatpush.msrb.mxu2 %v2817_v42  ;;  %2690 = vmatpush.msra.mxu3 %v2329_v45  ;;  %v2814_v42 = vld [vmem:[%s7171_s12 + $0x88] sm:$0xff]  ;;  %v2314_v45 = vld [vmem:[%s7169_s10 + $0x58] sm:$0xff] }
 0x476   : > { %4041 = vpow2.f32 %v2241_v19  ;;  %3011 = vmatpush.msrb.mxu1 %v2820_v36  ;;  %v1444_v36 = vsub.f32 %v4657_v26, %v5233_v40 }
 0x477   : > { %2778 = vmatmul.f32.gmra.mxu1 %v2287_v18  ;;  %v2168_v27 = vpop.f32.mrf.mxu0  ;;  %v2290_v13 = vsel %vm2185_vm8, %v6198_v17, %v3884_v61  ;;  %v2326_v17 = vld [vmem:[%s7169_s10 + $0xb8] sm:$0xff]  ;;  %2899 = vmatpush.msrb.mxu2 %v2815_v54  ;;  %v1562_v18 = vmul.f32 %v1520_v16, %v1478_v49  ;;  %v2317_v61 = vld [vmem:[%s7169_s10 + $0x70] sm:$0xff]  ;;  %v2136_v54 = vpop.f32.mrf.mxu3 }
 0x478   : > { %v6271_v23 = vadd.f32 %v2168_v27, %v2131_v21  ;;  %2553 = vmatmul.f32.gmra.mxu3 %v2290_v13  ;;  %3012 = vmatpush.msrb.mxu1 %v2818_v35  ;;  %v2099_v21 = vadd.f32 %v2098_v5, %v6072_v28  ;;  %v2805_v27 = vld [vmem:[%s7171_s12 + $0x40] sm:$0xff]  ;;  %v1490_v26 = vmul.f32 %v5288_v1, %v1444_v36  ;;  %v2798_v36 = vld [vmem:[%s7171_s12 + $0x8] sm:$0xff] }
 0x479   : > { %2691 = vmatpush.msra.mxu3 %v2326_v17  ;;  %2900 = vmatpush.msrb.mxu2 %v2813_v59  ;;  %v6319_v12 = vadd.f32 %v1604_v4, %v1562_v18  ;;  %v1610_v17 = vld [vmem:[%s7166_s7 + $0x58] sm:$0xff]  ;;  %v2803_v59 = vld [vmem:[%s7171_s12 + $0x30] sm:$0xff] }
 0x47a   : > { %v2212_v22 = vmin.f32 %v6271_v23, 0.0  ;;  %2667 = vmatmul.f32.gmra.mxu2 %v2290_v13  ;;  %2755 = vmatmul.f32.gmra.mxu0 %v6173_v44  ;;  %v2811_v44 = vld [vmem:[%s7171_s12 + $0x70] sm:$0xff]  ;;  %vm2191_vm11 = vcmp.gt.f32.partialorder %v6271_v23, 0.0 }
 0x47b   : > { %2692 = vmatpush.msra.mxu3 %v2323_v25  ;;  %2901 = vmatpush.msrb.mxu2 %v2811_v44  ;;  %v2810_v44 = vld [vmem:[%s7171_s12 + $0x68] sm:$0xff]  ;;  %v2305_v4 = vld [vmem:[%s7169_s10 + $0x10] sm:$0xff] }
 0x47c   : > { %v4042_v46 = vpop.eup %4041  ;;  %v2247_v7 = vmul.f32 1.442695, %v2212_v22  ;;  %3013 = vmatpush.msrb.mxu1 %v2816_v0  ;;  %v2137_v22 = vadd.f32 %v2136_v54, %v2099_v21  ;;  %v2806_v0 = vld [vmem:[%s7171_s12 + $0x48] sm:$0xff]  ;;  %v1456_v54 = vsub.f32 %v4679_v55, %v5233_v40  ;;  %v1518_v55 = vld [vmem:[%s7165_s6 + $0x18] sm:$0xff] }
 0x47d   : > { %v3887_v38 = vadd.f32 -1.0, %v4042_v46  ;;  %2693 = vmatpush.msra.mxu3 %v2320_v57  ;;  %2902 = vmatpush.msrb.mxu2 %v2809_v62 }
 0x47e   : > { %4043 = vpow2.f32 %v2247_v7  ;;  %3014 = vmatpush.msrb.mxu1 %v2814_v42  ;;  %v2804_v42 = vld [vmem:[%s7171_s12 + $0x38] sm:$0xff] }
 0x47f   : > { %2781 = vmatmul.f32.gmra.mxu1 %v2290_v13  ;;  %v2171_v58 = vpop.f32.mrf.mxu0  ;;  %v2293_v32 = vsel %vm2188_vm10, %v6232_v50, %v3887_v38  ;;  %v1526_v50 = vld [vmem:[%s7165_s6 + $0x58] sm:$0xff]  ;;  %2694 = vmatpush.msra.mxu3 %v2317_v61  ;;  %v2801_v38 = vld [vmem:[%s7171_s12 + $0x20] sm:$0xff]  ;;  %v1450_v61 = vsub.f32 %v4669_v33, %v5233_v40 }
 0x480   : > { %v6317_v19 = vadd.f32 %v2171_v58, %v2134_v41  ;;  %2556 = vmatmul.f32.gmra.mxu3 %v2293_v32  ;;  %v1568_v49 = vmul.f32 %v1526_v50, %v1484_v8  ;;  %2903 = vmatpush.msrb.mxu2 %v2807_v6  ;;  %v2808_v41 = vld [vmem:[%s7171_s12 + $0x58] sm:$0xff]  ;;  %v2797_v58 = vld [vmem:[%s7171_s12] sm:$0xff]  ;;  %v1616_v8 = vld [vmem:[%s7166_s7 + $0x88] sm:$0xff]  ;;  %v6399_v50 = vpop.f32.mrf.mxu1 }
 0x481   : > { %2695 = vmatpush.msra.mxu3 %v2314_v45  ;;  %3015 = vmatpush.msrb.mxu1 %v2812_v53  ;;  %v1538_v33 = vld [vmem:[%s7165_s6 + $0xb8] sm:$0xff] }
 0x482   : > { %v2215_v56 = vmin.f32 %v6317_v19, 0.0  ;;  %2670 = vmatmul.f32.gmra.mxu2 %v2293_v32  ;;  %2985 = vmatmul.f32.vlgmr.msra.gmra.mxu0 %v6319_v12  ;;  %v6365_v18 = vadd.f32 %v1610_v17, %v1568_v49  ;;  %vm2194_vm12 = vcmp.gt.f32.partialorder %v6317_v19, 0.0  ;;  %v2800_v49 = vld [vmem:[%s7171_s12 + $0x18] sm:$0xff] }
 0x483   : > { %2904 = vmatpush.msrb.mxu2 %v2805_v27  ;;  %2696 = vmatpush.msra.mxu3 %v2311_v2  ;;  %v1430_v2 = vsub.f32 %v4534_v29, %v5233_v40  ;;  %v2859_v29 = vld [vmem:[%s7171_s12 + $0x1f0] sm:$0xff] }
 0x484   : > { %v4044_v28 = vpop.eup %4043  ;;  %v2253_v13 = vmul.f32 1.442695, %v2215_v56  ;;  %3016 = vmatpush.msrb.mxu1 %v2810_v44  ;;  %v1496_v56 = vmul.f32 %v5288_v1, %v1450_v61  ;;  %v1436_v44 = vsub.f32 %v4562_v43, %v5233_v40  ;;  %v2858_v43 = vld [vmem:[%s7171_s12 + $0x1e8] sm:$0xff] }
 0x485   : > { %v3890_v16 = vadd.f32 -1.0, %v4044_v28  ;;  %2905 = vmatpush.msrb.mxu2 %v2803_v59  ;;  %2697 = vmatpush.msra.mxu3 %v2308_v34  ;;  %v1476_v53 = vmul.f32 %v5288_v1, %v1430_v2  ;;  %v1544_v34 = vld [vmem:[%s7165_s6 + $0xe8] sm:$0xff] }
 0x486   : > { %4045 = vpow2.f32 %v2253_v13  ;;  %3017 = vmatpush.msrb.mxu1 %v2808_v41  ;;  %v1580_v27 = vmul.f32 %v1538_v33, %v1496_v56  ;;  %v1622_v13 = vld [vmem:[%s7166_s7 + $0xb8] sm:$0xff]  ;;  %v2855_v41 = vld [vmem:[%s7171_s12 + $0x1d0] sm:$0xff]  ;;  %v2854_v61 = vld [vmem:[%s7171_s12 + $0x1c8] sm:$0xff] }
 0x487   : > { %2784 = vmatmul.f32.gmra.mxu1 %v2293_v32  ;;  %v2174_v25 = vpop.f32.mrf.mxu0  ;;  %v2296_v46 = vsel %vm2191_vm11, %v6271_v23, %v3890_v16  ;;  %v1532_v23 = vld [vmem:[%s7165_s6 + $0x88] sm:$0xff]  ;;  %2906 = vmatpush.msrb.mxu2 %v2801_v38  ;;  %v2857_v38 = vld [vmem:[%s7171_s12 + $0x1e0] sm:$0xff] }
 0x488   : > { %v2175_v7 = vadd.f32 %v2174_v25, %v2137_v22  ;;  %2559 = vmatmul.f32.gmra.mxu3 %v2296_v46  ;;  %v1574_v5 = vmul.f32 %v1532_v23, %v1490_v26  ;;  %3018 = vmatpush.msrb.mxu1 %v2806_v0  ;;  %v6425_v17 = vadd.f32 %v1622_v13, %v1580_v27  ;;  %v6435_v59 = vpop.f32.mrf.mxu1  ;;  %v1628_v26 = vld [vmem:[%s7166_s7 + $0xe8] sm:$0xff]  ;;  %v2860_v23 = vld [vmem:[%s7171_s12 + $0x1f8] sm:$0xff]  ;;  %v2851_v0 = vld [vmem:[%s7171_s12 + $0x1b0] sm:$0xff] }
 0x489   : > { %2698 = vmatpush.msra.mxu3 %v2305_v4  ;;  %2907 = vmatpush.msrb.mxu2 %v2799_v24  ;;  %v1502_v22 = vmul.f32 %v5288_v1, %v1456_v54  ;;  %v1560_v25 = vmul.f32 %v1518_v55, %v1476_v53  ;;  %v7205_v4 = vld [vmem:[#allocation11_spill] sm:$0xff]  ;;  %v1482_v24 = vmul.f32 %v5288_v1, %v1436_v44  ;;  %v2852_v13 = vld [vmem:[%s7171_s12 + $0x1b8] sm:$0xff]  ;;  %v2847_v54 = vld [vmem:[%s7171_s12 + $0x190] sm:$0xff] }
 0x48a   : > { %v2218_v35 = vmin.f32 %v2175_v7, 0.0  ;;  %2673 = vmatmul.f32.gmra.mxu2 %v2296_v46  ;;  %2988 = vmatmul.f32.gmra.mxu0 %v6365_v18  ;;  %v6402_v21 = vadd.f32 %v1616_v8, %v1574_v5  ;;  %vm2197_vm13 = vcmp.gt.f32.partialorder %v2175_v7, 0.0  ;;  %v1524_v8 = vld [vmem:[%s7165_s6 + $0x48] sm:$0xff]  ;;  %v2845_v55 = vld [vmem:[%s7171_s12 + $0x180] sm:$0xff] }
 0x48b   : > { %2908 = vmatpush.msrb.mxu2 %v2797_v58  ;;  %3019 = vmatpush.msrb.mxu1 %v2804_v42  ;;  %v2853_v58 = vld [vmem:[%s7171_s12 + $0x1c0] sm:$0xff]  ;;  %v1566_v56 = vmul.f32 %v1524_v8, %v1482_v24  ;;  %v1608_v42 = vld [vmem:[%s7166_s7 + $0x48] sm:$0xff]  ;;  %v2844_v24 = vld [vmem:[%s7171_s12 + $0x178] sm:$0xff] }
 0x48c   : > { %v4046_v57 = vpop.eup %4045  ;;  %v2259_v62 = vmul.f32 1.442695, %v2218_v35  ;;  %2931 = vmatpush.msrb.mxu3 %v2859_v29  ;;  %v1462_v35 = vsub.f32 %v7205_v4, %v5233_v40  ;;  %v2850_v29 = vld [vmem:[%s7171_s12 + $0x1a8] sm:$0xff] }
 0x48d   : > { %v3893_v32 = vadd.f32 -1.0, %v4046_v57  ;;  %3045 = vmatpush.msra.mxu2 %v2860_v23  ;;  %v1650_v53 = vadd.f32 %v1608_v42, %v1566_v56  ;;  %v2846_v44 = vld [vmem:[%s7171_s12 + $0x188] sm:$0xff]  ;;  %v1614_v23 = vld [vmem:[%s7166_s7 + $0x78] sm:$0xff] }
 0x48e   : > { %4047 = vpow2.f32 %v2259_v62  ;;  %2932 = vmatpush.msrb.mxu3 %v2857_v38  ;;  %v1508_v5 = vmul.f32 %v5288_v1, %v1462_v35  ;;  %v1640_v4 = vld [vmem:[%s7166_s7 + $0x148] sm:$0xff]  ;;  %v7208_v35 = vld [vmem:[#allocation10_spill] sm:$0xff] }
 0x48f   : > { %2787 = vmatmul.f32.gmra.mxu1 %v2296_v46  ;;  %v2299_v6 = vsel %vm2194_vm12, %v6317_v19, %v3893_v32  ;;  %v2802_v19 = vld [vmem:[%s7171_s12 + $0x28] sm:$0xff]  ;;  %v1602_v46 = vld [vmem:[%s7166_s7 + $0x18] sm:$0xff]  ;;  %3046 = vmatpush.msra.mxu2 %v2858_v43  ;;  %v2841_v43 = vld [vmem:[%s7171_s12 + $0x160] sm:$0xff] }
 0x490   : > { %2562 = vmatmul.f32.gmra.mxu3 %v2299_v6  ;;  %3020 = vmatpush.msrb.mxu1 %v2802_v19  ;;  %v1644_v57 = vadd.f32 %v1602_v46, %v1560_v25  ;;  %v2856_v32 = vld [vmem:[%s7171_s12 + $0x1d8] sm:$0xff]  ;;  %v2843_v46 = vld [vmem:[%s7171_s12 + $0x170] sm:$0xff]  ;;  %v1536_v8 = vld [vmem:[%s7165_s6 + $0xa8] sm:$0xff] }
 0x491   : > { %2933 = vmatpush.msrb.mxu3 %v2855_v41  ;;  %3047 = vmatpush.msra.mxu2 %v2856_v32  ;;  %v1634_v19 = vld [vmem:[%s7166_s7 + $0x118] sm:$0xff]  ;;  %v1448_v41 = vsub.f32 %v7208_v35, %v5233_v40  ;;  %v2842_v32 = vld [vmem:[%s7171_s12 + $0x168] sm:$0xff] }
 0x492   : > { %2676 = vmatmul.f32.gmra.mxu2 %v2299_v6  ;;  %2991 = vmatmul.f32.gmra.mxu0 %v6402_v21  ;;  %v2848_v25 = vld [vmem:[%s7171_s12 + $0x198] sm:$0xff]  ;;  %v1620_v56 = vld [vmem:[%s7166_s7 + $0xa8] sm:$0xff] }
 0x493   : > { %3021 = vmatpush.msrb.mxu1 %v2800_v49  ;;  %2934 = vmatpush.msrb.mxu3 %v2853_v58  ;;  %v7207_v49 = vld [vmem:[#allocation12_spill] sm:$0xff]  ;;  %v1494_v58 = vmul.f32 %v5288_v1, %v1448_v41 }
 0x494   : > { %v4048_v45 = vpop.eup %4047  ;;  %3048 = vmatpush.msra.mxu2 %v2854_v61  ;;  %v1468_v2 = vsub.f32 %v7207_v49, %v5233_v40  ;;  %v2838_v42 = vld [vmem:[%s7171_s12 + $0x148] sm:$0xff]  ;;  %v2829_v49 = vld [vmem:[%s7171_s12 + $0x100] sm:$0xff] }
 0x495   : > { %v3896_v28 = vadd.f32 -1.0, %v4048_v45  ;;  %3022 = vmatpush.msrb.mxu1 %v2798_v36  ;;  %v7206_v45 = vld [vmem:[#allocation9_spill] sm:$0xff]  ;;  %2935 = vmatpush.msrb.mxu3 %v2851_v0 }
 0x496   : > { %v1442_v27 = vsub.f32 %v7206_v45, %v5233_v40  ;;  %v1514_v36 = vmul.f32 %v5288_v1, %v1468_v2  ;;  %3049 = vmatpush.msra.mxu2 %v2852_v13  ;;  %v2839_v40 = vld [vmem:[%s7171_s12 + $0x150] sm:$0xff]  ;;  %v1542_v13 = vld [vmem:[%s7165_s6 + $0xd8] sm:$0xff] }
 0x497   : > { %2790 = vmatmul.f32.gmra.mxu1 %v2299_v6  ;;  %v2302_v16 = vsel %vm2197_vm13, %v2175_v7, %v3896_v28  ;;  %v1586_v7 = vmul.f32 %v1544_v34, %v1502_v22  ;;  %v6490_v6 = vpop.f32.mrf.mxu1  ;;  %v2849_v28 = vld [vmem:[%s7171_s12 + $0x1a0] sm:$0xff]  ;;  %v1530_v34 = vld [vmem:[%s7165_s6 + $0x78] sm:$0xff]  ;;  %v2835_v0 = vld [vmem:[%s7171_s12 + $0x130] sm:$0xff]  ;;  %v1584_v2 = vmul.f32 %v1542_v13, %v5344_v10 }
 0x498   : > { %2565 = vmatmul.f32.gmra.mxu3 %v2302_v16  ;;  %3050 = vmatpush.msra.mxu2 %v2850_v29  ;;  %v6700_v13 = vld [vmem:[%s7170_s11] sm:$0x7] }
 0x499   : > { %v6468_v62 = vadd.f32 %v1628_v26, %v1586_v7  ;;  %2936 = vmatpush.msrb.mxu3 %v2849_v28  ;;  %v2831_v28 = vld [vmem:[%s7171_s12 + $0x110] sm:$0xff] }
 0x49a   : > { %2679 = vmatmul.f32.gmra.mxu2 %v2302_v16  ;;  %2994 = vmatmul.f32.gmra.mxu0 %v6425_v17 }
 0x49b   : > { %2937 = vmatpush.msrb.mxu3 %v2847_v54  ;;  %3051 = vmatpush.msra.mxu2 %v2848_v25  ;;  %v2832_v54 = vld [vmem:[%s7171_s12 + $0x118] sm:$0xff] }
 0x49d   : > { %2938 = vmatpush.msrb.mxu3 %v2845_v55  ;;  %3052 = vmatpush.msra.mxu2 %v2846_v44  ;;  %v1548_v55 = vld [vmem:[%s7165_s6 + $0x108] sm:$0xff] }
 0x49f   : > { %2793 = vmatmul.f32.gmra.mxu1 %v2302_v16  ;;  %v1488_v16 = vmul.f32 %v5288_v1, %v1442_v27  ;;  %v6538_v38 = vpop.f32.mrf.mxu1  ;;  %2939 = vmatpush.msrb.mxu3 %v2843_v46  ;;  %v2837_v1 = vld [vmem:[%s7171_s12 + $0x140] sm:$0xff]  ;;  %v2836_v27 = vld [vmem:[%s7171_s12 + $0x138] sm:$0xff]  ;;  %v1632_v46 = vld [vmem:[%s7166_s7 + $0x108] sm:$0xff] }
 0x4a0   : > { %2699 = vmatmul.f32.vlgmr.msra.gmra.mxu3 %v5735_v60  ;;  %v1550_v60 = vld [vmem:[%s7165_s6 + $0x118] sm:$0xff]  ;;  %3053 = vmatpush.msra.mxu2 %v2844_v24  ;;  %v2890_v24 = vld [vmem:[%s7171_s12 + $0x2e8] sm:$0xff] }
 0x4a1   : > { %v1592_v33 = vmul.f32 %v1550_v60, %v1508_v5  ;;  %v1572_v7 = vmul.f32 %v1530_v34, %v1488_v16  ;;  %2940 = vmatpush.msrb.mxu3 %v2841_v43  ;;  %v1578_v60 = vmul.f32 %v1536_v8, %v1494_v58  ;;  %v1590_v34 = vmul.f32 %v1548_v55, %v5360_v11  ;;  %v1603_v43 = vld [vmem:[%s7166_s7 + $0x20] sm:$0xff]  ;;  %v2884_v8 = vld [vmem:[%s7171_s12 + $0x2b8] sm:$0xff] }
 0x4a2   : > { %2909 = vmatmul.f32.vlgmr.msrb.gmra.mxu2 %v1644_v57  ;;  %2997 = vmatmul.f32.gmra.mxu0 %v6468_v62 }
 0x4a3   : > { %v6513_v22 = vadd.f32 %v1634_v19, %v1592_v33  ;;  %2941 = vmatpush.msrb.mxu3 %v2839_v40  ;;  %3054 = vmatpush.msra.mxu2 %v2842_v32  ;;  %v2833_v33 = vld [vmem:[%s7171_s12 + $0x120] sm:$0xff]  ;;  %v1662_v45 = vadd.f32 %v1620_v56, %v1578_v60  ;;  %v2886_v32 = vld [vmem:[%s7171_s12 + $0x2c8] sm:$0xff]  ;;  %v1609_v60 = vld [vmem:[%s7166_s7 + $0x50] sm:$0xff] }
 0x4a5   : > { %2942 = vmatpush.msrb.mxu3 %v2837_v1 }
 0x4a7   : > { %3023 = vmatmul.f32.vlgmr.msrb.gmra.mxu1 %v1644_v57  ;;  %v1656_v57 = vadd.f32 %v1614_v23, %v1572_v7  ;;  %v6588_v19 = vpop.f32.mrf.mxu1  ;;  %2943 = vmatpush.msrb.mxu3 %v2835_v0  ;;  %v1554_v7 = vld [vmem:[%s7165_s6 + $0x138] sm:$0xff]  ;;  %v2882_v0 = vld [vmem:[%s7171_s12 + $0x2a8] sm:$0xff] }
 0x4a8   : > { %2702 = vmatmul.f32.gmra.mxu3 %v5760_v47  ;;  %v1556_v47 = vld [vmem:[%s7165_s6 + $0x148] sm:$0xff]  ;;  %v1596_v11 = vmul.f32 %v1554_v7, %v5363_v39  ;;  %v1638_v23 = vld [vmem:[%s7166_s7 + $0x138] sm:$0xff] }
 0x4a9   : > { %v1598_v26 = vmul.f32 %v1556_v47, %v1514_v36  ;;  %2944 = vmatpush.msrb.mxu3 %v2833_v33  ;;  %v2830_v36 = vld [vmem:[%s7171_s12 + $0x108] sm:$0xff]  ;;  %v6625_v47 = vpop.f32.mrf.mxu0  ;;  %v2892_v39 = vld [vmem:[%s7171_s12 + $0x2f8] sm:$0xff] }
 0x4aa   : > { %2912 = vmatmul.f32.gmra.mxu2 %v1650_v53  ;;  %3000 = vmatmul.f32.gmra.mxu0 %v6513_v22  ;;  %v1680_v35 = vadd.f32 %v1638_v23, %v1596_v11  ;;  %v2868_v7 = vld [vmem:[%s7171_s12 + $0x238] sm:$0xff] }
 0x4ab   : > { %v6555_v5 = vadd.f32 %v1640_v4, %v1598_v26  ;;  %2945 = vmatpush.msrb.mxu3 %v2831_v28  ;;  %v2876_v28 = vld [vmem:[%s7171_s12 + $0x278] sm:$0xff] }
 0x4ad   : > { %2946 = vmatpush.msrb.mxu3 %v2829_v49 }
 0x4af   : > { %3026 = vmatmul.f32.gmra.mxu1 %v1650_v53  ;;  %v1626_v53 = vld [vmem:[%s7166_s7 + $0xd8] sm:$0xff]  ;;  %v6619_v29 = vpop.f32.mrf.mxu1  ;;  %3083 = vmatpush.msra.mxu3 %v2892_v39 }
 0x4b0   : > { %2705 = vmatmul.f32.gmra.mxu3 %v5767_v20  ;;  %v2840_v20 = vld [vmem:[%s7171_s12 + $0x158] sm:$0xff]  ;;  %v1668_v10 = vadd.f32 %v1626_v53, %v1584_v2  ;;  %v1615_v2 = vld [vmem:[%s7166_s7 + $0x80] sm:$0xff]  ;;  %v2874_v53 = vld [vmem:[%s7171_s12 + $0x268] sm:$0xff] }
 0x4b1   : > { %3055 = vmatpush.msra.mxu2 %v2840_v20  ;;  %v6644_v4 = vpop.f32.mrf.mxu0  ;;  %3084 = vmatpush.msra.mxu3 %v2890_v24  ;;  %v2866_v24 = vld [vmem:[%s7171_s12 + $0x228] sm:$0xff] }
 0x4b2   : > { %2915 = vmatmul.f32.gmra.mxu2 %v1656_v57  ;;  %3003 = vmatmul.f32.gmra.mxu0 %v6555_v5 }
 0x4b3   : > { %3056 = vmatpush.msra.mxu2 %v2838_v42  ;;  %v2880_v42 = vld [vmem:[%s7171_s12 + $0x298] sm:$0xff] }
 0x4b5   : > { %v6577_v61 = vpop.f32.mrf.mxu2  ;;  %3057 = vmatpush.msra.mxu2 %v2836_v27  ;;  %v2878_v27 = vld [vmem:[%s7171_s12 + $0x288] sm:$0xff] }
 0x4b7   : > { %3029 = vmatmul.f32.gmra.mxu1 %v1656_v57  ;;  %v6636_v26 = vpop.f32.mrf.mxu1 }
 0x4b8   : > { %2708 = vmatmul.f32.gmra.mxu3 %v5810_v15  ;;  %v2834_v15 = vld [vmem:[%s7171_s12 + $0x128] sm:$0xff] }
 0x4b9   : > { %3058 = vmatpush.msra.mxu2 %v2834_v15  ;;  %v6674_v1 = vpop.f32.mrf.mxu0 }
 0x4ba   : > { %2918 = vmatmul.f32.gmra.mxu2 %v1662_v45 }
 0x4bb   : > { %3059 = vmatpush.msra.mxu2 %v2832_v54  ;;  %v6709_v54 = vperm.slane %v6700_v13, 0 }
 0x4bd   : > { %v6610_v16 = vpop.f32.mrf.mxu2  ;;  %3060 = vmatpush.msra.mxu2 %v2830_v36 }
 0x4bf   : > { %3032 = vmatmul.f32.gmra.mxu1 %v1662_v45  ;;  %v2624_v57 = vpop.f32.mrf.mxu1 }
 0x4c0   : > { %2711 = vmatmul.f32.gmra.mxu3 %v5858_v31  ;;  %v1674_v31 = vadd.f32 %v1632_v46, %v1590_v34  ;;  %v1537_v34 = vld [vmem:[%s7165_s6 + $0xb0] sm:$0xff]  ;;  %v2870_v46 = vld [vmem:[%s7171_s12 + $0x248] sm:$0xff] }
 0x4c1   : > { %v6703_v49 = vpop.f32.mrf.mxu0 }
 0x4c2   : > { %2921 = vmatmul.f32.gmra.mxu2 %v1668_v10 }
 0x4c5   : > { %v6627_v25 = vpop.f32.mrf.mxu2 }
 0x4c7   : > { %3035 = vmatmul.f32.gmra.mxu1 %v1668_v10  ;;  %v2627_v45 = vpop.f32.mrf.mxu1  ;;  %v6720_v10 = vperm.slane %v6700_v13, 1 }
 0x4c8   : > { %2714 = vmatmul.f32.gmra.mxu3 %v5895_v30  ;;  %v1519_v30 = vld [vmem:[%s7165_s6 + $0x20] sm:$0xff] }
 0x4c9   : > { %v1561_v41 = vmul.f32 %v1519_v30, %v5366_v9  ;;  %v1525_v9 = vld [vmem:[%s7165_s6 + $0x50] sm:$0xff]  ;;  %v2587_v23 = vadd.f32 %v6625_v47, %v6720_v10 }
 0x4ca   : > { %2924 = vmatmul.f32.gmra.mxu2 %v1674_v31  ;;  %v1567_v20 = vmul.f32 %v1525_v9, %v5403_v48  ;;  %v1531_v48 = vld [vmem:[%s7165_s6 + $0x80] sm:$0xff]  ;;  %v2862_v9 = vld [vmem:[%s7171_s12 + $0x208] sm:$0xff] }
 0x4cb   : > { %v1645_v40 = vadd.f32 %v1603_v43, %v1561_v41  ;;  %v1573_v15 = vmul.f32 %v1531_v48, %v5406_v51  ;;  %v2872_v51 = vld [vmem:[%s7171_s12 + $0x258] sm:$0xff]  ;;  %v2625_v41 = vadd.f32 %v2624_v57, %v2587_v23  ;;  %v1543_v57 = vld [vmem:[%s7165_s6 + $0xe0] sm:$0xff]  ;;  %v2596_v23 = vadd.f32 %v6703_v49, %v6720_v10 }
 0x4cc   : > { %v1651_v33 = vadd.f32 %v1609_v60, %v1567_v20  ;;  %v1585_v60 = vmul.f32 %v1543_v57, %v5440_v37  ;;  %v1549_v37 = vld [vmem:[%s7165_s6 + $0x110] sm:$0xff] }
 0x4cd   : > { %v6639_v44 = vpop.f32.mrf.mxu2  ;;  %v1657_v55 = vadd.f32 %v1615_v2, %v1573_v15 }
 0x4cf   : > { %3038 = vmatmul.f32.gmra.mxu1 %v1674_v31  ;;  %v2473_v31 = vadd.f32 %v6399_v50, %v6709_v54  ;;  %v2630_v11 = vpop.f32.mrf.mxu1  ;;  %v1621_v50 = vld [vmem:[%s7166_s7 + $0xb0] sm:$0xff] }
 0x4d0   : > { %2717 = vmatmul.f32.gmra.mxu3 %v5915_v3  ;;  %v2888_v3 = vld [vmem:[%s7171_s12 + $0x2d8] sm:$0xff] }
 0x4d1   : > { %3085 = vmatpush.msra.mxu3 %v2888_v3  ;;  %v2511_v30 = vadd.f32 %v6577_v61, %v2473_v31  ;;  %v6745_v3 = vpop.f32.mrf.mxu0 }
 0x4d2   : > { %2927 = vmatmul.f32.gmra.mxu2 %v1680_v35 }
 0x4d3   : > { %3086 = vmatpush.msra.mxu3 %v2886_v32  ;;  %v2476_v32 = vadd.f32 %v6435_v59, %v6709_v54 }
 0x4d5   : > { %v6660_v58 = vpop.f32.mrf.mxu2  ;;  %3087 = vmatpush.msra.mxu3 %v2884_v8  ;;  %v2590_v8 = vadd.f32 %v6644_v4, %v6720_v10  ;;  %v2514_v20 = vadd.f32 %v6610_v16, %v2476_v32  ;;  %v2479_v16 = vadd.f32 %v6490_v6, %v6709_v54 }
 0x4d7   : > { %3041 = vmatmul.f32.gmra.mxu1 %v1680_v35  ;;  %3088 = vmatpush.msra.mxu3 %v2882_v0  ;;  %v1579_v35 = vmul.f32 %v1537_v34, %v5428_v52  ;;  %v2633_v0 = vpop.f32.mrf.mxu1  ;;  %v2628_v48 = vadd.f32 %v2627_v45, %v2590_v8  ;;  %v2593_v45 = vadd.f32 %v6674_v1, %v6720_v10 }
 0x4d8   : > { %2947 = vmatmul.f32.vlgmr.msrb.gmra.mxu3 %v1645_v40  ;;  %v2517_v2 = vadd.f32 %v6627_v25, %v2479_v16  ;;  %v1555_v25 = vld [vmem:[%s7165_s6 + $0x140] sm:$0xff] }
 0x4d9   : > { %3089 = vmatpush.msra.mxu3 %v2880_v42  ;;  %v1663_v61 = vadd.f32 %v1621_v50, %v1579_v35  ;;  %v2601_v15 = vpop.f32.mrf.mxu0  ;;  %v2631_v34 = vadd.f32 %v2630_v11, %v2593_v45  ;;  %v1597_v35 = vmul.f32 %v1555_v25, %v5446_v14  ;;  %v1639_v50 = vld [vmem:[%s7166_s7 + $0x140] sm:$0xff]  ;;  %v2599_v14 = vadd.f32 %v6745_v3, %v6720_v10 }
 0x4da   : > { %3061 = vmatmul.f32.vlgmr.msra.gmra.mxu2 %v1645_v40  ;;  %v2864_v40 = vld [vmem:[%s7171_s12 + $0x218] sm:$0xff] }
 0x4db   : > { %3090 = vmatpush.msra.mxu3 %v2878_v27 }
 0x4dd   : > { %v6683_v56 = vpop.f32.mrf.mxu2  ;;  %3091 = vmatpush.msra.mxu3 %v2876_v28 }
 0x4df   : > { %3092 = vmatpush.msra.mxu3 %v2874_v53  ;;  %v1591_v53 = vmul.f32 %v1549_v37, %v5443_v63  ;;  %v2636_v6 = vpop.f32.mrf.mxu1  ;;  %v2482_v63 = vadd.f32 %v6538_v38, %v6709_v54 }
 0x4e0   : > { %2950 = vmatmul.f32.gmra.mxu3 %v1651_v33  ;;  %v2637_v32 = vadd.f32 %v2636_v6, %v2599_v14 }
 0x4e1   : > { %3093 = vmatpush.msra.mxu3 %v2872_v51  ;;  %v2604_v11 = vpop.f32.mrf.mxu0 }
 0x4e2   : > { %3064 = vmatmul.f32.gmra.mxu2 %v1651_v33  ;;  %v1627_v33 = vld [vmem:[%s7166_s7 + $0xe0] sm:$0xff] }
 0x4e3   : > { %3094 = vmatpush.msra.mxu3 %v2870_v46  ;;  %v1669_v4 = vadd.f32 %v1627_v33, %v1585_v60 }
 0x4e5   : > { %v6714_v36 = vpop.f32.mrf.mxu2  ;;  %3095 = vmatpush.msra.mxu3 %v2868_v7 }
 0x4e7   : > { %3096 = vmatpush.msra.mxu3 %v2866_v24  ;;  %v2639_v49 = vpop.f32.mrf.mxu1 }
 0x4e8   : > { %2953 = vmatmul.f32.gmra.mxu3 %v1657_v55 }
 0x4e9   : > { %3097 = vmatpush.msra.mxu3 %v2864_v40  ;;  %v2738_v57 = vpop.f32.mrf.mxu0 }
 0x4ea   : > { %3067 = vmatmul.f32.gmra.mxu2 %v1657_v55  ;;  %v1633_v55 = vld [vmem:[%s7166_s7 + $0x110] sm:$0xff] }
 0x4eb   : > { %v2548_v39 = vpop.f32.mrf.mxu3  ;;  %3098 = vmatpush.msra.mxu3 %v2862_v9  ;;  %v1675_v1 = vadd.f32 %v1633_v55, %v1591_v53 }
 0x4ec   : > { %v6740_v43 = vadd.f32 %v2548_v39, %v2511_v30  ;;  %v2520_v30 = vadd.f32 %v6639_v44, %v2482_v63  ;;  %v2485_v44 = vadd.f32 %v6588_v19, %v6709_v54  ;;  %v2488_v19 = vadd.f32 %v6619_v29, %v6709_v54 }
 0x4ed   : > { %v2662_v47 = vpop.f32.mrf.mxu2  ;;  %v2605_v29 = vadd.f32 %v2604_v11, %v6720_v10 }
 0x4ee   : > { %3121 = vmax.xlane.f32.xlu1 %v6740_v43  ;;  %v6748_v52 = vadd.f32 %v2662_v47, %v2625_v41  ;;  %v2634_v41 = vadd.f32 %v2633_v0, %v2596_v23  ;;  %v2523_v40 = vadd.f32 %v6660_v58, %v2485_v44  ;;  %v2602_v58 = vadd.f32 %v2601_v15, %v6720_v10 }
 0x4ef   : > { %v2642_v3 = vpop.f32.mrf.mxu1  ;;  %v2526_v0 = vadd.f32 %v6683_v56, %v2488_v19 }
 0x4f0   : > { %3184 = vmax.xlane.f32.xlu2 %v6748_v52  ;;  %2956 = vmatmul.f32.gmra.mxu3 %v1663_v61  ;;  %v2640_v33 = vadd.f32 %v2639_v49, %v2602_v58  ;;  %v2643_v16 = vadd.f32 %v2642_v3, %v2605_v29 }
 0x4f2   : > { %3070 = vmatmul.f32.gmra.mxu2 %v1663_v61  ;;  %v1681_v61 = vadd.f32 %v1639_v50, %v1597_v35 }
 0x4f3   : > { %v2551_v42 = vpop.f32.mrf.mxu3 }
 0x4f4   : > { %v6769_v59 = vadd.f32 %v2551_v42, %v2514_v20 }
 0x4f5   : > { %v2665_v27 = vpop.f32.mrf.mxu2 }
 0x4f6   : > { %3123 = vmax.xlane.f32.xlu1 %v6769_v59  ;;  %v6772_v28 = vadd.f32 %v2665_v27, %v2628_v48  ;;  %v2741_v27 = vpop.f32.mrf.mxu0 }
 0x4f7   : > { %v2776_v56 = vpop.f32.mrf.mxu1 }
 0x4f8   : > { %3186 = vmax.xlane.f32.xlu2 %v6772_v28  ;;  %2959 = vmatmul.f32.gmra.mxu3 %v1669_v4 }
 0x4fa   : > { %3073 = vmatmul.f32.gmra.mxu2 %v1669_v4 }
 0x4fb   : > { %v2554_v51 = vpop.f32.mrf.mxu3 }
 0x4fc   : > { %v6787_v46 = vadd.f32 %v2554_v51, %v2517_v2 }
 0x4fd   : > { %v2668_v31 = vpop.f32.mrf.mxu2 }
 0x4fe   : > { %3125 = vmax.xlane.f32.xlu1 %v6787_v46  ;;  %v6790_v7 = vadd.f32 %v2668_v31, %v2631_v34  ;;  %v2744_v55 = vpop.f32.mrf.mxu0 }
 0x4ff   : > { %v2779_v10 = vpop.f32.mrf.mxu1 }
 0x500   : > { %3188 = vmax.xlane.f32.xlu2 %v6790_v7  ;;  %2962 = vmatmul.f32.gmra.mxu3 %v1675_v1 }
 0x502   : > { %3076 = vmatmul.f32.gmra.mxu2 %v1675_v1 }
 0x503   : > { %v2557_v39 = vpop.f32.mrf.mxu3 }
 0x504   : > { %v6805_v24 = vadd.f32 %v2557_v39, %v2520_v30 }
 0x505   : > { %v2671_v38 = vpop.f32.mrf.mxu2 }
 0x506   : > { %3127 = vmax.xlane.f32.xlu1 %v6805_v24  ;;  %v6808_v47 = vadd.f32 %v2671_v38, %v2634_v41 }
 0x507   : > { %v2782_v63 = vpop.f32.mrf.mxu1 }
 0x508   : > { %3190 = vmax.xlane.f32.xlu2 %v6808_v47  ;;  %2965 = vmatmul.f32.gmra.mxu3 %v1681_v61 }
 0x50a   : > { %3079 = vmatmul.f32.gmra.mxu2 %v1681_v61 }
 0x50b   : > { %v2560_v9 = vpop.f32.mrf.mxu3 }
 0x50c   : > { %v6816_v8 = vadd.f32 %v2560_v9, %v2523_v40 }
 0x50d   : > { %v2674_v20 = vpop.f32.mrf.mxu2 }
 0x50e   : > { %v6818_v60 = vadd.f32 %v2674_v20, %v2637_v32  ;;  %3129 = vmax.xlane.f32.xlu1 %v6816_v8 }
 0x50f   : > { %v2785_v39 = vpop.f32.mrf.mxu1 }
 0x510   : > { %3192 = vmax.xlane.f32.xlu2 %v6818_v60  ;;  %3099 = vmatmul.f32.vlgmr.msra.gmra.mxu3 %v6319_v12  ;;  %v2491_v12 = vadd.f32 %v6636_v26, %v6709_v54 }
 0x512   : > { %v2529_v45 = vadd.f32 %v6714_v36, %v2491_v12  ;;  %v2747_v36 = vpop.f32.mrf.mxu0 }
 0x513   : > { %v2563_v42 = vpop.f32.mrf.mxu3 }
 0x514   : > { %v6827_v48 = vadd.f32 %v2563_v42, %v2526_v0 }
 0x515   : > { %v2677_v4 = vpop.f32.mrf.mxu2 }
 0x516   : > { %v6829_v37 = vadd.f32 %v2677_v4, %v2640_v33  ;;  %3131 = vmax.xlane.f32.xlu1 %v6827_v48 }
 0x517   : > { %v2788_v49 = vpop.f32.mrf.mxu1 }
 0x518   : > { %3194 = vmax.xlane.f32.xlu2 %v6829_v37  ;;  %3102 = vmatmul.f32.gmra.mxu3 %v6365_v18  ;;  %v2451_v18 = vperm.slane %v6700_v13, 2 }
 0x51b   : > { %v2566_v15 = vpop.f32.mrf.mxu3 }
 0x51c   : > { %v6838_v53 = vadd.f32 %v2566_v15, %v2529_v45 }
 0x51d   : > { %v2680_v2 = vpop.f32.mrf.mxu2 }
 0x51e   : > { %v6840_v51 = vadd.f32 %v2680_v2, %v2643_v16 }
 0x51f   : > { %v2791_v19 = vpop.f32.mrf.mxu1 }
 0x520   : > { %3196 = vmax.xlane.f32.xlu0 %v6840_v51  ;;  %3133 = vmax.xlane.f32.xlu2 %v6838_v53 }
 0x521   : > { %3105 = vmatmul.f32.gmra.mxu3 %v6402_v21  ;;  %v2750_v21 = vpop.f32.mrf.mxu0 }
 0x523   : > { %v2700_v26 = vpop.f32.mrf.mxu3 }
 0x524   : > { %v2701_v54 = vadd.f32 %v2700_v26, %v2451_v18 }
 0x525   : > { %v6858_v38 = vpop.f32.mrf.mxu2 }
 0x526   : > { %v2739_v34 = vadd.f32 %v2738_v57, %v2701_v54 }
 0x527   : > { %v2794_v4 = vpop.f32.mrf.mxu1 }
 0x528   : > { %v6846_v6 = vadd.f32 %v2776_v56, %v2739_v34 }
 0x529   : > { %3108 = vmatmul.f32.gmra.mxu3 %v6425_v17  ;;  %v2753_v41 = vpop.f32.mrf.mxu0 }
 0x52a   : > { %3393 = vmax.xlane.f32.xlu0 %v6846_v6 }
 0x52b   : > { %v2703_v31 = vpop.f32.mrf.mxu3 }
 0x52c   : > { %v2704_v1 = vadd.f32 %v2703_v31, %v2451_v18 }
 0x52e   : > { %v2742_v25 = vadd.f32 %v2741_v27, %v2704_v1 }
 0x530   : > { %v6850_v11 = vadd.f32 %v2779_v10, %v2742_v25 }
 0x531   : > { %3111 = vmatmul.f32.gmra.mxu3 %v6468_v62  ;;  %v2756_v57 = vpop.f32.mrf.mxu0 }
 0x532   : > { %3395 = vmax.xlane.f32.xlu0 %v6850_v11 }
 0x533   : > { %v2706_v13 = vpop.f32.mrf.mxu3 }
 0x534   : > { %v2707_v23 = vadd.f32 %v2706_v13, %v2451_v18 }
 0x536   : > { %v2745_v30 = vadd.f32 %v2744_v55, %v2707_v23 }
 0x538   : > { %v6854_v35 = vadd.f32 %v2782_v63, %v2745_v30 }
 0x539   : > { %3114 = vmatmul.f32.gmra.mxu3 %v6513_v22  ;;  %v2913_v22 = vpop.f32.mrf.mxu2  ;;  %v2986_v0 = vpop.f32.mrf.mxu0 }
 0x53a   : > { %3397 = vmax.xlane.f32.xlu0 %v6854_v35 }
 0x53b   : > { %v2709_v17 = vpop.f32.mrf.mxu3 }
 0x53c   : > { %v2710_v50 = vadd.f32 %v2709_v17, %v2451_v18 }
 0x53e   : > { %v2748_v61 = vadd.f32 %v2747_v36, %v2710_v50 }
 0x540   : > { %v6860_v62 = vadd.f32 %v2785_v39, %v2748_v61 }
 0x541   : > { %3117 = vmatmul.f32.gmra.mxu3 %v6555_v5  ;;  %v2916_v5 = vpop.f32.mrf.mxu2  ;;  %v2989_v29 = vpop.f32.mrf.mxu0 }
 0x542   : > { %3399 = vmax.xlane.f32.xlu0 %v6860_v62 }
 0x543   : > { %v2712_v44 = vpop.f32.mrf.mxu3 }
 0x544   : > { %v2713_v14 = vadd.f32 %v2712_v44, %v2451_v18 }
 0x546   : > { %v2751_v40 = vadd.f32 %v2750_v21, %v2713_v14 }
 0x548   : > { %v6864_v9 = vadd.f32 %v2788_v49, %v2751_v40 }
 0x549   : > { %v2919_v15 = vpop.f32.mrf.mxu2  ;;  %v2992_v10 = vpop.f32.mrf.mxu0 }
 0x54a   : > { %3401 = vmax.xlane.f32.xlu0 %v6864_v9 }
 0x54b   : > { %v2715_v32 = vpop.f32.mrf.mxu3 }
 0x54c   : > { %v2716_v20 = vadd.f32 %v2715_v32, %v2451_v18 }
 0x54e   : > { %v2754_v3 = vadd.f32 %v2753_v41, %v2716_v20 }
 0x550   : > { %v6867_v58 = vadd.f32 %v2791_v19, %v2754_v3 }
 0x551   : > { %v2922_v34 = vpop.f32.mrf.mxu2  ;;  %v2995_v25 = vpop.f32.mrf.mxu0 }
 0x552   : > { %3403 = vmax.xlane.f32.xlu0 %v6867_v58 }
 0x553   : > { %v2718_v42 = vpop.f32.mrf.mxu3 }
 0x554   : > { %v2719_v33 = vadd.f32 %v2718_v42, %v2451_v18 }
 0x556   : > { %v2757_v27 = vadd.f32 %v2756_v57, %v2719_v33 }
 0x558   : > { %v6870_v12 = vadd.f32 %v2794_v4, %v2757_v27 }
 0x559   : > { %v2998_v21 = vpop.f32.mrf.mxu0 }
 0x55a   : > { %3405 = vmax.xlane.f32.xlu0 %v6870_v12 }
 0x55b   : > { %v2948_v56 = vpop.f32.mrf.mxu3 }
 0x55c   : > { %v2949_v20 = vadd.f32 %v2948_v56, %v6858_v38 }
 0x55e   : > { %v2987_v19 = vadd.f32 %v2986_v0, %v2949_v20 }
 0x561   : > { %v3122_v16 = vpop.xlane.xlu1 %3121  ;;  %v3001_v14 = vpop.f32.mrf.mxu0 }
 0x562   : > { %v3135_v45 = vsub.f32 %v6740_v43, %v3122_v16  ;;  %v2925_v43 = vpop.f32.mrf.mxu2 }
 0x563   : > { %v2951_v2 = vpop.f32.mrf.mxu3  ;;  %v3185_v55 = vpop.xlane.xlu2 %3184 }
 0x564   : > { %v3142_v26 = vmul.f32 1.442695, %v3135_v45  ;;  %v3198_v54 = vsub.f32 %v6748_v52, %v3185_v55  ;;  %v2952_v23 = vadd.f32 %v2951_v2, %v2913_v22  ;;  %v6886_v22 = vpop.f32.mrf.mxu1 }
 0x566   : > { %4049 = vpow2.f32 %v3142_v26  ;;  %v3205_v18 = vmul.f32 1.442695, %v3198_v54  ;;  %v2990_v41 = vadd.f32 %v2989_v29, %v2952_v23 }
 0x568   : > { %4051 = vpow2.f32 %v3205_v18 }
 0x569   : > { %v3004_v33 = vpop.f32.mrf.mxu0  ;;  %v3124_v45 = vpop.xlane.xlu1 %3123 }
 0x56a   : > { %v2928_v52 = vpop.f32.mrf.mxu2 }
 0x56b   : > { %v2954_v36 = vpop.f32.mrf.mxu3  ;;  %v3187_v38 = vpop.xlane.xlu2 %3186 }
 0x56c   : > { %v6875_v31 = vpop.eup %4049  ;;  %v2955_v13 = vadd.f32 %v2954_v36, %v2916_v5 }
 0x56d   : > { %3156 = vadd.xlane.f32.xlu2 %v6875_v31 }
 0x56e   : > { %v6878_v1 = vpop.eup %4051  ;;  %v2993_v17 = vadd.f32 %v2992_v10, %v2955_v13 }
 0x56f   : > { %3219 = vadd.xlane.f32.xlu0 %v6878_v1 }
 0x570   : > { %v3968_v44 = vpack.i.bf16 %v2990_v41, %v2993_v17 }
 0x571   : > { %v3126_v18 = vpop.xlane.xlu1 %3125 }
 0x572   : > { %v6882_v32 = vpop.f32.mrf.mxu2 }
 0x573   : > { %v2957_v63 = vpop.f32.mrf.mxu3  ;;  %v3189_v54 = vpop.xlane.xlu2 %3188 }
 0x574   : > { %v2958_v50 = vadd.f32 %v2957_v63, %v2919_v15  ;;  %v6891_v15 = vpop.f32.mrf.mxu1 }
 0x576   : > { %v2996_v49 = vadd.f32 %v2995_v25, %v2958_v50 }
 0x57a   : > { %v6889_v27 = vpop.f32.mrf.mxu2 }
 0x57b   : > { %v2960_v30 = vpop.f32.mrf.mxu3  ;;  %v6913_v23 = vpop.xlane.xlu2 %3190 }
 0x57c   : > { %v2961_v39 = vadd.f32 %v2960_v30, %v2922_v34  ;;  %v6900_v55 = vpop.f32.mrf.mxu1  ;;  %v3199_v34 = vsub.f32 %v6772_v28, %v3187_v38 }
 0x57e   : > { %v2999_v61 = vadd.f32 %v2998_v21, %v2961_v39  ;;  %v3207_v25 = vmul.f32 1.442695, %v3199_v34 }
 0x580   : > { %v3973_v57 = vpack.i.bf16 %v2996_v49, %v2999_v61  ;;  %4053 = vpow2.f32 %v3207_v25 }
 0x582   : > { %v6898_v2 = vpop.f32.mrf.mxu2 }
 0x583   : > { %v2963_v40 = vpop.f32.mrf.mxu3  ;;  %3969 = vrot.lane.b32.xlu0 %v3968_v44, %s4202_s18 }
 0x584   : > { %v2964_v3 = vadd.f32 %v2963_v40, %v2925_v43  ;;  %v6907_v43 = vpop.f32.mrf.mxu1 }
 0x585   : > { %3974 = vrot.lane.b32.xlu2 %v3973_v57, %s4202_s18 }
 0x586   : > { %v3002_v4 = vadd.f32 %v3001_v14, %v2964_v3  ;;  %v3193_v14 = vpop.xlane.xlu2 %3192 }
 0x58a   : > { %v6905_v36 = vpop.f32.mrf.mxu2 }
 0x58b   : > { %v2966_v5 = vpop.f32.mrf.mxu3  ;;  %3254 = vrot.lane.b32.xlu0 %v2987_v19, %s4202_s18 }
 0x58c   : > { %v2967_v42 = vadd.f32 %v2966_v5, %v2928_v52  ;;  %v3200_v52 = vsub.f32 %v6790_v7, %v3189_v54  ;;  %v3036_v44 = vpop.f32.mrf.mxu1 }
 0x58e   : > { %v3005_v29 = vadd.f32 %v3004_v33, %v2967_v42  ;;  %v3209_v39 = vmul.f32 1.442695, %v3200_v52  ;;  %v3195_v38 = vpop.xlane.xlu2 %3194 }
 0x58f   : > { %v3203_v34 = vsub.f32 %v6829_v37, %v3195_v38 }
 0x590   : > { %3364 = vmatpush.msra.mxu1 %v3005_v29  ;;  %v3978_v16 = vpack.i.bf16 %v3002_v4, %v3005_v29 }
 0x592   : > { %3979 = vrot.lane.b32.xlu1 %v3978_v16, %s4202_s18  ;;  %3365 = vmatpush.msra.mxu1 %v3002_v4  ;;  %v6915_v28 = vpop.f32.mrf.mxu2 }
 0x593   : > { %v6894_v56 = vpop.f32.mrf.mxu3  ;;  %v6896_v0 = vpop.xlane.xlu0 %3196 }
 0x594   : > { %3366 = vmatpush.msra.mxu1 %v2999_v61 }
 0x596   : > { %3367 = vmatpush.msra.mxu1 %v2996_v49 }
 0x598   : > { %3368 = vmatpush.msra.mxu1 %v2993_v17  ;;  %v3128_v17 = vpop.xlane.xlu1 %3127 }
 0x599   : > { %v3138_v7 = vsub.f32 %v6805_v24, %v3128_v17  ;;  %v3039_v24 = vpop.f32.mrf.mxu1 }
 0x59a   : > { %3369 = vmatpush.msra.mxu1 %v2990_v41  ;;  %v6919_v41 = vpop.eup %4053  ;;  %v3077_v33 = vpop.f32.mrf.mxu2 }
 0x59b   : > { %v6902_v26 = vpop.f32.mrf.mxu3  ;;  %v3148_v20 = vmul.f32 1.442695, %v3138_v7  ;;  %v3078_v37 = vadd.f32 %v3077_v33, %v3039_v24  ;;  %v3204_v7 = vsub.f32 %v6840_v51, %v6896_v0 }
 0x59c   : > { %3370 = vmatpush.msra.mxu1 %v2987_v19 }
 0x59d   : > { %v3394_v10 = vpop.xlane.xlu0 %3393  ;;  %v3217_v33 = vmul.f32 1.442695, %v3204_v7 }
 0x59e   : > { %v3407_v61 = vsub.f32 %v6846_v6, %v3394_v10  ;;  %v3136_v6 = vsub.f32 %v6769_v59, %v3124_v45 }
 0x5a0   : > { %v3414_v40 = vmul.f32 1.442695, %v3407_v61  ;;  %v3144_v4 = vmul.f32 1.442695, %v3136_v6 }
 0x5a4   : > { %v6909_v63 = vpop.f32.mrf.mxu3 }
 0x5a5   : > { %v3396_v21 = vpop.xlane.xlu0 %3395 }
 0x5a6   : > { %v3408_v13 = vsub.f32 %v6850_v11, %v3396_v21  ;;  %v3080_v21 = vpop.f32.mrf.mxu2 }
 0x5a8   : > { %v3416_v30 = vmul.f32 1.442695, %v3408_v13 }
 0x5aa   : > { %4055 = vpow2.f32 %v3416_v30  ;;  %v3042_v30 = vpop.f32.mrf.mxu1 }
 0x5ab   : > { %4057 = vpow2.f32 %v3209_v39  ;;  %v3215_v39 = vmul.f32 1.442695, %v3203_v34  ;;  %v3081_v61 = vadd.f32 %v3080_v21, %v3042_v30 }
 0x5ac   : > { %v6917_v50 = vpop.f32.mrf.mxu3  ;;  %4059 = vpow2.f32 %v3414_v40  ;;  %v3075_v40 = vadd.f32 %v6915_v28, %v3036_v44 }
 0x5ad   : > { %v3398_v49 = vpop.xlane.xlu0 %3397 }
 0x5ae   : > { %v3409_v11 = vsub.f32 %v6854_v35, %v3398_v49  ;;  %3221 = vadd.xlane.f32.xlu2 %v6919_v41  ;;  %v3202_v35 = vsub.f32 %v6818_v60, %v3193_v14  ;;  %v3137_v60 = vsub.f32 %v6787_v46, %v3126_v18 }
 0x5b0   : > { %v3418_v57 = vmul.f32 1.442695, %v3409_v11  ;;  %v6925_v19 = vpop.eup %4055  ;;  %v3213_v29 = vmul.f32 1.442695, %v3202_v35  ;;  %v3146_v52 = vmul.f32 1.442695, %v3137_v60 }
 0x5b1   : > { %v6927_v5 = vpop.eup %4057 }
 0x5b2   : > { %4061 = vpow2.f32 %v3418_v57  ;;  %v6933_v16 = vpop.eup %4059 }
 0x5b3   : > { %4063 = vpow2.f32 %v3148_v20 }
 0x5b4   : > { %v3112_v3 = vpop.f32.mrf.mxu3  ;;  %4065 = vpow2.f32 %v3144_v4 }
 0x5b5   : > { %v3400_v42 = vpop.xlane.xlu0 %3399  ;;  %3430 = vadd.xlane.f32.xlu0 %v6925_v19  ;;  %4067 = vpow2.f32 %v3213_v29 }
 0x5b6   : > { %3223 = vadd.xlane.f32.xlu2 %v6927_v5 }
 0x5b8   : > { %v6935_v54 = vpop.eup %4061 }
 0x5b9   : > { %v6938_v45 = vpop.eup %4063 }
 0x5ba   : > { %v6945_v17 = vpop.eup %4065 }
 0x5bb   : > { %v6947_v46 = vpop.eup %4067 }
 0x5bc   : > { %v3115_v59 = vpop.f32.mrf.mxu3  ;;  %3428 = vadd.xlane.f32.xlu1 %v6933_v16 }
 0x5bd   : > { %v3402_v10 = vpop.xlane.xlu0 %3401  ;;  %3432 = vadd.xlane.f32.xlu0 %v6935_v54  ;;  %v3116_v57 = vadd.f32 %v3115_v59, %v3078_v37 }
 0x5be   : > { %v3411_v25 = vsub.f32 %v6864_v9, %v3402_v10  ;;  %3162 = vadd.xlane.f32.xlu2 %v6938_v45  ;;  %v3410_v9 = vsub.f32 %v6860_v62, %v3400_v42  ;;  %v3072_v62 = vadd.f32 %v6905_v36, %v6907_v43  ;;  %v3113_v42 = vadd.f32 %v3112_v3, %v3075_v40 }
 0x5bf   : > { %v3066_v36 = vadd.f32 %v6889_v27, %v6891_v15  ;;  %v3201_v43 = vsub.f32 %v6808_v47, %v6913_v23  ;;  %v3130_v15 = vpop.xlane.xlu1 %3129 }
 0x5c0   : > { %v3422_v13 = vmul.f32 1.442695, %v3411_v25  ;;  %v3420_v35 = vmul.f32 1.442695, %v3410_v9  ;;  %v3110_v0 = vadd.f32 %v6917_v50, %v3072_v62 }
 0x5c1   : > { %v3104_v50 = vadd.f32 %v6902_v26, %v3066_v36  ;;  %v3211_v23 = vmul.f32 1.442695, %v3201_v43  ;;  %v3134_v26 = vpop.xlane.xlu2 %3133 }
 0x5c2   : > { %4069 = vpow2.f32 %v3422_v13  ;;  %v3141_v10 = vsub.f32 %v6838_v53, %v3134_v26 }
 0x5c3   : > { %4071 = vpow2.f32 %v3146_v52 }
 0x5c4   : > { %v3118_v18 = vpop.f32.mrf.mxu3  ;;  %3158 = vadd.xlane.f32.xlu1 %v6945_v17  ;;  %4073 = vpow2.f32 %v3215_v39  ;;  %v3154_v21 = vmul.f32 1.442695, %v3141_v10 }
 0x5c5   : > { %v3119_v49 = vadd.f32 %v3118_v18, %v3081_v61  ;;  %v3404_v11 = vpop.xlane.xlu0 %3403  ;;  %3227 = vadd.xlane.f32.xlu0 %v6947_v46 }
 0x5c6   : > { %v3412_v14 = vsub.f32 %v6867_v58, %v3404_v11  ;;  %v3069_v58 = vadd.f32 %v6898_v2, %v6900_v55  ;;  %v3063_v55 = vadd.f32 %v6882_v32, %v6886_v22  ;;  %v3139_v32 = vsub.f32 %v6816_v8, %v3130_v15 }
 0x5c7   : > { %3486 = vmatpush.msrb.mxu2 %v3119_v49  ;;  %v3132_v4 = vpop.xlane.xlu1 %3131 }
 0x5c8   : > { %v6956_v20 = vpop.eup %4069  ;;  %v3424_v6 = vmul.f32 1.442695, %v3412_v14  ;;  %v3107_v44 = vadd.f32 %v6909_v63, %v3069_v58  ;;  %v3101_v63 = vadd.f32 %v6894_v56, %v3063_v55  ;;  %v3150_v56 = vmul.f32 1.442695, %v3139_v32 }
 0x5c9   : > { %3487 = vmatpush.msrb.mxu2 %v3116_v57  ;;  %3436 = vadd.xlane.f32.xlu2 %v6956_v20  ;;  %v6961_v51 = vpop.eup %4071  ;;  %v3140_v38 = vsub.f32 %v6827_v48, %v3132_v4 }
 0x5ca   : > { %4075 = vpow2.f32 %v3424_v6  ;;  %v6966_v28 = vpop.eup %4073 }
 0x5cb   : > { %3488 = vmatpush.msrb.mxu2 %v3113_v42  ;;  %4077 = vpow2.f32 %v3420_v35  ;;  %v3152_v60 = vmul.f32 1.442695, %v3140_v38 }
 0x5cc   : > { %3160 = vadd.xlane.f32.xlu1 %v6961_v51  ;;  %4079 = vpow2.f32 %v3217_v33 }
 0x5cd   : > { %3489 = vmatpush.msrb.mxu2 %v3110_v0  ;;  %v3406_v3 = vpop.xlane.xlu0 %3405  ;;  %3229 = vadd.xlane.f32.xlu0 %v6966_v28 }
 0x5ce   : > { %v3413_v2 = vsub.f32 %v6870_v12, %v3406_v3 }
 0x5cf   : > { %3490 = vmatpush.msrb.mxu2 %v3107_v44 }
 0x5d0   : > { %v6979_v27 = vpop.eup %4075  ;;  %v3426_v47 = vmul.f32 1.442695, %v3413_v2 }
 0x5d1   : > { %3491 = vmatpush.msrb.mxu2 %v3104_v50  ;;  %3438 = vadd.xlane.f32.xlu2 %v6979_v27  ;;  %v6983_v24 = vpop.eup %4077 }
 0x5d2   : > { %4081 = vpow2.f32 %v3426_v47  ;;  %v6985_v12 = vpop.eup %4079 }
 0x5d3   : > { %3492 = vmatpush.msrb.mxu2 %v3101_v63  ;;  %4083 = vpow2.f32 %v3211_v23 }
 0x5d4   : > { %3434 = vadd.xlane.f32.xlu1 %v6983_v24  ;;  %4085 = vpow2.f32 %v3150_v56 }
 0x5d5   : > { %3231 = vadd.xlane.f32.xlu0 %v6985_v12 }
 0x5d8   : > { %v6990_v22 = vpop.eup %4081 }
 0x5d9   : > { %3440 = vadd.xlane.f32.xlu2 %v6990_v22  ;;  %v6993_v29 = vpop.eup %4083 }
 0x5da   : > { %v6997_v8 = vpop.eup %4085 }
 0x5dc   : > { %3225 = vadd.xlane.f32.xlu1 %v6993_v29 }
 0x5e0   : > { %v3157_v59 = vpop.xlane.xlu2 %3156 }
 0x5e1   : > { %4087 = vrcp.f32 %v3157_v59 }
 0x5e2   : > { %4089 = vpow2.f32 %v3152_v60  ;;  %v3220_v52 = vpop.xlane.xlu0 %3219 }
 0x5e3   : > { %4091 = vpow2.f32 %v3154_v21 }
 0x5e4   : > { %3164 = vadd.xlane.f32.xlu1 %v6997_v8  ;;  %4093 = vrcp.f32 %v3220_v52 }
 0x5e7   : > { %v4088_v34 = vpop.eup %4087 }
 0x5e8   : > { %v3177_v25 = vmul.f32 %v4088_v34, %v6875_v31  ;;  %v7003_v13 = vpop.eup %4089  ;;  %v3975_v61 = vpop.permute.xlu2 %3974 }
 0x5e9   : > { %v7006_v48 = vpop.eup %4091  ;;  %v3976_v31 = vunpack.i.l.bf16 %v3975_v61  ;;  %v3977_v37 = vunpack.i.h.bf16 %v3975_v61 }
 0x5ea   : > { %3904 = vmatmul.msk.f32.vlgmr.msra.gmra.mxu1 %vm1027_vm9, %v3177_v25  ;;  %v4094_v49 = vpop.eup %4093 }
 0x5eb   : > { %v3240_v7 = vmul.f32 %v4094_v49, %v6878_v1 }
 0x5ec   : > { %3166 = vadd.xlane.f32.xlu1 %v7003_v13 }
 0x5f4   : > { %3168 = vadd.xlane.f32.xlu1 %v7006_v48 }
 0x5f5   : > { %v3970_v18 = vpop.permute.xlu0 %3969 }
 0x5f6   : > { %v3971_v9 = vunpack.i.l.bf16 %v3970_v18  ;;  %v3972_v11 = vunpack.i.h.bf16 %v3970_v18 }
 0x5fd   : > { %v3255_v14 = vpop.permute.xlu0 %3254 }
 0x604   : > { %v3980_v30 = vpop.permute.xlu1 %3979 }
 0x605   : > { %v3981_v39 = vunpack.i.l.bf16 %v3980_v30  ;;  %v3982_v53 = vunpack.i.h.bf16 %v3980_v30 }
 0x607   : > { %3305 = vmatpush.msrb.mxu0 %v3981_v39 }
 0x609   : > { %3306 = vmatpush.msrb.mxu0 %v3982_v53 }
 0x60b   : > { %3307 = vmatpush.msrb.mxu0 %v3976_v31 }
 0x60d   : > { %3308 = vmatpush.msrb.mxu0 %v3977_v37 }
 0x60f   : > { %3309 = vmatpush.msrb.mxu0 %v3971_v9 }
 0x611   : > { %3310 = vmatpush.msrb.mxu0 %v3972_v11 }
 0x613   : > { %3311 = vmatpush.msrb.mxu0 %v3255_v14 }
 0x614   : > { %3897 = vmatmul.msk.f32.vlgmr.msrb.gmra.mxu0 %vm1027_vm9, %v3240_v7 }
 0x621   : > { %v3222_v40 = vpop.xlane.xlu2 %3221 }
 0x622   : > { %4095 = vrcp.f32 %v3222_v40 }
 0x628   : > { %v4096_v57 = vpop.eup %4095  ;;  %v3431_v33 = vpop.xlane.xlu0 %3430 }
 0x629   : > { %v3224_v6 = vpop.xlane.xlu2 %3223  ;;  %v3241_v62 = vmul.f32 %v4096_v57, %v6919_v41 }
 0x62a   : > { %4097 = vrcp.f32 %v3224_v6 }
 0x62b   : > { %3898 = vmatmul.msk.f32.gmra.mxu0 %vm1027_vm9, %v3241_v62 }
 0x62f   : > { %v3429_v42 = vpop.xlane.xlu1 %3428 }
 0x630   : > { %v4098_v35 = vpop.eup %4097  ;;  %4099 = vrcp.f32 %v3429_v42  ;;  %v3433_v41 = vpop.xlane.xlu0 %3432 }
 0x631   : > { %v3242_v58 = vmul.f32 %v4098_v35, %v6927_v5  ;;  %4101 = vrcp.f32 %v3431_v33  ;;  %v3163_v5 = vpop.xlane.xlu2 %3162 }
 0x633   : > { %3899 = vmatmul.msk.f32.gmra.mxu0 %vm1027_vm9, %v3242_v58 }
 0x636   : > { %v4100_v1 = vpop.eup %4099 }
 0x637   : > { %v3449_v0 = vmul.f32 %v4100_v1, %v6933_v16  ;;  %v3159_v36 = vpop.xlane.xlu1 %3158  ;;  %v4102_v43 = vpop.eup %4101 }
 0x638   : > { %4103 = vrcp.f32 %v3159_v36  ;;  %v3450_v55 = vmul.f32 %v4102_v43, %v6925_v19  ;;  %v3228_v32 = vpop.xlane.xlu0 %3227 }
 0x639   : > { %3911 = vmatmul.msk.f32.vlgmr.msrb.gmra.mxu2 %vm1027_vm9, %v3449_v0  ;;  %4105 = vrcp.f32 %v3433_v41 }
 0x63c   : > { %v3437_v63 = vpop.xlane.xlu2 %3436 }
 0x63e   : > { %v4104_v44 = vpop.eup %4103 }
 0x63f   : > { %v3161_v3 = vpop.xlane.xlu1 %3160  ;;  %v3178_v2 = vmul.f32 %v4104_v44, %v6945_v17  ;;  %v4106_v16 = vpop.eup %4105 }
 0x640   : > { %4107 = vrcp.f32 %v3161_v3  ;;  %v3451_v23 = vmul.f32 %v4106_v16, %v6935_v54  ;;  %v3230_v34 = vpop.xlane.xlu0 %3229 }
 0x641   : > { %3905 = vmatmul.msk.f32.gmra.mxu1 %vm1027_vm9, %v3178_v2  ;;  %3912 = vmatmul.msk.f32.gmra.mxu2 %vm1027_vm9, %v3450_v55  ;;  %4109 = vrcp.f32 %v3163_v5 }
 0x644   : > { %v3439_v54 = vpop.xlane.xlu2 %3438 }
 0x646   : > { %v4108_v50 = vpop.eup %4107 }
 0x647   : > { %v3435_v15 = vpop.xlane.xlu1 %3434  ;;  %v3179_v47 = vmul.f32 %v4108_v50, %v6961_v51  ;;  %v4110_v19 = vpop.eup %4109 }
 0x648   : > { %4111 = vrcp.f32 %v3435_v15  ;;  %v3180_v56 = vmul.f32 %v4110_v19, %v6938_v45 }
 0x649   : > { %3906 = vmatmul.msk.f32.gmra.mxu1 %vm1027_vm9, %v3179_v47  ;;  %3913 = vmatmul.msk.f32.gmra.mxu2 %vm1027_vm9, %v3451_v23  ;;  %4113 = vrcp.f32 %v3437_v63 }
 0x64e   : > { %v4112_v17 = vpop.eup %4111 }
 0x64f   : > { %v3226_v26 = vpop.xlane.xlu1 %3225  ;;  %v3452_v4 = vmul.f32 %v4112_v17, %v6983_v24  ;;  %v4114_v51 = vpop.eup %4113 }
 0x650   : > { %4115 = vrcp.f32 %v3226_v26  ;;  %v3453_v10 = vmul.f32 %v4114_v51, %v6956_v20  ;;  %v3441_v24 = vpop.xlane.xlu2 %3440 }
 0x651   : > { %3907 = vmatmul.msk.f32.gmra.mxu1 %vm1027_vm9, %v3180_v56  ;;  %3914 = vmatmul.msk.f32.gmra.mxu2 %vm1027_vm9, %v3452_v4  ;;  %4117 = vrcp.f32 %v3228_v32 }
 0x652   : > { %4119 = vrcp.f32 %v3439_v54 }
 0x656   : > { %v4116_v38 = vpop.eup %4115 }
 0x657   : > { %v3165_v59 = vpop.xlane.xlu1 %3164  ;;  %v3243_v60 = vmul.f32 %v4116_v38, %v6993_v29  ;;  %v4118_v45 = vpop.eup %4117 }
 0x658   : > { %4121 = vrcp.f32 %v3165_v59  ;;  %v4120_v25 = vpop.eup %4119  ;;  %v3244_v30 = vmul.f32 %v4118_v45, %v6947_v46  ;;  %v3232_v29 = vpop.xlane.xlu0 %3231 }
 0x659   : > { %3900 = vmatmul.msk.f32.gmra.mxu0 %vm1027_vm9, %v3243_v60  ;;  %3915 = vmatmul.msk.f32.gmra.mxu2 %vm1027_vm9, %v3453_v10  ;;  %4123 = vrcp.f32 %v3230_v34  ;;  %v3454_v20 = vmul.f32 %v4120_v25, %v6979_v27 }
 0x65a   : > { %4125 = vrcp.f32 %v3441_v24  ;;  %v7209_v24 = vld [vmem:[#allocation7_spill] sm:$0xff] }
 0x65b   : > { %v3527_v25 = vadd.s32 48, %v7209_v24 }
 0x65d   : > { %vm3534_vm14 = vcmp.lt.s32.totalorder %v3527_v25, 49 }
 0x65e   : > { %v4122_v21 = vpop.eup %4121 }
 0x65f   : > { %v3167_v52 = vpop.xlane.xlu1 %3166  ;;  %v3181_v39 = vmul.f32 %v4122_v21, %v6997_v8  ;;  %v4124_v61 = vpop.eup %4123 }
 0x660   : > { %4127 = vrcp.f32 %v3167_v52  ;;  %v4126_v53 = vpop.eup %4125  ;;  %v3245_v37 = vmul.f32 %v4124_v61, %v6966_v28 }
 0x661   : > { %3901 = vmatmul.msk.f32.gmra.mxu0 %vm1027_vm9, %v3244_v30  ;;  %3908 = vmatmul.msk.f32.gmra.mxu1 %vm1027_vm9, %v3181_v39  ;;  %4129 = vrcp.f32 %v3232_v29  ;;  %v3455_v8 = vmul.f32 %v4126_v53, %v6990_v22  ;;  %v7210_v53 = vmov 0.0  }
 0x662   : > { %3916 = vmatmul.msk.f32.gmra.mxu2 %vm1027_vm9, %v3454_v20 }
 0x666   : > { %v4128_v18 = vpop.eup %4127 }
 0x667   : > { %v3169_v31 = vpop.xlane.xlu1 %3168  ;;  %v3182_v46 = vmul.f32 %v4128_v18, %v7003_v13  ;;  %v4130_v27 = vpop.eup %4129  ;;  %v3918_v18 = vsel %vm3534_vm14, 1.0, %v7210_v53 }
 0x668   : > { %4131 = vrcp.f32 %v3169_v31  ;;  %v3246_v49 = vmul.f32 %v4130_v27, %v6985_v12  ;;  %v3372_v28 = vpop.f32.mrf.mxu1  ;;  %v4000_v12 = vld [vmem:[%s7172_s13] ss:$0 sm:$0xff] }
 0x669   : > { %3902 = vmatmul.msk.f32.gmra.mxu0 %vm1027_vm9, %v3245_v37  ;;  %3909 = vmatmul.msk.f32.gmra.mxu1 %vm1027_vm9, %v3182_v46 }
 0x66a   : > { %3917 = vmatmul.msk.f32.gmra.mxu2 %vm1027_vm9, %v3455_v8 }
 0x66e   : > { %v4132_v9 = vpop.eup %4131 }
 0x66f   : > { %v3183_v11 = vmul.f32 %v4132_v9, %v7006_v48 }
 0x671   : > { %3903 = vmatmul.msk.f32.gmra.mxu0 %vm1027_vm9, %v3246_v49  ;;  %3910 = vmatmul.msk.f32.gmra.mxu1 %vm1027_vm9, %v3183_v11 }
 0x691   : > { %v3313_v13 = vpop.f32.mrf.mxu0 }
 0x692   : > { %v3373_v7 = vadd.f32 %v3372_v28, %v3313_v13 }
 0x6a8   : > { %v3316_v57 = vpop.f32.mrf.mxu0 }
 0x6b0   : > { %v3319_v48 = vpop.f32.mrf.mxu0 }
 0x6bc   : > { %v3494_v22 = vpop.f32.mrf.mxu2 }
 0x6bd   : > { %v3515_v14 = vadd.f32 %v3494_v22, %v3373_v7 }
 0x6be   : > { %v3375_v40 = vpop.f32.mrf.mxu1 }
 0x6bf   : > { %v3376_v62 = vadd.f32 %v3375_v40, %v3316_v57  ;;  %v3553_v9 = vadd.f32 %v4000_v12, %v3515_v14 }
 0x6c1   : > { %v3560_v11 = vmax.f32 %v3553_v9, 0.0 }
 0x6c3   : > { %v3574_v28 = vmul.f32 %v3560_v11, %v3560_v11 }
 0x6c4   : > { %v3497_v6 = vpop.f32.mrf.mxu2 }
 0x6c5   : > { %v3516_v42 = vadd.f32 %v3497_v6, %v3376_v62 }
 0x6c6   : > { %v3378_v35 = vpop.f32.mrf.mxu1 }
 0x6c7   : > { %v3554_v33 = vadd.f32 %v4000_v12, %v3516_v42  ;;  %v3379_v58 = vadd.f32 %v3378_v35, %v3319_v48 }
 0x6c9   : > { %v7052_v36 = vmax.f32 %v3554_v33, 0.0 }
 0x6cb   : > { %v3575_v44 = vmul.f32 %v7052_v36, %v7052_v36 }
 0x6cc   : > { %v3500_v1 = vpop.f32.mrf.mxu2 }
 0x6cd   : > { %v3517_v0 = vadd.f32 %v3500_v1, %v3379_v58 }
 0x6ce   : > { %v3381_v5 = vpop.f32.mrf.mxu1 }
 0x6cf   : > { %v3555_v41 = vadd.f32 %v4000_v12, %v3517_v0 }
 0x6d1   : > { %v7054_v43 = vmax.f32 %v3555_v41, 0.0 }
 0x6d3   : > { %v3576_v3 = vmul.f32 %v7054_v43, %v7054_v43 }
 0x6d4   : > { %v3503_v2 = vpop.f32.mrf.mxu2 }
 0x6d5   : > { %v3993_v55 = vpack.i.bf16 %v3575_v44, %v3576_v3  ;;  %v7211_v44 = vld [vmem:[#allocation8_spill] sm:$0xff] }
 0x6d6   : > { %v3322_v16 = vpop.f32.mrf.mxu0 }
 0x6d7   : > { %v3382_v50 = vadd.f32 %v3381_v5, %v3322_v16  ;;  %3994 = vrot.lane.b32.xlu0 %v3993_v55, %s4202_s18 }
 0x6d9   : > { %v3518_v15 = vadd.f32 %v3503_v2, %v3382_v50  ;;  %v3665_v50 = vsel %vm3609_vm15, %v7054_v43, -inf }
 0x6db   : > { %v3556_v19 = vadd.f32 %v4000_v12, %v3518_v15 }
 0x6dc   : > { %v3506_v47 = vpop.f32.mrf.mxu2 }
 0x6dd   : > { %v7061_v26 = vmax.f32 %v3556_v19, 0.0 }
 0x6de   : > { %v3325_v23 = vpop.f32.mrf.mxu0  ;;  %v3384_v63 = vpop.f32.mrf.mxu1 }
 0x6df   : > { %v3385_v17 = vadd.f32 %v3384_v63, %v3325_v23  ;;  %v3577_v59 = vmul.f32 %v7061_v26, %v7061_v26  ;;  %v3664_v23 = vsel %vm3609_vm15, %v7052_v36, -inf }
 0x6e1   : > { %v3519_v32 = vadd.f32 %v3506_v47, %v3385_v17  ;;  %v3663_v17 = vsel %vm3609_vm15, %v3560_v11, -inf }
 0x6e3   : > { %v3557_v56 = vadd.f32 %v4000_v12, %v3519_v32  ;;  %v3666_v32 = vsel %vm3609_vm15, %v7061_v26, -inf }
 0x6e5   : > { %v7063_v4 = vmax.f32 %v3557_v56, 0.0  ;;  %v3509_v54 = vpop.f32.mrf.mxu2 }
 0x6e6   : > { %v3328_v51 = vpop.f32.mrf.mxu0  ;;  %v3387_v38 = vpop.f32.mrf.mxu1 }
 0x6e7   : > { %v3578_v60 = vmul.f32 %v7063_v4, %v7063_v4  ;;  %v3388_v10 = vadd.f32 %v3387_v38, %v3328_v51  ;;  %v3667_v63 = vsel %vm3609_vm15, %v7063_v4, -inf  ;;  %v3690_v51 = vld [vmem:[%s7173_s14 + $0x30] sm:$0xff] }
 0x6e8   : > { %v3668_v56 = vmax.f32 %v3663_v17, %v3667_v63 }
 0x6e9   : > { %v3988_v34 = vpack.i.bf16 %v3577_v59, %v3578_v60  ;;  %v3520_v45 = vadd.f32 %v3509_v54, %v3388_v10  ;;  %v3688_v60 = vld [vmem:[%s7173_s14 + $0x20] sm:$0xff]  ;;  %v3687_v10 = vld [vmem:[%s7173_s14 + $0x18] sm:$0xff] }
 0x6eb   : > { %3989 = vrot.lane.b32.xlu1 %v3988_v34, %s4202_s18  ;;  %v3558_v20 = vadd.f32 %v4000_v12, %v3520_v45 }
 0x6ed   : > { %v3512_v39 = vpop.f32.mrf.mxu2  ;;  %v3565_v31 = vmax.f32 %v3558_v20, 0.0 }
 0x6ee   : > { %v3331_v21 = vpop.f32.mrf.mxu0  ;;  %v3390_v52 = vpop.f32.mrf.mxu1 }
 0x6ef   : > { %v3391_v30 = vadd.f32 %v3390_v52, %v3331_v21  ;;  %v3579_v8 = vmul.f32 %v3565_v31, %v3565_v31  ;;  %v3669_v15 = vsel %vm3609_vm15, %v3565_v31, -inf  ;;  %v3686_v21 = vld [vmem:[%s7173_s14 + $0x10] sm:$0xff] }
 0x6f0   : > { %v3670_v19 = vmax.f32 %v3664_v23, %v3669_v15 }
 0x6f1   : > { %v3521_v29 = vadd.f32 %v3512_v39, %v3391_v30  ;;  %v3685_v30 = vld [vmem:[%s7173_s14 + $0x8] sm:$0xff] }
 0x6f2   : > { %v3673_v38 = vmax.f32 %v3668_v56, %v3670_v19 }
 0x6f3   : > { %v3559_v61 = vadd.f32 %v4000_v12, %v3521_v29  ;;  %v3684_v29 = vld [vmem:[%s7173_s14] sm:$0xff] }
 0x6f5   : > { %v3566_v37 = vmax.f32 %v3559_v61, 0.0 }
 0x6f7   : > { %v3573_v46 = vmul.f32 %v3918_v18, %v3566_v37 }
 0x6f9   : > { %v3580_v27 = vmul.f32 %v3573_v46, %v3573_v46  ;;  %v3671_v16 = vsel %vm3609_vm15, %v3573_v46, -inf }
 0x6fa   : > { %v3672_v47 = vmax.f32 %v3665_v50, %v3671_v16 }
 0x6fb   : > { %v3983_v49 = vpack.i.bf16 %v3579_v8, %v3580_v27 }
 0x6fc   : > { %v3674_v54 = vmax.f32 %v3672_v47, %v3666_v32 }
 0x6fd   : > { %3984 = vrot.lane.b32.xlu2 %v3983_v49, %s4202_s18 }
 0x6fe   : > { %v3675_v59 = vmax.f32 %v3673_v38, %v3674_v54 }
 0x700   : > { %v3676_v45 = vrot.slane %v3675_v59, 4 }
 0x702   : > { %v3677_v39 = vmax.f32 %v3675_v59, %v3676_v45 }
 0x704   : > { %v3678_v61 = vrot.slane %v3677_v39, 2 }
 0x705   : > { %3588 = vrot.lane.b32.xlu2 %v3574_v28, %s4202_s18 }
 0x706   : > { %v3679_v18 = vmax.f32 %v3677_v39, %v3678_v61 }
 0x749   : > { %v3995_v6 = vpop.permute.xlu0 %3994 }
 0x74a   : > { %v3996_v35 = vunpack.i.l.bf16 %v3995_v6  ;;  %v3997_v48 = vunpack.i.h.bf16 %v3995_v6 }
 0x74c   : > { %v3612_v58 = vsel %vm3609_vm15, %v7054_v43, %v3996_v35  ;;  %v3611_v0 = vsel %vm3609_vm15, %v7052_v36, %v3997_v48  ;;  %v3691_v43 = vld [vmem:[%s7173_s14 + $0x38] sm:$0xff] }
 0x757   : > { %v3985_v13 = vpop.permute.xlu2 %3984 }
 0x758   : > { %v3987_v7 = vunpack.i.h.bf16 %v3985_v13  ;;  %v3986_v22 = vunpack.i.l.bf16 %v3985_v13 }
 0x75a   : > { %v3616_v40 = vsel %vm3609_vm15, %v3573_v46, %v3986_v22  ;;  %v3615_v57 = vsel %vm3609_vm15, %v3565_v31, %v3987_v7  ;;  %v3680_v46 = vrot.slane %v3679_v18, 1  ;;  %v3692_v7 = vld [vmem:[%s7174_s15] sm:$0x1] }
 0x75b   : > { %3626 = vmatpush.msrb.mxu3 %v3616_v40 }
 0x75c   : > { %v3681_v9 = vmax.f32 %v3679_v18, %v3680_v46 }
 0x75d   : > { %v3990_v62 = vpop.permute.xlu1 %3989  ;;  %3627 = vmatpush.msrb.mxu3 %v3615_v57 }
 0x75e   : > { %v3992_v14 = vunpack.i.h.bf16 %v3990_v62  ;;  %v3991_v42 = vunpack.i.l.bf16 %v3990_v62 }
 0x75f   : > { %v3589_v1 = vpop.permute.xlu2 %3588 }
 0x760   : > { %v3614_v12 = vsel %vm3609_vm15, %v7063_v4, %v3991_v42  ;;  %v3613_v33 = vsel %vm3609_vm15, %v7061_v26, %v3992_v14  ;;  %v3610_v41 = vsel %vm3609_vm15, %v3560_v11, %v3589_v1  ;;  %v3689_v4 = vld [vmem:[%s7173_s14 + $0x28] sm:$0xff] }
 0x761   : > { %3628 = vmatpush.msrb.mxu3 %v3614_v12 }
 0x763   : > { %3629 = vmatpush.msrb.mxu3 %v3613_v33 }
 0x765   : > { %3630 = vmatpush.msrb.mxu3 %v3612_v58 }
 0x767   : > { %3631 = vmatpush.msrb.mxu3 %v3611_v0 }
 0x769   : > { %3632 = vmatpush.msrb.mxu3 %v3610_v41 }
 0x76a   : > { %3919 = vmatmul.msk.f32.vlgmr.msrb.gmra.mxu3 %vm1027_vm9, %v7211_v44 }
 0x76b   : > { %3704 = vmatpush.msra.mxu3 %v3691_v43 }
 0x76d   : > { %3705 = vmatpush.msra.mxu3 %v3690_v51 }
 0x76f   : > { %3706 = vmatpush.msra.mxu3 %v3689_v4 }
 0x771   : > { %3707 = vmatpush.msra.mxu3 %v3688_v60 }
 0x773   : > { %3708 = vmatpush.msra.mxu3 %v3687_v10 }
 0x775   : > { %3709 = vmatpush.msra.mxu3 %v3686_v21 }
 0x777   : > { %3710 = vmatpush.msra.mxu3 %v3685_v30 }
 0x779   : > { %3711 = vmatpush.msra.mxu3 %v3684_v29 }
 0x7ed   : > { %v3634_v3 = vpop.f32.mrf.mxu3 }
 0x7ee   : > { %3643 = vrot.lane.b32.xlu0 %v3634_v3, %s4202_s18  ;;  %v3638_v2 = vsel %vm3637_vm0, %v3634_v3, 0.0  ;;  %s4153_s18 = scalar_lea.hbm %s4152_s23, 1 }
 0x7ef   : > { %3639 = vadd.xlane.f32.xlu1 %v3638_v2  ;;  %p4154_p11 = scmp.ne.s32.totalorder %s4152_s23, %s4153_s18  ;;  %p4159_p1 = scmp.lt.s32.totalorder %s4157_s20, %s4153_s18 }
 0x7f1   : > { %p4155_p12 = pnand %p4154_p11, %p4326_p5  ;;  %p4160_p2 = por %p4159_p1, %p4158_p0 }
 0x7f3   : > { %p4156_p13 = pneg %p4155_p12 }
 0x7f5   : > { %p4161_p3 = pnand %p4160_p2, %p4156_p13 }
 0x860   : > { %v3644_v55 = vpop.permute.xlu0 %3643 }
 0x861   : > { %v3646_v5 = vsel %vm3637_vm0, %v3644_v55, 0.0 }
 0x862   : > { %3647 = vadd.xlane.f32.xlu2 %v3646_v5  ;;  %v3640_v36 = vpop.xlane.xlu1 %3639 }
 0x863   : > { %v3641_v26 = vmul.f32 0.00031887754, %v3640_v36 }
 0x865   : > { %v3650_v24 = vmul.f32 %v3641_v26, %v3641_v26  ;;  %v3682_v11 = vsub.f32 %v3681_v9, %v3641_v26 }
 0x8d5   : > { %v3648_v34 = vpop.xlane.xlu2 %3647 }
 0x8d6   : > { %v3649_v25 = vmul.f32 0.00031887754, %v3648_v34 }
 0x8d8   : > { %v3651_v52 = vsub.f32 %v3649_v25, %v3650_v24 }
 0x8da   : > { %v3652_v20 = vadd.f32 1e-05, %v3651_v52 }
 0x8dc   : > { %4133 = vrsqrt.f32 %v3652_v20  ;;  %vm3659_vm1 = vweird.f32 %v3652_v20 }
 0x8e2   : > { %v4134_v53 = vpop.eup %4133 }
 0x8e3   : > { %v3654_v31 = vmul.f32 %v4134_v53, %v3652_v20  ;;  %vm3660_vm9 = vweird.f32 %v4134_v53 }
 0x8e4   : > { %vm3661_vm2 = vmor %vm3659_vm1, %vm3660_vm9 }
 0x8e5   : > { %v3655_v37 = vmul.f32 %v4134_v53, %v3654_v31 }
 0x8e7   : > { %v3656_v8 = vmul.f32 0.5, %v3655_v37 }
 0x8e9   : > { %v3657_v27 = vsub.f32 1.5, %v3656_v8 }
 0x8eb   : > { %v3658_v49 = vmul.f32 %v4134_v53, %v3657_v27 }
 0x8ed   : > { %v3662_v28 = vsel %vm3661_vm2, %v4134_v53, %v3658_v49 }
 0x8ee   : > { %v3683_v13 = vmul.f32 %v3682_v11, %v3662_v28 }
 0x8f0   : > { %3920 = vmatmul.msk.f32.vlgmr.msra.gmra.mxu3 %vm3609_vm15, %v3683_v13 }
 0x973   : > { %v3713_v22 = vpop.f32.mrf.mxu3 }
 0x974   : > { %v3714_v40 = vadd.f32 %v3713_v22, %v3692_v7 }
 0x976   : > { %v3717_v57 = vmin.f32 %v3714_v40, 0.0  ;;  %vm3716_vm3 = vcmp.gt.f32.partialorder %v3714_v40, 0.0 }
 0x978   : > { %v3718_v6 = vmul.f32 1.442695, %v3717_v57 }
 0x97a   : > { %4135 = vpow2.f32 %v3718_v6 }
 0x980   : > { %v4136_v62 = vpop.eup %4135 }
 0x981   : > { %v3921_v14 = vadd.f32 -1.0, %v4136_v62 }
 0x983   : > { %v3721_v42 = vsel %vm3716_vm3, %v3714_v40, %v3921_v14 }
 0x984   : > { %3722 = vst [vmem:[%s514_s28] sm:$0x1] %v3721_v42 }
 0x985   : > { %4164 = shalt.err (!%p4161_p3)
}
 0x986   : > { %3927 = dma.vmem_to_hbm [thread:$0]  (%p4326_p5), %s3735_s29, 16, %s3737_s1, %s3724_s2  }
 0x987 PF: > { %p3933_p4 = scmp.ge.s32.totalorder %s4199_s24, 2  ;;  %s3748_s19 = sand.u32 1, %s4187_s21  }
 0x988   : > { %s3749_s28 = scalar_lea.sflag [#allocation3], %s3748_s19 }
 0x989   : > { %p3930_p7 = pnand %p3933_p4, %p4330_p6 }
 0x98b   : > { %p3931_p8 = pneg %p3930_p7 }
 0x98d   : > { %4182 = dma.done.wait (%p3931_p8), %s3749_s28, 16  }
 0x98e   : > { %4184 = vsyncadd (%p3931_p8), %s3749_s28, 4294967280  ;;  %s7212_s3 = sld [smem:[#allocation5_spill]]  ;;  %p26_p9 = scmp.ge.s32.totalorder %s4313_s27, 4  }
 0x98f   : > { %s7213_s23 = sld [smem:[#allocation6_spill]]  ;;  %s7214_s21 = smov %s4191_s22 }
 0x990   : > { %s7216_s24 = smov %s4313_s27  ;;  %28 = sbr.rel (!%p26_p9) target bundleno = 8 (0x8), region = 119 }
 0x994   : > { %s7215_s22 = smov %s7212_s3 }
 0x995   :  { %3754 = vsyncpa [#allocation3], 1 }
 0x996   :  { %3756 = vsyncpa [#allocation3 + $0x1], 1 }

</bundles_post_ra>
